<compile_context>
chip_gen: v7x
topology: tpu7x:2x2x1
jax: 0.10.0
libtpu: 0.0.40
codegen_flags: <defaults>
</compile_context>

<pallas_src>
import jax
import jax.numpy as jnp
from jax.experimental import pallas as pl
from jax.experimental.pallas import tpu as pltpu

C_IN, H_IN, W_IN = 4, 84, 84          # Atari frame stack -> 64*7*7 = 3136 after the convs
NUM_ACTIONS = 6
HIDDEN_DIM = 32
CONV_OUT = 3136                        # 64 * 7 * 7
CONV3_K = 3 * 3 * 64                   # 576
CONV3_K_PAD = 640                      # next multiple of 128
VMEM_LIMIT = 32 * 1024 * 1024          # explicit scoped-VMEM limit (>= all gen defaults, < v7x phys)
CONV_VMEM_BUDGET = 8 * 1024 * 1024     # target double-buffered in+out bytes per conv grid step


# ----------------------------- tiling helpers ---------------------------------


def _row_tiling(m, cap):
    """Row tile (multiple of 8), grid steps, padded M.

    Targets >= 2 grid steps (v7x has 2 TensorCores) while keeping blocks as large as
    `cap` allows (per-grid-step overhead ~0.35us, bigger blocks -> closer to roofline).
    """
    half = -(-m // 2)
    tm = max(8, min(cap, -(-half // 8) * 8))
    m_pad = -(-m // tm) * tm
    return tm, m_pad // tm, m_pad


def _conv_row_cap(kk, o, budget=CONV_VMEM_BUDGET):
    """Largest row tile whose double-buffered bf16 in+out blocks fit the VMEM budget."""
    per_row = 2 * 2 * (kk + o)          # 2 bytes * 2 buffers * (patch row + out row)
    return max(256, (budget // per_row) // 8 * 8)


# ------------------- merged conv matmul (im2col rows -> MXU) -------------------


def _mm_bias_relu_kernel(x_ref, w_ref, b_ref, o_ref):
    y = jnp.dot(x_ref[...], w_ref[...], preferred_element_type=jnp.float32)
    o_ref[...] = jnp.maximum(y + b_ref[...], 0.0).astype(o_ref.dtype)


def _matmul_bias_relu(x, w, b, *, tm, steps, out_dtype):
    m, kk = x.shape
    o = w.shape[1]
    cost = pl.CostEstimate(
        flops=2 * m * kk * o,
        transcendentals=0,
        bytes_accessed=2 * (m * kk + kk * o + m * o) + 4 * o)
    return pl.pallas_call(
        _mm_bias_relu_kernel,
        out_shape=jax.ShapeDtypeStruct((m, o), out_dtype),
        grid_spec=pltpu.PrefetchScalarGridSpec(
            num_scalar_prefetch=0,
            grid=(steps,),
            in_specs=[
                pl.BlockSpec((tm, kk), lambda i: (i, 0)),
                pl.BlockSpec((kk, o), lambda i: (0, 0)),
                pl.BlockSpec((1, o), lambda i: (0, 0)),
            ],
            out_specs=pl.BlockSpec((tm, o), lambda i: (i, 0)),
        ),
        compiler_params=pltpu.CompilerParams(
            dimension_semantics=("parallel",), vmem_limit_bytes=VMEM_LIMIT),
        cost_estimate=cost,
    )(x, w, b)


def _im2col_nhwc(x, k, s):
    """x: (N, H, W, C) -> (N, Ho*Wo, k*k*C), feature order (kh, kw, c); transpose-free."""
    n, h, w, c = x.shape
    ho = (h - k) // s + 1
    wo = (w - k) // s + 1
    cols = [x[:, dh:dh + s * ho:s, dw:dw + s * wo:s, :]
            for dh in range(k) for dw in range(k)]
    patches = jnp.concatenate(cols, axis=-1)               # (N, Ho, Wo, k*k*C)
    return patches.reshape(n, ho * wo, k * k * c), ho, wo


def conv2d_relu(x, w_mat, b, *, k, s, k_pad=None):
    """x: (N,H,W,C) bf16, w_mat: (Kp,O) bf16, b: (1,O) f32 -> (N,Ho,Wo,O) bf16."""
    # TODO(synk): im2col still runs XLA-side (strided slices + concat); an in-kernel
    # im2col would cut conv HBM traffic another ~2-3x but relies on Mosaic strided-slice
    # lowering, so it is left out to keep the kernel guaranteed-compiling.
    patches, ho, wo = _im2col_nhwc(x, k, s)
    n, p, kk = patches.shape
    if k_pad is not None and k_pad > kk:
        patches = jnp.pad(patches, ((0, 0), (0, 0), (0, k_pad - kk)))
        kk = k_pad
    o = w_mat.shape[1]
    m = n * p
    flat = patches.reshape(m, kk)                           # one lane-dense (N*P, K) slab
    tm, steps, m_pad = _row_tiling(m, _conv_row_cap(kk, o))
    if m_pad > m:
        flat = jnp.pad(flat, ((0, m_pad - m), (0, 0)))      # zero rows, sliced off below
    out = _matmul_bias_relu(flat, w_mat, b, tm=tm, steps=steps, out_dtype=jnp.bfloat16)
    return out[:m].reshape(n, ho, wo, o)


# ----------------------------- fused torso FC (fc1->relu->fc2->relu) ----------


def _torso_fc_kernel(x_ref, w1_ref, b1_ref, w2_ref, b2_ref, o_ref):
    h = jnp.dot(x_ref[...], w1_ref[...], preferred_element_type=jnp.float32)
    h = jnp.maximum(h + b1_ref[...], 0.0)
    h = jnp.dot(h.astype(jnp.bfloat16), w2_ref[...], preferred_element_type=jnp.float32)
    o_ref[...] = jnp.maximum(h + b2_ref[...], 0.0)


def torso_fc(flat, w1, b1, w2, b2):
    m, kk = flat.shape
    nh = w1.shape[1]
    tm, steps, m_pad = _row_tiling(m, cap=512)
    if m_pad > m:
        flat = jnp.pad(flat, ((0, m_pad - m), (0, 0)))
    cost = pl.CostEstimate(
        flops=2 * m_pad * kk * nh + 2 * m_pad * nh * nh,
        transcendentals=0,
        bytes_accessed=2 * (m_pad * kk + kk * nh + nh * nh) + 4 * m_pad * nh)
    out = pl.pallas_call(
        _torso_fc_kernel,
        out_shape=jax.ShapeDtypeStruct((m_pad, nh), jnp.float32),
        grid_spec=pltpu.PrefetchScalarGridSpec(
            num_scalar_prefetch=0,
            grid=(steps,),
            in_specs=[
                pl.BlockSpec((tm, kk), lambda i: (i, 0)),
                pl.BlockSpec((kk, nh), lambda i: (0, 0)),
                pl.BlockSpec((1, nh), lambda i: (0, 0)),
                pl.BlockSpec((nh, nh), lambda i: (0, 0)),
                pl.BlockSpec((1, nh), lambda i: (0, 0)),
            ],
            out_specs=pl.BlockSpec((tm, nh), lambda i: (i, 0)),
        ),
        compiler_params=pltpu.CompilerParams(
            dimension_semantics=("parallel",), vmem_limit_bytes=VMEM_LIMIT),
        cost_estimate=cost,
    )(flat, w1, b1, w2, b2)
    return out[:m]


# --------- fused prediction head (fc1->relu->fc2->relu->+residual->reward) ------


def _pred_head_kernel(x_ref, res_ref, w1_ref, b1_ref, w2_ref, b2_ref, wr_ref, br_ref,
                      o_ref):
    nh = res_ref.shape[1]
    h = jnp.dot(x_ref[...], w1_ref[...], preferred_element_type=jnp.float32)
    h = jnp.maximum(h + b1_ref[...], 0.0)
    h = jnp.dot(h.astype(jnp.bfloat16), w2_ref[...], preferred_element_type=jnp.float32)
    h = jnp.maximum(h + b2_ref[...], 0.0)
    st = h + res_ref[...]
    rw = jnp.dot(st.astype(jnp.bfloat16), wr_ref[...], preferred_element_type=jnp.float32)
    # Single (tm, 2*nh) output: cols [0, nh) = st, col nh = reward (rest of rw is zero
    # because the reward weights/bias are zero-padded to width nh).
    o_ref[:, :nh] = st
    o_ref[:, nh:] = rw + br_ref[...]


def pred_head(st_in, obs_st, params):
    m, d_in = st_in.shape
    nh = HIDDEN_DIM
    tm, steps, m_pad = _row_tiling(m, cap=1024)
    x = st_in.astype(jnp.bfloat16)
    res = obs_st
    if m_pad > m:
        x = jnp.pad(x, ((0, m_pad - m), (0, 0)))
        res = jnp.pad(res, ((0, m_pad - m), (0, 0)))
    out = pl.pallas_call(
        _pred_head_kernel,
        out_shape=jax.ShapeDtypeStruct((m_pad, 2 * nh), jnp.float32),
        grid_spec=pltpu.PrefetchScalarGridSpec(
            num_scalar_prefetch=0,
            grid=(steps,),
            in_specs=[
                pl.BlockSpec((tm, d_in), lambda i: (i, 0)),
                pl.BlockSpec((tm, nh), lambda i: (i, 0)),
                pl.BlockSpec((d_in, nh), lambda i: (0, 0)),
                pl.BlockSpec((1, nh), lambda i: (0, 0)),
                pl.BlockSpec((nh, nh), lambda i: (0, 0)),
                pl.BlockSpec((1, nh), lambda i: (0, 0)),
                pl.BlockSpec((nh, nh), lambda i: (0, 0)),
                pl.BlockSpec((1, nh), lambda i: (0, 0)),
            ],
            out_specs=pl.BlockSpec((tm, 2 * nh), lambda i: (i, 0)),
        ),
        compiler_params=pltpu.CompilerParams(
            dimension_semantics=("parallel",), vmem_limit_bytes=VMEM_LIMIT),
    )(x, res, params["pfc1_w"], params["pfc1_b"], params["pfc2_w"], params["pfc2_b"],
      params["rw_w"], params["rw_b"])
    st = out[:m, :nh]
    reward = out[:m, nh]
    return st, reward


# ----------------------------- params ------------------------------------------


def init_params(key):
    def uniform(k, fan_in, shape):
        lim = 1.0 / jnp.sqrt(jnp.float32(fan_in))
        return jax.random.uniform(k, shape, jnp.float32, -lim, lim)

    def conv_pack(w_ockk, scale=1.0):
        # torch (O, C, kh, kw) -> matmul layout (kh*kw*C, O) matching NHWC im2col order
        o, c, kh, kw = w_ockk.shape
        w = jnp.transpose(w_ockk, (2, 3, 1, 0)).reshape(kh * kw * c, o)
        return (w * scale).astype(jnp.bfloat16)

    keys = jax.random.split(key, 16)
    p = {}
    w1 = uniform(keys[0], C_IN * 8 * 8, (32, C_IN, 8, 8))
    p["conv1_w"] = conv_pack(w1, scale=1.0 / 255.0)            # fold the /255 pixel scale
    p["conv1_b"] = uniform(keys[1], C_IN * 8 * 8, (1, 32))
    w2 = uniform(keys[2], 32 * 4 * 4, (64, 32, 4, 4))
    p["conv2_w"] = conv_pack(w2)
    p["conv2_b"] = uniform(keys[3], 32 * 4 * 4, (1, 64))
    w3 = uniform(keys[4], 64 * 3 * 3, (64, 64, 3, 3))
    p["conv3_w"] = jnp.pad(conv_pack(w3), ((0, CONV3_K_PAD - CONV3_K), (0, 0)))  # K 576->640
    p["conv3_b"] = uniform(keys[5], 64 * 3 * 3, (1, 64))

    # torso fc: Linear(3136, h) -> ReLU -> Linear(h, h) -> ReLU.
    # tfc1 rows are permuted from the PyTorch NCHW flatten order (c*49 + p) to the
    # NHWC flatten order (p*64 + c) produced by the conv pipeline above.
    tfc1 = uniform(keys[6], CONV_OUT, (CONV_OUT, HIDDEN_DIM))
    p["tfc1_w"] = (tfc1.reshape(64, 49, HIDDEN_DIM).transpose(1, 0, 2)
                   .reshape(CONV_OUT, HIDDEN_DIM).astype(jnp.bfloat16))
    p["tfc1_b"] = uniform(keys[7], CONV_OUT, (1, HIDDEN_DIM))
    p["tfc2_w"] = uniform(keys[8], HIDDEN_DIM, (HIDDEN_DIM, HIDDEN_DIM)).astype(jnp.bfloat16)
    p["tfc2_b"] = uniform(keys[9], HIDDEN_DIM, (1, HIDDEN_DIM))

    # prediction fc: Linear(h + A + 1, h) -> ReLU -> Linear(h, h) -> ReLU, reward head.
    in_dim = HIDDEN_DIM + NUM_ACTIONS + 1
    p["pfc1_w"] = uniform(keys[10], in_dim, (in_dim, HIDDEN_DIM)).astype(jnp.bfloat16)
    p["pfc1_b"] = uniform(keys[11], in_dim, (1, HIDDEN_DIM))
    p["pfc2_w"] = uniform(keys[12], HIDDEN_DIM, (HIDDEN_DIM, HIDDEN_DIM)).astype(jnp.bfloat16)
    p["pfc2_b"] = uniform(keys[13], HIDDEN_DIM, (1, HIDDEN_DIM))
    # reward head zero-padded to width h so the fused head emits one lane-dense output.
    rw_w = uniform(keys[14], HIDDEN_DIM, (HIDDEN_DIM, 1))
    p["rw_w"] = jnp.pad(rw_w, ((0, 0), (0, HIDDEN_DIM - 1))).astype(jnp.bfloat16)
    rw_b = uniform(keys[15], HIDDEN_DIM, (1, 1))
    p["rw_b"] = jnp.pad(rw_b, ((0, 0), (0, HIDDEN_DIM - 1)))
    return p


# ----------------------------- model --------------------------------------------


def atari_torso(params, x_nhwc):
    """x_nhwc: (N, 84, 84, C) bf16 raw pixel values.  Returns (N, h) f32."""
    x = conv2d_relu(x_nhwc, params["conv1_w"], params["conv1_b"], k=8, s=4)
    x = conv2d_relu(x, params["conv2_w"], params["conv2_b"], k=4, s=2)
    x = conv2d_relu(x, params["conv3_w"], params["conv3_b"], k=3, s=1, k_pad=CONV3_K_PAD)
    flat = x.reshape(x.shape[0], -1)            # NHWC flatten; tfc1_w rows pre-permuted
    return torso_fc(flat, params["tfc1_w"], params["tfc1_b"],
                    params["tfc2_w"], params["tfc2_b"])


def prediction_model_forward(params, frame, action, done):
    """Mirror of PredictionModel.forward (version=1, predict_items={'reward': ()},
    last_obs=None -> shifted frames, 'frame' not in predict_items => next_obs_mask == 1).

    frame: (T, B, C, 84, 84) uint8, action: (T, B) int32, done: (T, B) bool.
    Returns (reward (T,B), obs_st (T,B,h), st (T,B,h)).
    """
    t, b = action.shape
    h_dim, hh = HIDDEN_DIM, HIDDEN_DIM // 2
    n = t * b

    # torso(last_obs) == torso(frame) shifted by one step in T (torso(zeros) at t=0),
    # so the conv torso runs only once on the T*B frames plus ONE zero image (row n).
    x = frame.reshape(n, C_IN, H_IN, W_IN)
    x = jnp.transpose(x, (0, 2, 3, 1)).astype(jnp.bfloat16)     # NHWC, raw 0..255 values
    x = jnp.pad(x, ((0, 1), (0, 0), (0, 0), (0, 0)))            # append the zero image

    feat = atari_torso(params, x)                               # (n+1, h) f32
    frame_feat = feat[:n].reshape(t, b, h_dim)                  # torso(frame)
    zero_feat = feat[n]                                         # torso(zero image)
    last_feat = jnp.concatenate(
        [jnp.broadcast_to(zero_feat[None, None, :], (1, b, h_dim)), frame_feat[:-1]],
        axis=0)                                                 # torso(last_obs)

    done_f = done.astype(jnp.float32)
    obs_st = jnp.concatenate(
        [(1.0 - done_f)[:, :, None] * frame_feat[:, :, :hh], last_feat[:, :, hh:]],
        axis=2).reshape(n, h_dim)

    one_hot_action = jax.nn.one_hot(action.reshape(n), NUM_ACTIONS, dtype=jnp.float32)
    st_in = jnp.concatenate([obs_st, one_hot_action, done_f.reshape(n, 1)], axis=1)

    st, reward = pred_head(st_in, obs_st, params)
    # TODO(synk): version=2 ModuleDict heads and the nethack obs-key branch are config
    # paths not exercised here (version=1, Atari); structure is identical (extra Linears).
    return reward.reshape(t, b), obs_st.reshape(t, b, h_dim), st.reshape(t, b, h_dim)


# ----------------------------- main ----------------------------------------------

if __name__ == "__main__":
    T, B = 2, 2
    key = jax.random.PRNGKey(0)
    k_param, k_frame, k_act, k_done = jax.random.split(key, 4)

    params = init_params(k_param)

    frame = jax.random.randint(
        k_frame, (T, B, C_IN, H_IN, W_IN), 0, 256, dtype=jnp.int32
    ).astype(jnp.uint8)
    action = jax.random.randint(k_act, (T, B), 0, NUM_ACTIONS, dtype=jnp.int32)
    done = jax.random.bernoulli(k_done, 0.3, (T, B))

    fwd = jax.jit(prediction_model_forward)
    reward, obs_st, st = fwd(params, frame, action, done)
    jax.block_until_ready((reward, obs_st, st))

    assert reward.shape == (T, B)
    assert obs_st.shape == (T, B, HIDDEN_DIM)
    assert st.shape == (T, B, HIDDEN_DIM)
    print("KERNEL_OK")
</pallas_src>

<mosaic_0001>
module attributes {stable_mosaic.version = 11 : i64} {
  func.func @_mm_bias_relu_kernel(%arg0: i32, %arg1: memref<1000x256xbf16, #tpu.memory_space<vmem>>, %arg2: memref<256x32xbf16, #tpu.memory_space<vmem>>, %arg3: memref<1x32xf32, #tpu.memory_space<vmem>>, %arg4: memref<1000x32xbf16, #tpu.memory_space<vmem>>) attributes {dimension_semantics = [#tpu.dimension_semantics<parallel>], iteration_bounds = array<i64: 2>, scalar_prefetch = 0 : i64, scratch_operands = 0 : i64, tpu.core_type = #tpu.core_type<tc>, window_params = [{transform_indices = @transform_0, window_bounds = array<i64: 1000, 256>}, {pipeline_mode = #tpu.pipeline_mode<synchronous>, transform_indices = @transform_1, window_bounds = array<i64: 256, 32>}, {pipeline_mode = #tpu.pipeline_mode<synchronous>, transform_indices = @transform_2, window_bounds = array<i64: 1, 32>}, {transform_indices = @transform_3, window_bounds = array<i64: 1000, 32>}]} {
    %c0 = arith.constant 0 : index
    %c0_0 = arith.constant 0 : index
    %0 = vector.load %arg1[%c0, %c0_0] : memref<1000x256xbf16, #tpu.memory_space<vmem>>, vector<1000x256xbf16>
    %c0_1 = arith.constant 0 : index
    %c0_2 = arith.constant 0 : index
    %1 = vector.load %arg2[%c0_1, %c0_2] : memref<256x32xbf16, #tpu.memory_space<vmem>>, vector<256x32xbf16>
    %cst = arith.constant dense<0.000000e+00> : vector<1000x32xf32>
    %2 = tpu.matmul %0, %1, %cst {dimension_numbers = #tpu.dot_dimension_numbers<[1], [0], [0], [1], [0, 0, 1, 1], [], []>} : vector<1000x256xbf16>, vector<256x32xbf16>, vector<1000x32xf32> -> vector<1000x32xf32>
    %c0_3 = arith.constant 0 : index
    %c0_4 = arith.constant 0 : index
    %3 = vector.load %arg3[%c0_3, %c0_4] : memref<1x32xf32, #tpu.memory_space<vmem>>, vector<1x32xf32>
    %4 = vector.broadcast %3 : vector<1x32xf32> to vector<1000x32xf32>
    %5 = arith.addf %2, %4 : vector<1000x32xf32>
    %cst_5 = arith.constant 0.000000e+00 : f32
    %6 = vector.broadcast %cst_5 : f32 to vector<1000x32xf32>
    %7 = arith.maximumf %5, %6 : vector<1000x32xf32>
    %8 = arith.truncf %7 : vector<1000x32xf32> to vector<1000x32xbf16>
    %c0_6 = arith.constant 0 : index
    %c0_7 = arith.constant 0 : index
    %9 = vector.load %arg4[%c0_6, %c0_7] : memref<1000x32xbf16, #tpu.memory_space<vmem>>, vector<1000x32xbf16>
    tpu.vector_store %arg4[%c0_6, %c0_7], %8 {strides = array<i32>} : memref<1000x32xbf16, #tpu.memory_space<vmem>>, vector<1000x32xbf16>,
    return
  }
  func.func @transform_0(%arg0: i32) -> (i32, i32) {
    %c0_i32 = arith.constant 0 : i32
    %c0_i32_0 = arith.constant 0 : i32
    return %arg0, %c0_i32 : i32, i32
  }
  func.func @transform_1(%arg0: i32) -> (i32, i32) {
    %c0_i32 = arith.constant 0 : i32
    %c0_i32_0 = arith.constant 0 : i32
    %c0_i32_1 = arith.constant 0 : i32
    return %c0_i32, %c0_i32_0 : i32, i32
  }
  func.func @transform_2(%arg0: i32) -> (i32, i32) {
    %c0_i32 = arith.constant 0 : i32
    %c0_i32_0 = arith.constant 0 : i32
    %c0_i32_1 = arith.constant 0 : i32
    return %c0_i32, %c0_i32_0 : i32, i32
  }
  func.func @transform_3(%arg0: i32) -> (i32, i32) {
    %c0_i32 = arith.constant 0 : i32
    %c0_i32_0 = arith.constant 0 : i32
    return %arg0, %c0_i32 : i32, i32
  }
}

module attributes {stable_mosaic.version = 11 : i64} {
  func.func @_mm_bias_relu_kernel(%arg0: i32, %arg1: memref<208x512xbf16, #tpu.memory_space<vmem>>, %arg2: memref<512x64xbf16, #tpu.memory_space<vmem>>, %arg3: memref<1x64xf32, #tpu.memory_space<vmem>>, %arg4: memref<208x64xbf16, #tpu.memory_space<vmem>>) attributes {dimension_semantics = [#tpu.dimension_semantics<parallel>], iteration_bounds = array<i64: 2>, scalar_prefetch = 0 : i64, scratch_operands = 0 : i64, tpu.core_type = #tpu.core_type<tc>, window_params = [{transform_indices = @transform_0, window_bounds = array<i64: 208, 512>}, {pipeline_mode = #tpu.pipeline_mode<synchronous>, transform_indices = @transform_1, window_bounds = array<i64: 512, 64>}, {pipeline_mode = #tpu.pipeline_mode<synchronous>, transform_indices = @transform_2, window_bounds = array<i64: 1, 64>}, {transform_indices = @transform_3, window_bounds = array<i64: 208, 64>}]} {
    %c0 = arith.constant 0 : index
    %c0_0 = arith.constant 0 : index
    %0 = vector.load %arg1[%c0, %c0_0] : memref<208x512xbf16, #tpu.memory_space<vmem>>, vector<208x512xbf16>
    %c0_1 = arith.constant 0 : index
    %c0_2 = arith.constant 0 : index
    %1 = vector.load %arg2[%c0_1, %c0_2] : memref<512x64xbf16, #tpu.memory_space<vmem>>, vector<512x64xbf16>
    %cst = arith.constant dense<0.000000e+00> : vector<208x64xf32>
    %2 = tpu.matmul %0, %1, %cst {dimension_numbers = #tpu.dot_dimension_numbers<[1], [0], [0], [1], [0, 0, 1, 1], [], []>} : vector<208x512xbf16>, vector<512x64xbf16>, vector<208x64xf32> -> vector<208x64xf32>
    %c0_3 = arith.constant 0 : index
    %c0_4 = arith.constant 0 : index
    %3 = vector.load %arg3[%c0_3, %c0_4] : memref<1x64xf32, #tpu.memory_space<vmem>>, vector<1x64xf32>
    %4 = vector.broadcast %3 : vector<1x64xf32> to vector<208x64xf32>
    %5 = arith.addf %2, %4 : vector<208x64xf32>
    %cst_5 = arith.constant 0.000000e+00 : f32
    %6 = vector.broadcast %cst_5 : f32 to vector<208x64xf32>
    %7 = arith.maximumf %5, %6 : vector<208x64xf32>
    %8 = arith.truncf %7 : vector<208x64xf32> to vector<208x64xbf16>
    %c0_6 = arith.constant 0 : index
    %c0_7 = arith.constant 0 : index
    %9 = vector.load %arg4[%c0_6, %c0_7] : memref<208x64xbf16, #tpu.memory_space<vmem>>, vector<208x64xbf16>
    tpu.vector_store %arg4[%c0_6, %c0_7], %8 {strides = array<i32>} : memref<208x64xbf16, #tpu.memory_space<vmem>>, vector<208x64xbf16>,
    return
  }
  func.func @transform_0(%arg0: i32) -> (i32, i32) {
    %c0_i32 = arith.constant 0 : i32
    %c0_i32_0 = arith.constant 0 : i32
    return %arg0, %c0_i32 : i32, i32
  }
  func.func @transform_1(%arg0: i32) -> (i32, i32) {
    %c0_i32 = arith.constant 0 : i32
    %c0_i32_0 = arith.constant 0 : i32
    %c0_i32_1 = arith.constant 0 : i32
    return %c0_i32, %c0_i32_0 : i32, i32
  }
  func.func @transform_2(%arg0: i32) -> (i32, i32) {
    %c0_i32 = arith.constant 0 : i32
    %c0_i32_0 = arith.constant 0 : i32
    %c0_i32_1 = arith.constant 0 : i32
    return %c0_i32, %c0_i32_0 : i32, i32
  }
  func.func @transform_3(%arg0: i32) -> (i32, i32) {
    %c0_i32 = arith.constant 0 : i32
    %c0_i32_0 = arith.constant 0 : i32
    return %arg0, %c0_i32 : i32, i32
  }
}

module attributes {stable_mosaic.version = 11 : i64} {
  func.func @_mm_bias_relu_kernel(%arg0: i32, %arg1: memref<128x640xbf16, #tpu.memory_space<vmem>>, %arg2: memref<640x64xbf16, #tpu.memory_space<vmem>>, %arg3: memref<1x64xf32, #tpu.memory_space<vmem>>, %arg4: memref<128x64xbf16, #tpu.memory_space<vmem>>) attributes {dimension_semantics = [#tpu.dimension_semantics<parallel>], iteration_bounds = array<i64: 2>, scalar_prefetch = 0 : i64, scratch_operands = 0 : i64, tpu.core_type = #tpu.core_type<tc>, window_params = [{transform_indices = @transform_0, window_bounds = array<i64: 128, 640>}, {pipeline_mode = #tpu.pipeline_mode<synchronous>, transform_indices = @transform_1, window_bounds = array<i64: 640, 64>}, {pipeline_mode = #tpu.pipeline_mode<synchronous>, transform_indices = @transform_2, window_bounds = array<i64: 1, 64>}, {transform_indices = @transform_3, window_bounds = array<i64: 128, 64>}]} {
    %c0 = arith.constant 0 : index
    %c0_0 = arith.constant 0 : index
    %0 = vector.load %arg1[%c0, %c0_0] : memref<128x640xbf16, #tpu.memory_space<vmem>>, vector<128x640xbf16>
    %c0_1 = arith.constant 0 : index
    %c0_2 = arith.constant 0 : index
    %1 = vector.load %arg2[%c0_1, %c0_2] : memref<640x64xbf16, #tpu.memory_space<vmem>>, vector<640x64xbf16>
    %cst = arith.constant dense<0.000000e+00> : vector<128x64xf32>
    %2 = tpu.matmul %0, %1, %cst {dimension_numbers = #tpu.dot_dimension_numbers<[1], [0], [0], [1], [0, 0, 1, 1], [], []>} : vector<128x640xbf16>, vector<640x64xbf16>, vector<128x64xf32> -> vector<128x64xf32>
    %c0_3 = arith.constant 0 : index
    %c0_4 = arith.constant 0 : index
    %3 = vector.load %arg3[%c0_3, %c0_4] : memref<1x64xf32, #tpu.memory_space<vmem>>, vector<1x64xf32>
    %4 = vector.broadcast %3 : vector<1x64xf32> to vector<128x64xf32>
    %5 = arith.addf %2, %4 : vector<128x64xf32>
    %cst_5 = arith.constant 0.000000e+00 : f32
    %6 = vector.broadcast %cst_5 : f32 to vector<128x64xf32>
    %7 = arith.maximumf %5, %6 : vector<128x64xf32>
    %8 = arith.truncf %7 : vector<128x64xf32> to vector<128x64xbf16>
    %c0_6 = arith.constant 0 : index
    %c0_7 = arith.constant 0 : index
    %9 = vector.load %arg4[%c0_6, %c0_7] : memref<128x64xbf16, #tpu.memory_space<vmem>>, vector<128x64xbf16>
    tpu.vector_store %arg4[%c0_6, %c0_7], %8 {strides = array<i32>} : memref<128x64xbf16, #tpu.memory_space<vmem>>, vector<128x64xbf16>,
    return
  }
  func.func @transform_0(%arg0: i32) -> (i32, i32) {
    %c0_i32 = arith.constant 0 : i32
    %c0_i32_0 = arith.constant 0 : i32
    return %arg0, %c0_i32 : i32, i32
  }
  func.func @transform_1(%arg0: i32) -> (i32, i32) {
    %c0_i32 = arith.constant 0 : i32
    %c0_i32_0 = arith.constant 0 : i32
    %c0_i32_1 = arith.constant 0 : i32
    return %c0_i32, %c0_i32_0 : i32, i32
  }
  func.func @transform_2(%arg0: i32) -> (i32, i32) {
    %c0_i32 = arith.constant 0 : i32
    %c0_i32_0 = arith.constant 0 : i32
    %c0_i32_1 = arith.constant 0 : i32
    return %c0_i32, %c0_i32_0 : i32, i32
  }
  func.func @transform_3(%arg0: i32) -> (i32, i32) {
    %c0_i32 = arith.constant 0 : i32
    %c0_i32_0 = arith.constant 0 : i32
    return %arg0, %c0_i32 : i32, i32
  }
}

module attributes {stable_mosaic.version = 11 : i64} {
  func.func @_torso_fc_kernel(%arg0: i32, %arg1: memref<8x3136xbf16, #tpu.memory_space<vmem>>, %arg2: memref<3136x32xbf16, #tpu.memory_space<vmem>>, %arg3: memref<1x32xf32, #tpu.memory_space<vmem>>, %arg4: memref<32x32xbf16, #tpu.memory_space<vmem>>, %arg5: memref<1x32xf32, #tpu.memory_space<vmem>>, %arg6: memref<8x32xf32, #tpu.memory_space<vmem>>) attributes {dimension_semantics = [#tpu.dimension_semantics<parallel>], iteration_bounds = array<i64: 1>, scalar_prefetch = 0 : i64, scratch_operands = 0 : i64, tpu.core_type = #tpu.core_type<tc>, window_params = [{transform_indices = @transform_0, window_bounds = array<i64: 8, 3136>}, {pipeline_mode = #tpu.pipeline_mode<synchronous>, transform_indices = @transform_1, window_bounds = array<i64: 3136, 32>}, {pipeline_mode = #tpu.pipeline_mode<synchronous>, transform_indices = @transform_2, window_bounds = array<i64: 1, 32>}, {pipeline_mode = #tpu.pipeline_mode<synchronous>, transform_indices = @transform_3, window_bounds = array<i64: 32, 32>}, {pipeline_mode = #tpu.pipeline_mode<synchronous>, transform_indices = @transform_4, window_bounds = array<i64: 1, 32>}, {transform_indices = @transform_5, window_bounds = array<i64: 8, 32>}]} {
    %c0 = arith.constant 0 : index
    %c0_0 = arith.constant 0 : index
    %0 = vector.load %arg1[%c0, %c0_0] : memref<8x3136xbf16, #tpu.memory_space<vmem>>, vector<8x3136xbf16>
    %c0_1 = arith.constant 0 : index
    %c0_2 = arith.constant 0 : index
    %1 = vector.load %arg2[%c0_1, %c0_2] : memref<3136x32xbf16, #tpu.memory_space<vmem>>, vector<3136x32xbf16>
    %cst = arith.constant dense<0.000000e+00> : vector<8x32xf32>
    %2 = tpu.matmul %0, %1, %cst {dimension_numbers = #tpu.dot_dimension_numbers<[1], [0], [0], [1], [0, 0, 1, 1], [], []>} : vector<8x3136xbf16>, vector<3136x32xbf16>, vector<8x32xf32> -> vector<8x32xf32>
    %c0_3 = arith.constant 0 : index
    %c0_4 = arith.constant 0 : index
    %3 = vector.load %arg3[%c0_3, %c0_4] : memref<1x32xf32, #tpu.memory_space<vmem>>, vector<1x32xf32>
    %4 = vector.broadcast %3 : vector<1x32xf32> to vector<8x32xf32>
    %5 = arith.addf %2, %4 : vector<8x32xf32>
    %cst_5 = arith.constant 0.000000e+00 : f32
    %6 = vector.broadcast %cst_5 : f32 to vector<8x32xf32>
    %7 = arith.maximumf %5, %6 : vector<8x32xf32>
    %8 = arith.truncf %7 : vector<8x32xf32> to vector<8x32xbf16>
    %c0_6 = arith.constant 0 : index
    %c0_7 = arith.constant 0 : index
    %9 = vector.load %arg4[%c0_6, %c0_7] : memref<32x32xbf16, #tpu.memory_space<vmem>>, vector<32x32xbf16>
    %cst_8 = arith.constant dense<0.000000e+00> : vector<8x32xf32>
    %10 = tpu.matmul %8, %9, %cst_8 {dimension_numbers = #tpu.dot_dimension_numbers<[1], [0], [0], [1], [0, 0, 1, 1], [], []>} : vector<8x32xbf16>, vector<32x32xbf16>, vector<8x32xf32> -> vector<8x32xf32>
    %c0_9 = arith.constant 0 : index
    %c0_10 = arith.constant 0 : index
    %11 = vector.load %arg5[%c0_9, %c0_10] : memref<1x32xf32, #tpu.memory_space<vmem>>, vector<1x32xf32>
    %12 = vector.broadcast %11 : vector<1x32xf32> to vector<8x32xf32>
    %13 = arith.addf %10, %12 : vector<8x32xf32>
    %cst_11 = arith.constant 0.000000e+00 : f32
    %14 = vector.broadcast %cst_11 : f32 to vector<8x32xf32>
    %15 = arith.maximumf %13, %14 : vector<8x32xf32>
    %c0_12 = arith.constant 0 : index
    %c0_13 = arith.constant 0 : index
    %16 = vector.load %arg6[%c0_12, %c0_13] : memref<8x32xf32, #tpu.memory_space<vmem>>, vector<8x32xf32>
    tpu.vector_store %arg6[%c0_12, %c0_13], %15 {strides = array<i32>} : memref<8x32xf32, #tpu.memory_space<vmem>>, vector<8x32xf32>,
    return
  }
  func.func @transform_0(%arg0: i32) -> (i32, i32) {
    %c0_i32 = arith.constant 0 : i32
    %c0_i32_0 = arith.constant 0 : i32
    return %arg0, %c0_i32 : i32, i32
  }
  func.func @transform_1(%arg0: i32) -> (i32, i32) {
    %c0_i32 = arith.constant 0 : i32
    %c0_i32_0 = arith.constant 0 : i32
    %c0_i32_1 = arith.constant 0 : i32
    return %c0_i32, %c0_i32_0 : i32, i32
  }
  func.func @transform_2(%arg0: i32) -> (i32, i32) {
    %c0_i32 = arith.constant 0 : i32
    %c0_i32_0 = arith.constant 0 : i32
    %c0_i32_1 = arith.constant 0 : i32
    return %c0_i32, %c0_i32_0 : i32, i32
  }
  func.func @transform_3(%arg0: i32) -> (i32, i32) {
    %c0_i32 = arith.constant 0 : i32
    %c0_i32_0 = arith.constant 0 : i32
    %c0_i32_1 = arith.constant 0 : i32
    return %c0_i32, %c0_i32_0 : i32, i32
  }
  func.func @transform_4(%arg0: i32) -> (i32, i32) {
    %c0_i32 = arith.constant 0 : i32
    %c0_i32_0 = arith.constant 0 : i32
    %c0_i32_1 = arith.constant 0 : i32
    return %c0_i32, %c0_i32_0 : i32, i32
  }
  func.func @transform_5(%arg0: i32) -> (i32, i32) {
    %c0_i32 = arith.constant 0 : i32
    %c0_i32_0 = arith.constant 0 : i32
    return %arg0, %c0_i32 : i32, i32
  }
}

module attributes {stable_mosaic.version = 11 : i64} {
  func.func @_pred_head_kernel(%arg0: i32, %arg1: memref<8x39xbf16, #tpu.memory_space<vmem>>, %arg2: memref<8x32xf32, #tpu.memory_space<vmem>>, %arg3: memref<39x32xbf16, #tpu.memory_space<vmem>>, %arg4: memref<1x32xf32, #tpu.memory_space<vmem>>, %arg5: memref<32x32xbf16, #tpu.memory_space<vmem>>, %arg6: memref<1x32xf32, #tpu.memory_space<vmem>>, %arg7: memref<32x32xbf16, #tpu.memory_space<vmem>>, %arg8: memref<1x32xf32, #tpu.memory_space<vmem>>, %arg9: memref<8x64xf32, #tpu.memory_space<vmem>>) attributes {dimension_semantics = [#tpu.dimension_semantics<parallel>], iteration_bounds = array<i64: 1>, scalar_prefetch = 0 : i64, scratch_operands = 0 : i64, tpu.core_type = #tpu.core_type<tc>, window_params = [{transform_indices = @transform_0, window_bounds = array<i64: 8, 39>}, {transform_indices = @transform_1, window_bounds = array<i64: 8, 32>}, {pipeline_mode = #tpu.pipeline_mode<synchronous>, transform_indices = @transform_2, window_bounds = array<i64: 39, 32>}, {pipeline_mode = #tpu.pipeline_mode<synchronous>, transform_indices = @transform_3, window_bounds = array<i64: 1, 32>}, {pipeline_mode = #tpu.pipeline_mode<synchronous>, transform_indices = @transform_4, window_bounds = array<i64: 32, 32>}, {pipeline_mode = #tpu.pipeline_mode<synchronous>, transform_indices = @transform_5, window_bounds = array<i64: 1, 32>}, {pipeline_mode = #tpu.pipeline_mode<synchronous>, transform_indices = @transform_6, window_bounds = array<i64: 32, 32>}, {pipeline_mode = #tpu.pipeline_mode<synchronous>, transform_indices = @transform_7, window_bounds = array<i64: 1, 32>}, {transform_indices = @transform_8, window_bounds = array<i64: 8, 64>}]} {
    %c0 = arith.constant 0 : index
    %c0_0 = arith.constant 0 : index
    %0 = vector.load %arg1[%c0, %c0_0] : memref<8x39xbf16, #tpu.memory_space<vmem>>, vector<8x39xbf16>
    %c0_1 = arith.constant 0 : index
    %c0_2 = arith.constant 0 : index
    %1 = vector.load %arg3[%c0_1, %c0_2] : memref<39x32xbf16, #tpu.memory_space<vmem>>, vector<39x32xbf16>
    %cst = arith.constant dense<0.000000e+00> : vector<8x32xf32>
    %2 = tpu.matmul %0, %1, %cst {dimension_numbers = #tpu.dot_dimension_numbers<[1], [0], [0], [1], [0, 0, 1, 1], [], []>} : vector<8x39xbf16>, vector<39x32xbf16>, vector<8x32xf32> -> vector<8x32xf32>
    %c0_3 = arith.constant 0 : index
    %c0_4 = arith.constant 0 : index
    %3 = vector.load %arg4[%c0_3, %c0_4] : memref<1x32xf32, #tpu.memory_space<vmem>>, vector<1x32xf32>
    %4 = vector.broadcast %3 : vector<1x32xf32> to vector<8x32xf32>
    %5 = arith.addf %2, %4 : vector<8x32xf32>
    %cst_5 = arith.constant 0.000000e+00 : f32
    %6 = vector.broadcast %cst_5 : f32 to vector<8x32xf32>
    %7 = arith.maximumf %5, %6 : vector<8x32xf32>
    %8 = arith.truncf %7 : vector<8x32xf32> to vector<8x32xbf16>
    %c0_6 = arith.constant 0 : index
    %c0_7 = arith.constant 0 : index
    %9 = vector.load %arg5[%c0_6, %c0_7] : memref<32x32xbf16, #tpu.memory_space<vmem>>, vector<32x32xbf16>
    %cst_8 = arith.constant dense<0.000000e+00> : vector<8x32xf32>
    %10 = tpu.matmul %8, %9, %cst_8 {dimension_numbers = #tpu.dot_dimension_numbers<[1], [0], [0], [1], [0, 0, 1, 1], [], []>} : vector<8x32xbf16>, vector<32x32xbf16>, vector<8x32xf32> -> vector<8x32xf32>
    %c0_9 = arith.constant 0 : index
    %c0_10 = arith.constant 0 : index
    %11 = vector.load %arg6[%c0_9, %c0_10] : memref<1x32xf32, #tpu.memory_space<vmem>>, vector<1x32xf32>
    %12 = vector.broadcast %11 : vector<1x32xf32> to vector<8x32xf32>
    %13 = arith.addf %10, %12 : vector<8x32xf32>
    %cst_11 = arith.constant 0.000000e+00 : f32
    %14 = vector.broadcast %cst_11 : f32 to vector<8x32xf32>
    %15 = arith.maximumf %13, %14 : vector<8x32xf32>
    %c0_12 = arith.constant 0 : index
    %c0_13 = arith.constant 0 : index
    %16 = vector.load %arg2[%c0_12, %c0_13] : memref<8x32xf32, #tpu.memory_space<vmem>>, vector<8x32xf32>
    %17 = arith.addf %15, %16 : vector<8x32xf32>
    %18 = arith.truncf %17 : vector<8x32xf32> to vector<8x32xbf16>
    %c0_14 = arith.constant 0 : index
    %c0_15 = arith.constant 0 : index
    %19 = vector.load %arg7[%c0_14, %c0_15] : memref<32x32xbf16, #tpu.memory_space<vmem>>, vector<32x32xbf16>
    %cst_16 = arith.constant dense<0.000000e+00> : vector<8x32xf32>
    %20 = tpu.matmul %18, %19, %cst_16 {dimension_numbers = #tpu.dot_dimension_numbers<[1], [0], [0], [1], [0, 0, 1, 1], [], []>} : vector<8x32xbf16>, vector<32x32xbf16>, vector<8x32xf32> -> vector<8x32xf32>
    %c0_17 = arith.constant 0 : index
    %c0_18 = arith.constant 0 : index
    %21 = vector.load %arg9[%c0_17, %c0_18] : memref<8x64xf32, #tpu.memory_space<vmem>>, vector<8x32xf32>
    tpu.vector_store %arg9[%c0_17, %c0_18], %17 {strides = array<i32>} : memref<8x64xf32, #tpu.memory_space<vmem>>, vector<8x32xf32>,
    %c0_19 = arith.constant 0 : index
    %c0_20 = arith.constant 0 : index
    %22 = vector.load %arg8[%c0_19, %c0_20] : memref<1x32xf32, #tpu.memory_space<vmem>>, vector<1x32xf32>
    %23 = vector.broadcast %22 : vector<1x32xf32> to vector<8x32xf32>
    %24 = arith.addf %20, %23 : vector<8x32xf32>
    %c0_21 = arith.constant 0 : index
    %c32 = arith.constant 32 : index
    %25 = vector.load %arg9[%c0_21, %c32] : memref<8x64xf32, #tpu.memory_space<vmem>>, vector<8x32xf32>
    tpu.vector_store %arg9[%c0_21, %c32], %24 {strides = array<i32>} : memref<8x64xf32, #tpu.memory_space<vmem>>, vector<8x32xf32>,
    return
  }
  func.func @transform_0(%arg0: i32) -> (i32, i32) {
    %c0_i32 = arith.constant 0 : i32
    %c0_i32_0 = arith.constant 0 : i32
    return %arg0, %c0_i32 : i32, i32
  }
  func.func @transform_1(%arg0: i32) -> (i32, i32) {
    %c0_i32 = arith.constant 0 : i32
    %c0_i32_0 = arith.constant 0 : i32
    return %arg0, %c0_i32 : i32, i32
  }
  func.func @transform_2(%arg0: i32) -> (i32, i32) {
    %c0_i32 = arith.constant 0 : i32
    %c0_i32_0 = arith.constant 0 : i32
    %c0_i32_1 = arith.constant 0 : i32
    return %c0_i32, %c0_i32_0 : i32, i32
  }
  func.func @transform_3(%arg0: i32) -> (i32, i32) {
    %c0_i32 = arith.constant 0 : i32
    %c0_i32_0 = arith.constant 0 : i32
    %c0_i32_1 = arith.constant 0 : i32
    return %c0_i32, %c0_i32_0 : i32, i32
  }
  func.func @transform_4(%arg0: i32) -> (i32, i32) {
    %c0_i32 = arith.constant 0 : i32
    %c0_i32_0 = arith.constant 0 : i32
    %c0_i32_1 = arith.constant 0 : i32
    return %c0_i32, %c0_i32_0 : i32, i32
  }
  func.func @transform_5(%arg0: i32) -> (i32, i32) {
    %c0_i32 = arith.constant 0 : i32
    %c0_i32_0 = arith.constant 0 : i32
    %c0_i32_1 = arith.constant 0 : i32
    return %c0_i32, %c0_i32_0 : i32, i32
  }
  func.func @transform_6(%arg0: i32) -> (i32, i32) {
    %c0_i32 = arith.constant 0 : i32
    %c0_i32_0 = arith.constant 0 : i32
    %c0_i32_1 = arith.constant 0 : i32
    return %c0_i32, %c0_i32_0 : i32, i32
  }
  func.func @transform_7(%arg0: i32) -> (i32, i32) {
    %c0_i32 = arith.constant 0 : i32
    %c0_i32_0 = arith.constant 0 : i32
    %c0_i32_1 = arith.constant 0 : i32
    return %c0_i32, %c0_i32_0 : i32, i32
  }
  func.func @transform_8(%arg0: i32) -> (i32, i32) {
    %c0_i32 = arith.constant 0 : i32
    %c0_i32_0 = arith.constant 0 : i32
    return %arg0, %c0_i32 : i32, i32
  }
}

</mosaic_0001>

<bundles_post_ra>
// kernel: prediction_model_forward.5
= control target key start
LH: loop header
LB: loop body
LE: loop exit
PB: predicated region body
PF: predicated region fallthrough
CT: control target
= control target key end

     0   :  { %s3088_s12 = smov 0   ;;  %s3703_s0 = inlined_call_operand.vmem [shape: bf16[2000,256], index: 0, kind: input, shape index: {}]   ;;  %s3704_s1 = inlined_call_operand.vmem [shape: bf16[256,32], index: 1, kind: input, shape index: {}]   ;;  %s3705_s2 = inlined_call_operand.vmem [shape: f32[1,32], index: 2, kind: input, shape index: {}]   ;;  %s3706_s3 = inlined_call_operand.vmem [shape: bf16[2000,32], index: 3, kind: output, shape index: {}]  }
   0x1 LB: > { %s2409_s13 = sadd.s32 4294967295, %s3065_s12   ;;  %p2413_p0 = scmp.ge.s32.totalorder %s3065_s12, 1  ;;  %s3065_s12 = sphi %s3088_s12, %s13_s12  }
   0x2   : > { %p139_p1 = scmp.lt.s32.totalorder %s3065_s12, 3 }
   0x4   : > { %p140_p2 = pnand %p2413_p0, %p139_p1 }
   0x5   : > { %v2854_v0 = vld [vmem:[%s3704_s1] sm:$0xff] (!%p140_p2)   ;;  %v3067_v1 = vmov (!%p140_p2), 0   ;;  %s164_s16 = smul.u32 (!%p140_p2), 125, %s2409_s13  ;;  %v2855_v2 = vld [vmem:[%s3704_s1 + $0x8] sm:$0xff] (!%p140_p2)   ;;  %v2856_v3 = vld [vmem:[%s3704_s1 + $0x10] sm:$0xff] (!%p140_p2)   ;;  %vm2227_vm0 = vcmask (!%p140_p2), 257024  }
   0x6   : > { %143 = sbr.rel (%p140_p2) target bundleno = 539 (0x21b), region = 32  ;;  %1065 = vmatprep.subr.bf16.mxu0 (!%p140_p2), %v3067_v1  ;;  %2813 = vmatprep.subr.bf16.mxu1 (!%p140_p2), %v3067_v1  ;;  %v2857_v4 = vld [vmem:[%s3704_s1 + $0x18] sm:$0xff] (!%p140_p2)   ;;  %v2858_v5 = vld [vmem:[%s3704_s1 + $0x20] sm:$0xff] (!%p140_p2)   ;;  %v2859_v7 = vld [vmem:[%s3704_s1 + $0x28] sm:$0xff] (!%p140_p2)  }
   0x7   : > { %1066 = vmatpush1.bf16.msra.mxu0 (!%p140_p2), %v2854_v0  ;;  %2829 = vmatpush1.bf16.msra.mxu1 (!%p140_p2), %v2854_v0  ;;  %p165_p3 = scmp.lt.s32.totalorder (!%p140_p2), %s164_s16, 249  ;;  %v2860_v9 = vld [vmem:[%s3704_s1 + $0x30] sm:$0xff] (!%p140_p2)   ;;  %v2861_v10 = vld [vmem:[%s3704_s1 + $0x38] sm:$0xff] (!%p140_p2)   ;;  %v2862_v11 = vld [vmem:[%s3704_s1 + $0x40] sm:$0xff] (!%p140_p2)  }
   0x8   : > { %1067 = vmatprep.subr.bf16.mxu0 (!%p140_p2), %v3067_v1  ;;  %2814 = vmatprep.subr.bf16.mxu1 (!%p140_p2), %v3067_v1  ;;  %v2863_v12 = vld [vmem:[%s3704_s1 + $0x48] sm:$0xff] (!%p140_p2)   ;;  %v2864_v13 = vld [vmem:[%s3704_s1 + $0x50] sm:$0xff] (!%p140_p2)   ;;  %v2865_v14 = vld [vmem:[%s3704_s1 + $0x58] sm:$0xff] (!%p140_p2)  }
   0x9   : > { %v2866_v15 = vld [vmem:[%s3704_s1 + $0x60] sm:$0xff] (!%p140_p2)   ;;  %v2867_v16 = vld [vmem:[%s3704_s1 + $0x68] sm:$0xff] (!%p140_p2)   ;;  %v2868_v17 = vld [vmem:[%s3704_s1 + $0x70] sm:$0xff] (!%p140_p2)  }
   0xa   : > { %v2869_v18 = vld [vmem:[%s3704_s1 + $0x78] sm:$0xff] (!%p140_p2)  }
   0xb   : > { %1068 = vmatpush1.bf16.msra.mxu0 (!%p140_p2), %v2855_v2  ;;  %2830 = vmatpush1.bf16.msra.mxu1 (!%p140_p2), %v2855_v2 }
   0xc   : > { %1069 = vmatprep.subr.bf16.mxu0 (!%p140_p2), %v3067_v1  ;;  %2815 = vmatprep.subr.bf16.mxu1 (!%p140_p2), %v3067_v1 }
   0xd   : > { %s3708_s16 = smov (!%p165_p3, %s164_s16), 249 }
   0xe   : > { %s2687_s23 = sshll.u32 %s3708_s16, 3  ;;  %s2416_s29 = sshll.u32 %s3708_s16, 2 }
   0xf   : > { %1070 = vmatpush1.bf16.msra.mxu0 %v2856_v3  ;;  %2831 = vmatpush1.bf16.msra.mxu1 %v2856_v3  ;;  %s3125_s28 = scalar_lea.vmem %s3703_s0, %s2687_s23  ;;  %s3311_s4 = scalar_lea.vmem %s3706_s3, %s2416_s29 }
  0x10   : > { %1071 = vmatprep.subr.bf16.mxu0 %v3067_v1  ;;  %2816 = vmatprep.subr.bf16.mxu1 %v3067_v1  ;;  %v2872_v6 = vld [vmem:[%s3125_s28 + $0x4] ss:$8 sps:$4 sm:$0xff]   ;;  %v2870_v19 = vld [vmem:[%s3125_s28] ss:$8 sps:$4 sm:$0xff]   ;;  %v2876_v21 = vld [vmem:[%s3125_s28 + $0x14] ss:$8 sps:$4 sm:$0xff]  }
  0x11   : > { %v2875_v8 = vld [vmem:[%s3125_s28 + $0x204] ss:$8 sps:$4 sm:$0xff]   ;;  %1097 = vmatprep.mubr.bf16.mxu0 %v2872_v6  ;;  %v2873_v20 = vld [vmem:[%s3125_s28 + $0x200] ss:$8 sps:$4 sm:$0xff]   ;;  %v2879_v22 = vld [vmem:[%s3125_s28 + $0x214] ss:$8 sps:$4 sm:$0xff]  }
  0x12   : > { %1353 = vmatprep.mubr.bf16.mxu1 %v2875_v8  ;;  %v2878_v23 = vld [vmem:[%s3125_s28 + $0x10] ss:$8 sps:$4 sm:$0xff]   ;;  %v2881_v25 = vld [vmem:[%s3125_s28 + $0x24] ss:$8 sps:$4 sm:$0xff]   ;;  %v2884_v27 = vld [vmem:[%s3125_s28 + $0x20] ss:$8 sps:$4 sm:$0xff]  }
  0x13   : > { %1072 = vmatpush1.bf16.msra.mxu0 %v2857_v4  ;;  %2832 = vmatpush1.bf16.msra.mxu1 %v2857_v4  ;;  %v2883_v24 = vld [vmem:[%s3125_s28 + $0x210] ss:$8 sps:$4 sm:$0xff]   ;;  %v2885_v26 = vld [vmem:[%s3125_s28 + $0x224] ss:$8 sps:$4 sm:$0xff]   ;;  %v2889_v28 = vld [vmem:[%s3125_s28 + $0x220] ss:$8 sps:$4 sm:$0xff]  }
  0x14   : > { %1073 = vmatprep.subr.bf16.mxu0 %v3067_v1  ;;  %2817 = vmatprep.subr.bf16.mxu1 %v3067_v1  ;;  %v2887_v29 = vld [vmem:[%s3125_s28 + $0x34] ss:$8 sps:$4 sm:$0xff]   ;;  %v2890_v31 = vld [vmem:[%s3125_s28 + $0x30] ss:$8 sps:$4 sm:$0xff]   ;;  %v2893_v33 = vld [vmem:[%s3125_s28 + $0x44] ss:$8 sps:$4 sm:$0xff]  }
  0x15   : > { %v2891_v30 = vld [vmem:[%s3125_s28 + $0x234] ss:$8 sps:$4 sm:$0xff]   ;;  %v2895_v32 = vld [vmem:[%s3125_s28 + $0x230] ss:$8 sps:$4 sm:$0xff]   ;;  %v2897_v34 = vld [vmem:[%s3125_s28 + $0x244] ss:$8 sps:$4 sm:$0xff]  }
  0x16   : > { %v2896_v35 = vld [vmem:[%s3125_s28 + $0x40] ss:$8 sps:$4 sm:$0xff]   ;;  %v2899_v37 = vld [vmem:[%s3125_s28 + $0x54] ss:$8 sps:$4 sm:$0xff]   ;;  %v2902_v39 = vld [vmem:[%s3125_s28 + $0x50] ss:$8 sps:$4 sm:$0xff]  }
  0x17   : > { %1074 = vmatpush1.bf16.msra.mxu0 %v2858_v5  ;;  %2833 = vmatpush1.bf16.msra.mxu1 %v2858_v5  ;;  %v2901_v36 = vld [vmem:[%s3125_s28 + $0x240] ss:$8 sps:$4 sm:$0xff]   ;;  %v2903_v38 = vld [vmem:[%s3125_s28 + $0x254] ss:$8 sps:$4 sm:$0xff]   ;;  %v2907_v40 = vld [vmem:[%s3125_s28 + $0x250] ss:$8 sps:$4 sm:$0xff]  }
  0x18   : > { %1075 = vmatprep.subr.bf16.mxu0 %v3067_v1  ;;  %2818 = vmatprep.subr.bf16.mxu1 %v3067_v1  ;;  %v2905_v41 = vld [vmem:[%s3125_s28 + $0x64] ss:$8 sps:$4 sm:$0xff]   ;;  %v2908_v43 = vld [vmem:[%s3125_s28 + $0x60] ss:$8 sps:$4 sm:$0xff]   ;;  %v2911_v45 = vld [vmem:[%s3125_s28 + $0x74] ss:$8 sps:$4 sm:$0xff]  }
  0x19   : > { %v2909_v42 = vld [vmem:[%s3125_s28 + $0x264] ss:$8 sps:$4 sm:$0xff]   ;;  %v2913_v44 = vld [vmem:[%s3125_s28 + $0x260] ss:$8 sps:$4 sm:$0xff]   ;;  %v2915_v46 = vld [vmem:[%s3125_s28 + $0x274] ss:$8 sps:$4 sm:$0xff]  }
  0x1a   : > { %v2914_v47 = vld [vmem:[%s3125_s28 + $0x70] ss:$8 sps:$4 sm:$0xff]   ;;  %v2917_v49 = vld [vmem:[%s3125_s28 + $0x84] ss:$8 sps:$4 sm:$0xff]   ;;  %v2920_v51 = vld [vmem:[%s3125_s28 + $0x80] ss:$8 sps:$4 sm:$0xff]  }
  0x1b   : > { %1076 = vmatpush1.bf16.msra.mxu0 %v2859_v7  ;;  %2834 = vmatpush1.bf16.msra.mxu1 %v2859_v7  ;;  %v2919_v48 = vld [vmem:[%s3125_s28 + $0x270] ss:$8 sps:$4 sm:$0xff]   ;;  %v2921_v50 = vld [vmem:[%s3125_s28 + $0x284] ss:$8 sps:$4 sm:$0xff]   ;;  %v2925_v52 = vld [vmem:[%s3125_s28 + $0x280] ss:$8 sps:$4 sm:$0xff]  }
  0x1c   : > { %1077 = vmatprep.subr.bf16.mxu0 %v3067_v1  ;;  %2819 = vmatprep.subr.bf16.mxu1 %v3067_v1  ;;  %v2923_v53 = vld [vmem:[%s3125_s28 + $0x94] ss:$8 sps:$4 sm:$0xff]   ;;  %v2926_v55 = vld [vmem:[%s3125_s28 + $0x90] ss:$8 sps:$4 sm:$0xff]   ;;  %v2929_v57 = vld [vmem:[%s3125_s28 + $0xa4] ss:$8 sps:$4 sm:$0xff]  }
  0x1d   : > { %v2927_v54 = vld [vmem:[%s3125_s28 + $0x294] ss:$8 sps:$4 sm:$0xff]   ;;  %v2931_v56 = vld [vmem:[%s3125_s28 + $0x290] ss:$8 sps:$4 sm:$0xff]   ;;  %v2933_v58 = vld [vmem:[%s3125_s28 + $0x2a4] ss:$8 sps:$4 sm:$0xff]  }
  0x1e   : > { %v2932_v59 = vld [vmem:[%s3125_s28 + $0xa0] ss:$8 sps:$4 sm:$0xff]   ;;  %v2935_v61 = vld [vmem:[%s3125_s28 + $0xb4] ss:$8 sps:$4 sm:$0xff]   ;;  %v2938_v63 = vld [vmem:[%s3125_s28 + $0xb0] ss:$8 sps:$4 sm:$0xff]  }
  0x1f   : > { %1078 = vmatpush1.bf16.msra.mxu0 %v2860_v9  ;;  %2835 = vmatpush1.bf16.msra.mxu1 %v2860_v9  ;;  %v2937_v60 = vld [vmem:[%s3125_s28 + $0x2a0] ss:$8 sps:$4 sm:$0xff]   ;;  %v2939_v62 = vld [vmem:[%s3125_s28 + $0x2b4] ss:$8 sps:$4 sm:$0xff]   ;;  %v2943_v0 = vld [vmem:[%s3125_s28 + $0x2b0] ss:$8 sps:$4 sm:$0xff]  }
  0x20   : > { %1079 = vmatprep.subr.bf16.mxu0 %v3067_v1  ;;  %2820 = vmatprep.subr.bf16.mxu1 %v3067_v1  ;;  %v2945_v2 = vld [vmem:[%s3125_s28 + $0x2c4] ss:$8 sps:$4 sm:$0xff]   ;;  %v2944_v3 = vld [vmem:[%s3125_s28 + $0xc0] ss:$8 sps:$4 sm:$0xff]   ;;  %v2947_v5 = vld [vmem:[%s3125_s28 + $0xd4] ss:$8 sps:$4 sm:$0xff]  }
  0x21   : > { %v2949_v4 = vld [vmem:[%s3125_s28 + $0x2c0] ss:$8 sps:$4 sm:$0xff]   ;;  %v2951_v6 = vld [vmem:[%s3125_s28 + $0x2d4] ss:$8 sps:$4 sm:$0xff]   ;;  %v2950_v7 = vld [vmem:[%s3125_s28 + $0xd0] ss:$8 sps:$4 sm:$0xff]  }
  0x22   : > { %v2955_v8 = vld [vmem:[%s3125_s28 + $0x2d0] ss:$8 sps:$4 sm:$0xff]   ;;  %v2953_v9 = vld [vmem:[%s3125_s28 + $0xe4] ss:$8 sps:$4 sm:$0xff]  }
  0x23   : > { %1080 = vmatpush1.bf16.msra.mxu0 %v2861_v10  ;;  %2836 = vmatpush1.bf16.msra.mxu1 %v2861_v10  ;;  %v2957_v10 = vld [vmem:[%s3125_s28 + $0x2e4] ss:$8 sps:$4 sm:$0xff]  }
  0x24   : > { %1081 = vmatprep.subr.bf16.mxu0 %v3067_v1  ;;  %2821 = vmatprep.subr.bf16.mxu1 %v3067_v1 }
  0x27   : > { %1082 = vmatpush1.bf16.msra.mxu0 %v2862_v11  ;;  %2837 = vmatpush1.bf16.msra.mxu1 %v2862_v11  ;;  %v2956_v11 = vld [vmem:[%s3125_s28 + $0xe0] ss:$8 sps:$4 sm:$0xff]  }
  0x28   : > { %1083 = vmatprep.subr.bf16.mxu0 %v3067_v1  ;;  %2822 = vmatprep.subr.bf16.mxu1 %v3067_v1 }
  0x2b   : > { %1084 = vmatpush1.bf16.msra.mxu0 %v2863_v12  ;;  %2838 = vmatpush1.bf16.msra.mxu1 %v2863_v12  ;;  %v2961_v12 = vld [vmem:[%s3125_s28 + $0x2e0] ss:$8 sps:$4 sm:$0xff]  }
  0x2c   : > { %1085 = vmatprep.subr.bf16.mxu0 %v3067_v1  ;;  %2823 = vmatprep.subr.bf16.mxu1 %v3067_v1 }
  0x2f   : > { %1086 = vmatpush1.bf16.msra.mxu0 %v2864_v13  ;;  %2839 = vmatpush1.bf16.msra.mxu1 %v2864_v13  ;;  %v2959_v13 = vld [vmem:[%s3125_s28 + $0xf4] ss:$8 sps:$4 sm:$0xff]  }
  0x30   : > { %1087 = vmatprep.subr.bf16.mxu0 %v3067_v1  ;;  %2824 = vmatprep.subr.bf16.mxu1 %v3067_v1 }
  0x33   : > { %1088 = vmatpush1.bf16.msra.mxu0 %v2865_v14  ;;  %2840 = vmatpush1.bf16.msra.mxu1 %v2865_v14  ;;  %v2963_v14 = vld [vmem:[%s3125_s28 + $0x2f4] ss:$8 sps:$4 sm:$0xff]  }
  0x34   : > { %1089 = vmatprep.subr.bf16.mxu0 %v3067_v1  ;;  %2825 = vmatprep.subr.bf16.mxu1 %v3067_v1 }
  0x37   : > { %1090 = vmatpush1.bf16.msra.mxu0 %v2866_v15  ;;  %2841 = vmatpush1.bf16.msra.mxu1 %v2866_v15  ;;  %v2962_v15 = vld [vmem:[%s3125_s28 + $0xf0] ss:$8 sps:$4 sm:$0xff]  }
  0x38   : > { %1091 = vmatprep.subr.bf16.mxu0 %v3067_v1  ;;  %2826 = vmatprep.subr.bf16.mxu1 %v3067_v1 }
  0x3b   : > { %1092 = vmatpush1.bf16.msra.mxu0 %v2867_v16  ;;  %2842 = vmatpush1.bf16.msra.mxu1 %v2867_v16  ;;  %v2967_v16 = vld [vmem:[%s3125_s28 + $0x2f0] ss:$8 sps:$4 sm:$0xff]  }
  0x3c   : > { %1093 = vmatprep.subr.bf16.mxu0 %v3067_v1  ;;  %2827 = vmatprep.subr.bf16.mxu1 %v3067_v1 }
  0x3f   : > { %1094 = vmatpush1.bf16.msra.mxu0 %v2868_v17  ;;  %2843 = vmatpush1.bf16.msra.mxu1 %v2868_v17  ;;  %v2965_v17 = vld [vmem:[%s3125_s28 + $0x104] ss:$8 sps:$4 sm:$0xff]  }
  0x40   : > { %1095 = vmatprep.subr.bf16.mxu0 %v3067_v1  ;;  %2828 = vmatprep.subr.bf16.mxu1 %v3067_v1  ;;  %v2941_v1 = vld [vmem:[%s3125_s28 + $0xc4] ss:$8 sps:$4 sm:$0xff]  }
  0x43   : > { %1096 = vmatpush1.bf16.msra.mxu0 %v2869_v18  ;;  %2844 = vmatpush1.bf16.msra.mxu1 %v2869_v18  ;;  %v2969_v18 = vld [vmem:[%s3125_s28 + $0x304] ss:$8 sps:$4 sm:$0xff]  }
  0x46   : > { %1098 = vmatmul.mubr.bf16.vlgmr.msra.gmra.mrb[0].mxu0 %v2870_v19  ;;  %1354 = vmatmul.mubr.bf16.vlgmr.msra.gmra.mrb[0].mxu1 %v2873_v20  ;;  %v2968_v19 = vld [vmem:[%s3125_s28 + $0x100] ss:$8 sps:$4 sm:$0xff]  }
  0x47   : > { %1105 = vmatprep.mubr.bf16.mxu0 %v2876_v21  ;;  %1361 = vmatprep.mubr.bf16.mxu1 %v2879_v22  ;;  %v2973_v20 = vld [vmem:[%s3125_s28 + $0x300] ss:$8 sps:$4 sm:$0xff]   ;;  %v2971_v21 = vld [vmem:[%s3125_s28 + $0x114] ss:$8 sps:$4 sm:$0xff]  }
  0x48   : > { %v2975_v22 = vld [vmem:[%s3125_s28 + $0x314] ss:$8 sps:$4 sm:$0xff]  }
  0x4e   : > { %1106 = vmatmul.mubr.bf16.gmra.mrb[4].mxu0 %v2878_v23  ;;  %1362 = vmatmul.mubr.bf16.gmra.mrb[4].mxu1 %v2883_v24  ;;  %v2974_v23 = vld [vmem:[%s3125_s28 + $0x110] ss:$8 sps:$4 sm:$0xff]  }
  0x4f   : > { %1113 = vmatprep.mubr.bf16.mxu0 %v2881_v25  ;;  %1369 = vmatprep.mubr.bf16.mxu1 %v2885_v26  ;;  %v2979_v24 = vld [vmem:[%s3125_s28 + $0x310] ss:$8 sps:$4 sm:$0xff]   ;;  %v2977_v25 = vld [vmem:[%s3125_s28 + $0x124] ss:$8 sps:$4 sm:$0xff]  }
  0x50   : > { %v2981_v26 = vld [vmem:[%s3125_s28 + $0x324] ss:$8 sps:$4 sm:$0xff]  }
  0x56   : > { %1114 = vmatmul.mubr.bf16.gmra.mrb[8].mxu0 %v2884_v27  ;;  %1370 = vmatmul.mubr.bf16.gmra.mrb[8].mxu1 %v2889_v28  ;;  %v2980_v27 = vld [vmem:[%s3125_s28 + $0x120] ss:$8 sps:$4 sm:$0xff]  }
  0x57   : > { %1121 = vmatprep.mubr.bf16.mxu0 %v2887_v29  ;;  %1377 = vmatprep.mubr.bf16.mxu1 %v2891_v30  ;;  %v2985_v28 = vld [vmem:[%s3125_s28 + $0x320] ss:$8 sps:$4 sm:$0xff]   ;;  %v2983_v29 = vld [vmem:[%s3125_s28 + $0x134] ss:$8 sps:$4 sm:$0xff]  }
  0x58   : > { %v2987_v30 = vld [vmem:[%s3125_s28 + $0x334] ss:$8 sps:$4 sm:$0xff]  }
  0x5e   : > { %1122 = vmatmul.mubr.bf16.gmra.mrb[12].mxu0 %v2890_v31  ;;  %1378 = vmatmul.mubr.bf16.gmra.mrb[12].mxu1 %v2895_v32  ;;  %v2986_v31 = vld [vmem:[%s3125_s28 + $0x130] ss:$8 sps:$4 sm:$0xff]  }
  0x5f   : > { %1129 = vmatprep.mubr.bf16.mxu0 %v2893_v33  ;;  %1385 = vmatprep.mubr.bf16.mxu1 %v2897_v34  ;;  %v2991_v32 = vld [vmem:[%s3125_s28 + $0x330] ss:$8 sps:$4 sm:$0xff]   ;;  %v2989_v33 = vld [vmem:[%s3125_s28 + $0x144] ss:$8 sps:$4 sm:$0xff]  }
  0x60   : > { %v2993_v34 = vld [vmem:[%s3125_s28 + $0x344] ss:$8 sps:$4 sm:$0xff]  }
  0x66   : > { %1130 = vmatmul.mubr.bf16.gmra.mrb[16].mxu0 %v2896_v35  ;;  %1386 = vmatmul.mubr.bf16.gmra.mrb[16].mxu1 %v2901_v36  ;;  %v2992_v35 = vld [vmem:[%s3125_s28 + $0x140] ss:$8 sps:$4 sm:$0xff]  }
  0x67   : > { %1137 = vmatprep.mubr.bf16.mxu0 %v2899_v37  ;;  %1393 = vmatprep.mubr.bf16.mxu1 %v2903_v38  ;;  %v2997_v36 = vld [vmem:[%s3125_s28 + $0x340] ss:$8 sps:$4 sm:$0xff]   ;;  %v2995_v37 = vld [vmem:[%s3125_s28 + $0x154] ss:$8 sps:$4 sm:$0xff]  }
  0x68   : > { %v2999_v38 = vld [vmem:[%s3125_s28 + $0x354] ss:$8 sps:$4 sm:$0xff]  }
  0x6e   : > { %1138 = vmatmul.mubr.bf16.gmra.mrb[20].mxu0 %v2902_v39  ;;  %1394 = vmatmul.mubr.bf16.gmra.mrb[20].mxu1 %v2907_v40  ;;  %v2998_v39 = vld [vmem:[%s3125_s28 + $0x150] ss:$8 sps:$4 sm:$0xff]  }
  0x6f   : > { %1145 = vmatprep.mubr.bf16.mxu0 %v2905_v41  ;;  %1401 = vmatprep.mubr.bf16.mxu1 %v2909_v42  ;;  %v3003_v40 = vld [vmem:[%s3125_s28 + $0x350] ss:$8 sps:$4 sm:$0xff]   ;;  %v3001_v41 = vld [vmem:[%s3125_s28 + $0x164] ss:$8 sps:$4 sm:$0xff]  }
  0x70   : > { %v3005_v42 = vld [vmem:[%s3125_s28 + $0x364] ss:$8 sps:$4 sm:$0xff]  }
  0x76   : > { %1146 = vmatmul.mubr.bf16.gmra.mrb[24].mxu0 %v2908_v43  ;;  %1402 = vmatmul.mubr.bf16.gmra.mrb[24].mxu1 %v2913_v44  ;;  %v3004_v43 = vld [vmem:[%s3125_s28 + $0x160] ss:$8 sps:$4 sm:$0xff]  }
  0x77   : > { %1153 = vmatprep.mubr.bf16.mxu0 %v2911_v45  ;;  %1409 = vmatprep.mubr.bf16.mxu1 %v2915_v46  ;;  %v3009_v44 = vld [vmem:[%s3125_s28 + $0x360] ss:$8 sps:$4 sm:$0xff]   ;;  %v3007_v45 = vld [vmem:[%s3125_s28 + $0x174] ss:$8 sps:$4 sm:$0xff]  }
  0x78   : > { %v3011_v46 = vld [vmem:[%s3125_s28 + $0x374] ss:$8 sps:$4 sm:$0xff]  }
  0x7e   : > { %1154 = vmatmul.mubr.bf16.gmra.mrb[28].mxu0 %v2914_v47  ;;  %1410 = vmatmul.mubr.bf16.gmra.mrb[28].mxu1 %v2919_v48  ;;  %v3010_v47 = vld [vmem:[%s3125_s28 + $0x170] ss:$8 sps:$4 sm:$0xff]  }
  0x7f   : > { %1161 = vmatprep.mubr.bf16.mxu0 %v2917_v49  ;;  %1417 = vmatprep.mubr.bf16.mxu1 %v2921_v50  ;;  %v3015_v48 = vld [vmem:[%s3125_s28 + $0x370] ss:$8 sps:$4 sm:$0xff]   ;;  %v3013_v49 = vld [vmem:[%s3125_s28 + $0x184] ss:$8 sps:$4 sm:$0xff]  }
  0x80   : > { %v3017_v50 = vld [vmem:[%s3125_s28 + $0x384] ss:$8 sps:$4 sm:$0xff]  }
  0x86   : > { %1162 = vmatmul.mubr.bf16.gmra.mrb[32].mxu0 %v2920_v51  ;;  %1418 = vmatmul.mubr.bf16.gmra.mrb[32].mxu1 %v2925_v52  ;;  %v3016_v51 = vld [vmem:[%s3125_s28 + $0x180] ss:$8 sps:$4 sm:$0xff]  }
  0x87   : > { %1169 = vmatprep.mubr.bf16.mxu0 %v2923_v53  ;;  %1425 = vmatprep.mubr.bf16.mxu1 %v2927_v54  ;;  %v3021_v52 = vld [vmem:[%s3125_s28 + $0x380] ss:$8 sps:$4 sm:$0xff]   ;;  %v3019_v53 = vld [vmem:[%s3125_s28 + $0x194] ss:$8 sps:$4 sm:$0xff]  }
  0x88   : > { %v3023_v54 = vld [vmem:[%s3125_s28 + $0x394] ss:$8 sps:$4 sm:$0xff]  }
  0x8e   : > { %1170 = vmatmul.mubr.bf16.gmra.mrb[36].mxu0 %v2926_v55  ;;  %1426 = vmatmul.mubr.bf16.gmra.mrb[36].mxu1 %v2931_v56  ;;  %v3022_v55 = vld [vmem:[%s3125_s28 + $0x190] ss:$8 sps:$4 sm:$0xff]  }
  0x8f   : > { %1177 = vmatprep.mubr.bf16.mxu0 %v2929_v57  ;;  %1433 = vmatprep.mubr.bf16.mxu1 %v2933_v58  ;;  %v3027_v56 = vld [vmem:[%s3125_s28 + $0x390] ss:$8 sps:$4 sm:$0xff]   ;;  %v3025_v57 = vld [vmem:[%s3125_s28 + $0x1a4] ss:$8 sps:$4 sm:$0xff]  }
  0x90   : > { %v3029_v58 = vld [vmem:[%s3125_s28 + $0x3a4] ss:$8 sps:$4 sm:$0xff]  }
  0x96   : > { %1178 = vmatmul.mubr.bf16.gmra.mrb[40].mxu0 %v2932_v59  ;;  %1434 = vmatmul.mubr.bf16.gmra.mrb[40].mxu1 %v2937_v60  ;;  %v3028_v59 = vld [vmem:[%s3125_s28 + $0x1a0] ss:$8 sps:$4 sm:$0xff]  }
  0x97   : > { %1185 = vmatprep.mubr.bf16.mxu0 %v2935_v61  ;;  %1441 = vmatprep.mubr.bf16.mxu1 %v2939_v62  ;;  %v3033_v60 = vld [vmem:[%s3125_s28 + $0x3a0] ss:$8 sps:$4 sm:$0xff]   ;;  %v3031_v61 = vld [vmem:[%s3125_s28 + $0x1b4] ss:$8 sps:$4 sm:$0xff]  }
  0x98   : > { %v3035_v62 = vld [vmem:[%s3125_s28 + $0x3b4] ss:$8 sps:$4 sm:$0xff]  }
  0x9e   : > { %1186 = vmatmul.mubr.bf16.gmra.mrb[44].mxu0 %v2938_v63  ;;  %1442 = vmatmul.mubr.bf16.gmra.mrb[44].mxu1 %v2943_v0  ;;  %v3297_v63 = vld [vmem:[%s3705_s2] ss:$0 sm:$0xff] }
  0x9f   : > { %1193 = vmatprep.mubr.bf16.mxu0 %v2941_v1  ;;  %1449 = vmatprep.mubr.bf16.mxu1 %v2945_v2 }
  0xa6   : > { %1194 = vmatmul.mubr.bf16.gmra.mrb[48].mxu0 %v2944_v3  ;;  %1450 = vmatmul.mubr.bf16.gmra.mrb[48].mxu1 %v2949_v4  ;;  %v3034_v4 = vld [vmem:[%s3125_s28 + $0x1b0] ss:$8 sps:$4 sm:$0xff]  }
  0xa7   : > { %1201 = vmatprep.mubr.bf16.mxu0 %v2947_v5  ;;  %1457 = vmatprep.mubr.bf16.mxu1 %v2951_v6 }
  0xae   : > { %1202 = vmatmul.mubr.bf16.gmra.mrb[52].mxu0 %v2950_v7  ;;  %1458 = vmatmul.mubr.bf16.gmra.mrb[52].mxu1 %v2955_v8  ;;  %v3039_v7 = vld [vmem:[%s3125_s28 + $0x3b0] ss:$8 sps:$4 sm:$0xff]  }
  0xaf   : > { %1209 = vmatprep.mubr.bf16.mxu0 %v2953_v9  ;;  %1465 = vmatprep.mubr.bf16.mxu1 %v2957_v10  ;;  %v3037_v10 = vld [vmem:[%s3125_s28 + $0x1c4] ss:$8 sps:$4 sm:$0xff]  }
  0xb6   : > { %1210 = vmatmul.mubr.bf16.gmra.mrb[56].mxu0 %v2956_v11  ;;  %1466 = vmatmul.mubr.bf16.gmra.mrb[56].mxu1 %v2961_v12  ;;  %v3041_v11 = vld [vmem:[%s3125_s28 + $0x3c4] ss:$8 sps:$4 sm:$0xff]  }
  0xb7   : > { %1217 = vmatprep.mubr.bf16.mxu0 %v2959_v13  ;;  %1473 = vmatprep.mubr.bf16.mxu1 %v2963_v14 }
  0xbe   : > { %1218 = vmatmul.mubr.bf16.gmra.mrb[60].mxu0 %v2962_v15  ;;  %1474 = vmatmul.mubr.bf16.gmra.mrb[60].mxu1 %v2967_v16 }
  0xbf   : > { %1225 = vmatprep.mubr.bf16.mxu0 %v2965_v17  ;;  %1481 = vmatprep.mubr.bf16.mxu1 %v2969_v18 }
  0xc6   : > { %1226 = vmatmul.mubr.bf16.gmra.mrb[64].mxu0 %v2968_v19  ;;  %1482 = vmatmul.mubr.bf16.gmra.mrb[64].mxu1 %v2973_v20 }
  0xc7   : > { %1233 = vmatprep.mubr.bf16.mxu0 %v2971_v21  ;;  %1489 = vmatprep.mubr.bf16.mxu1 %v2975_v22 }
  0xce   : > { %1234 = vmatmul.mubr.bf16.gmra.mrb[68].mxu0 %v2974_v23  ;;  %1490 = vmatmul.mubr.bf16.gmra.mrb[68].mxu1 %v2979_v24 }
  0xcf   : > { %1241 = vmatprep.mubr.bf16.mxu0 %v2977_v25  ;;  %1497 = vmatprep.mubr.bf16.mxu1 %v2981_v26 }
  0xd6   : > { %1242 = vmatmul.mubr.bf16.gmra.mrb[72].mxu0 %v2980_v27  ;;  %1498 = vmatmul.mubr.bf16.gmra.mrb[72].mxu1 %v2985_v28  ;;  %v3040_v28 = vld [vmem:[%s3125_s28 + $0x1c0] ss:$8 sps:$4 sm:$0xff]  }
  0xd7   : > { %1249 = vmatprep.mubr.bf16.mxu0 %v2983_v29  ;;  %1505 = vmatprep.mubr.bf16.mxu1 %v2987_v30 }
  0xde   : > { %1250 = vmatmul.mubr.bf16.gmra.mrb[76].mxu0 %v2986_v31  ;;  %1506 = vmatmul.mubr.bf16.gmra.mrb[76].mxu1 %v2991_v32  ;;  %v3045_v31 = vld [vmem:[%s3125_s28 + $0x3c0] ss:$8 sps:$4 sm:$0xff]  }
  0xdf   : > { %1257 = vmatprep.mubr.bf16.mxu0 %v2989_v33  ;;  %1513 = vmatprep.mubr.bf16.mxu1 %v2993_v34  ;;  %v3043_v34 = vld [vmem:[%s3125_s28 + $0x1d4] ss:$8 sps:$4 sm:$0xff]  }
  0xe6   : > { %1258 = vmatmul.mubr.bf16.gmra.mrb[80].mxu0 %v2992_v35  ;;  %1514 = vmatmul.mubr.bf16.gmra.mrb[80].mxu1 %v2997_v36  ;;  %v3047_v35 = vld [vmem:[%s3125_s28 + $0x3d4] ss:$8 sps:$4 sm:$0xff]  }
  0xe7   : > { %1265 = vmatprep.mubr.bf16.mxu0 %v2995_v37  ;;  %1521 = vmatprep.mubr.bf16.mxu1 %v2999_v38 }
  0xee   : > { %1266 = vmatmul.mubr.bf16.gmra.mrb[84].mxu0 %v2998_v39  ;;  %1522 = vmatmul.mubr.bf16.gmra.mrb[84].mxu1 %v3003_v40 }
  0xef   : > { %1273 = vmatprep.mubr.bf16.mxu0 %v3001_v41  ;;  %1529 = vmatprep.mubr.bf16.mxu1 %v3005_v42 }
  0xf6   : > { %1274 = vmatmul.mubr.bf16.gmra.mrb[88].mxu0 %v3004_v43  ;;  %1530 = vmatmul.mubr.bf16.gmra.mrb[88].mxu1 %v3009_v44 }
  0xf7   : > { %1281 = vmatprep.mubr.bf16.mxu0 %v3007_v45  ;;  %1537 = vmatprep.mubr.bf16.mxu1 %v3011_v46 }
  0xfe   : > { %1282 = vmatmul.mubr.bf16.gmra.mrb[92].mxu0 %v3010_v47  ;;  %1538 = vmatmul.mubr.bf16.gmra.mrb[92].mxu1 %v3015_v48  ;;  %v302_v48 = vld [vmem:[%s3125_s28 + $0x3e0] sm:$0xff] }
  0xff   : > { %1289 = vmatprep.mubr.bf16.mxu0 %v3013_v49  ;;  %1545 = vmatprep.mubr.bf16.mxu1 %v3017_v50 }
 0x106   : > { %1290 = vmatmul.mubr.bf16.gmra.mrb[96].mxu0 %v3016_v51  ;;  %1546 = vmatmul.mubr.bf16.gmra.mrb[96].mxu1 %v3021_v52 }
 0x107   : > { %1297 = vmatprep.mubr.bf16.mxu0 %v3019_v53  ;;  %1553 = vmatprep.mubr.bf16.mxu1 %v3023_v54  ;;  %v3046_v53 = vld [vmem:[%s3125_s28 + $0x1d0] ss:$8 sps:$4 sm:$0xff]  }
 0x10e   : > { %1298 = vmatmul.mubr.bf16.gmra.mrb[100].mxu0 %v3022_v55  ;;  %1554 = vmatmul.mubr.bf16.gmra.mrb[100].mxu1 %v3027_v56  ;;  %v3051_v56 = vld [vmem:[%s3125_s28 + $0x3d0] ss:$8 sps:$4 sm:$0xff]  }
 0x10f   : > { %1305 = vmatprep.mubr.bf16.mxu0 %v3025_v57  ;;  %1561 = vmatprep.mubr.bf16.mxu1 %v3029_v58 }
 0x116   : > { %1306 = vmatmul.mubr.bf16.gmra.mrb[104].mxu0 %v3028_v59  ;;  %1562 = vmatmul.mubr.bf16.gmra.mrb[104].mxu1 %v3033_v60  ;;  %v3049_v59 = vld [vmem:[%s3125_s28 + $0x1e4] ss:$8 sps:$4 sm:$0xff]   ;;  %v2543_v60 = vcombine.high %v302_v48, %v302_v48 }
 0x117   : > { %1313 = vmatprep.mubr.bf16.mxu0 %v3031_v61  ;;  %1569 = vmatprep.mubr.bf16.mxu1 %v3035_v62 }
 0x119   : > { %v1099_v0 = vpop.f32.mrb[0].mxu0  ;;  %v1355_v1 = vpop.f32.mrb[0].mxu1 }
 0x11a   : > { %v1100_v2 = vadd.f32 %v3297_v63, %v1099_v0  ;;  %v1101_v3 = vpop.f32.mrb[1].mxu0  ;;  %v1356_v5 = vadd.f32 %v3297_v63, %v1355_v1  ;;  %v1357_v6 = vpop.f32.mrb[1].mxu1 }
 0x11b   : > { %v1102_v8 = vpop.f32.mrb[2].mxu0  ;;  %v1358_v9 = vpop.f32.mrb[2].mxu1 }
 0x11c   : > { %v1601_v12 = vmax.f32 %v1100_v2, 0.0  ;;  %v1103_v13 = vadd.f32 %v3297_v63, %v1102_v8  ;;  %v1104_v14 = vpop.f32.mrb[3].mxu0  ;;  %v1665_v15 = vmax.f32 %v1356_v5, 0.0  ;;  %v1359_v16 = vadd.f32 %v3297_v63, %v1358_v9  ;;  %v1360_v17 = vpop.f32.mrb[3].mxu1 }
 0x11d   : > { %v3052_v14 = vld [vmem:[%s3125_s28 + $0x1e0] ss:$8 sps:$4 sm:$0xff]   ;;  %v2542_v17 = vcombine.low %v302_v48, %v302_v48 }
 0x11e   : > { %v2688_v18 = vpack.c.bf16 %v1601_v12, %v1601_v12  ;;  %v1602_v19 = vmax.f32 %v1103_v13, 0.0  ;;  %1314 = vmatmul.mubr.bf16.gmra.mrb[108].mxu0 %v3034_v4  ;;  %v2752_v20 = vpack.c.bf16 %v1665_v15, %v1665_v15  ;;  %v1666_v21 = vmax.f32 %v1359_v16, 0.0  ;;  %1570 = vmatmul.mubr.bf16.gmra.mrb[108].mxu1 %v3039_v7 }
 0x11f   : > { %1321 = vmatprep.mubr.bf16.mxu0 %v3037_v10  ;;  %1577 = vmatprep.mubr.bf16.mxu1 %v3041_v11 }
 0x120   : > { %2228 = vst.msk [vmem:[%s3311_s4] sm:$0xf] %vm2227_vm0, %v2688_v18  ;;  %v2689_v22 = vpack.c.bf16 %v1602_v19, %v1602_v19  ;;  %2292 = vst.msk [vmem:[%s3311_s4 + $0x100] sm:$0xf] %vm2227_vm0, %v2752_v20  ;;  %v2753_v23 = vpack.c.bf16 %v1666_v21, %v1666_v21  ;;  %v3054_v20 = vld [vmem:[%s3125_s28 + $0x1f4] ss:$8 sps:$4 sm:$0xff]  }
 0x121   : > { %v1107_v24 = vpop.f32.mrb[4].mxu0  ;;  %v1363_v25 = vpop.f32.mrb[4].mxu1 }
 0x122   : > { %2229 = vst.msk [vmem:[%s3311_s4 + $0x4] sm:$0xf] %vm2227_vm0, %v2689_v22  ;;  %v1108_v26 = vadd.f32 %v3297_v63, %v1107_v24  ;;  %v1109_v27 = vpop.f32.mrb[5].mxu0  ;;  %2293 = vst.msk [vmem:[%s3311_s4 + $0x104] sm:$0xf] %vm2227_vm0, %v2753_v23  ;;  %v1364_v29 = vadd.f32 %v3297_v63, %v1363_v25  ;;  %v1365_v30 = vpop.f32.mrb[5].mxu1 }
 0x123   : > { %v1110_v32 = vpop.f32.mrb[6].mxu0  ;;  %v1366_v33 = vpop.f32.mrb[6].mxu1 }
 0x124   : > { %v1603_v36 = vmax.f32 %v1108_v26, 0.0  ;;  %v1111_v37 = vadd.f32 %v3297_v63, %v1110_v32  ;;  %v1112_v38 = vpop.f32.mrb[7].mxu0  ;;  %v1667_v39 = vmax.f32 %v1364_v29, 0.0  ;;  %v1367_v40 = vadd.f32 %v3297_v63, %v1366_v33  ;;  %v1368_v41 = vpop.f32.mrb[7].mxu1 }
 0x126   : > { %v2690_v42 = vpack.c.bf16 %v1603_v36, %v1603_v36  ;;  %v1604_v43 = vmax.f32 %v1111_v37, 0.0  ;;  %1322 = vmatmul.mubr.bf16.gmra.mrb[112].mxu0 %v3040_v28  ;;  %v2754_v44 = vpack.c.bf16 %v1667_v39, %v1667_v39  ;;  %v1668_v45 = vmax.f32 %v1367_v40, 0.0  ;;  %1578 = vmatmul.mubr.bf16.gmra.mrb[112].mxu1 %v3045_v31  ;;  %v3057_v37 = vld [vmem:[%s3125_s28 + $0x1f0] ss:$8 sps:$4 sm:$0xff]  }
 0x127   : > { %1329 = vmatprep.mubr.bf16.mxu0 %v3043_v34  ;;  %1585 = vmatprep.mubr.bf16.mxu1 %v3047_v35 }
 0x128   : > { %2230 = vst.msk [vmem:[%s3311_s4 + $0x8] sm:$0xf] %vm2227_vm0, %v2690_v42  ;;  %v2691_v46 = vpack.c.bf16 %v1604_v43, %v1604_v43  ;;  %2294 = vst.msk [vmem:[%s3311_s4 + $0x108] sm:$0xf] %vm2227_vm0, %v2754_v44  ;;  %v2755_v47 = vpack.c.bf16 %v1668_v45, %v1668_v45 }
 0x129   : > { %v1115_v49 = vpop.f32.mrb[8].mxu0  ;;  %v1371_v50 = vpop.f32.mrb[8].mxu1 }
 0x12a   : > { %2231 = vst.msk [vmem:[%s3311_s4 + $0xc] sm:$0xf] %vm2227_vm0, %v2691_v46  ;;  %v1116_v51 = vadd.f32 %v3297_v63, %v1115_v49  ;;  %v1117_v52 = vpop.f32.mrb[9].mxu0  ;;  %2295 = vst.msk [vmem:[%s3311_s4 + $0x10c] sm:$0xf] %vm2227_vm0, %v2755_v47  ;;  %v1372_v54 = vadd.f32 %v3297_v63, %v1371_v50  ;;  %v1373_v55 = vpop.f32.mrb[9].mxu1 }
 0x12b   : > { %v1118_v57 = vpop.f32.mrb[10].mxu0  ;;  %v1374_v58 = vpop.f32.mrb[10].mxu1 }
 0x12c   : > { %v1605_v61 = vmax.f32 %v1116_v51, 0.0  ;;  %v1119_v62 = vadd.f32 %v3297_v63, %v1118_v57  ;;  %v1120_v0 = vpop.f32.mrb[11].mxu0  ;;  %v1669_v1 = vmax.f32 %v1372_v54, 0.0  ;;  %v1375_v2 = vadd.f32 %v3297_v63, %v1374_v58  ;;  %v1376_v3 = vpop.f32.mrb[11].mxu1 }
 0x12e   : > { %v2692_v4 = vpack.c.bf16 %v1605_v61, %v1605_v61  ;;  %v1606_v5 = vmax.f32 %v1119_v62, 0.0  ;;  %1330 = vmatmul.mubr.bf16.gmra.mrb[116].mxu0 %v3046_v53  ;;  %v2756_v6 = vpack.c.bf16 %v1669_v1, %v1669_v1  ;;  %v1670_v7 = vmax.f32 %v1375_v2, 0.0  ;;  %1586 = vmatmul.mubr.bf16.gmra.mrb[116].mxu1 %v3051_v56 }
 0x12f   : > { %1337 = vmatprep.mubr.bf16.mxu0 %v3049_v59  ;;  %1593 = vmatprep.mubr.bf16.mxu1 %v2543_v60 }
 0x130   : > { %2232 = vst.msk [vmem:[%s3311_s4 + $0x10] sm:$0xf] %vm2227_vm0, %v2692_v4  ;;  %v2693_v8 = vpack.c.bf16 %v1606_v5, %v1606_v5  ;;  %2296 = vst.msk [vmem:[%s3311_s4 + $0x110] sm:$0xf] %vm2227_vm0, %v2756_v6  ;;  %v2757_v9 = vpack.c.bf16 %v1670_v7, %v1670_v7 }
 0x131   : > { %v1123_v10 = vpop.f32.mrb[12].mxu0  ;;  %v1379_v11 = vpop.f32.mrb[12].mxu1 }
 0x132   : > { %2233 = vst.msk [vmem:[%s3311_s4 + $0x14] sm:$0xf] %vm2227_vm0, %v2693_v8  ;;  %v1124_v12 = vadd.f32 %v3297_v63, %v1123_v10  ;;  %v1125_v13 = vpop.f32.mrb[13].mxu0  ;;  %2297 = vst.msk [vmem:[%s3311_s4 + $0x114] sm:$0xf] %vm2227_vm0, %v2757_v9  ;;  %v1380_v15 = vadd.f32 %v3297_v63, %v1379_v11  ;;  %v1381_v16 = vpop.f32.mrb[13].mxu1 }
 0x133   : > { %v1126_v18 = vpop.f32.mrb[14].mxu0  ;;  %v1382_v19 = vpop.f32.mrb[14].mxu1 }
 0x134   : > { %v1607_v21 = vmax.f32 %v1124_v12, 0.0  ;;  %v1127_v22 = vadd.f32 %v3297_v63, %v1126_v18  ;;  %v1128_v23 = vpop.f32.mrb[15].mxu0  ;;  %v1671_v24 = vmax.f32 %v1380_v15, 0.0  ;;  %v1383_v25 = vadd.f32 %v3297_v63, %v1382_v19  ;;  %v1384_v26 = vpop.f32.mrb[15].mxu1 }
 0x136   : > { %v2694_v27 = vpack.c.bf16 %v1607_v21, %v1607_v21  ;;  %v1608_v28 = vmax.f32 %v1127_v22, 0.0  ;;  %1338 = vmatmul.mubr.bf16.gmra.mrb[120].mxu0 %v3052_v14  ;;  %v2758_v29 = vpack.c.bf16 %v1671_v24, %v1671_v24  ;;  %v1672_v30 = vmax.f32 %v1383_v25, 0.0  ;;  %1594 = vmatmul.mubr.bf16.gmra.mrb[120].mxu1 %v2542_v17 }
 0x137   : > { %1345 = vmatprep.mubr.bf16.mxu0 %v3054_v20 }
 0x138   : > { %2234 = vst.msk [vmem:[%s3311_s4 + $0x18] sm:$0xf] %vm2227_vm0, %v2694_v27  ;;  %v2695_v31 = vpack.c.bf16 %v1608_v28, %v1608_v28  ;;  %2298 = vst.msk [vmem:[%s3311_s4 + $0x118] sm:$0xf] %vm2227_vm0, %v2758_v29  ;;  %v2759_v32 = vpack.c.bf16 %v1672_v30, %v1672_v30 }
 0x139   : > { %v1131_v33 = vpop.f32.mrb[16].mxu0  ;;  %v1387_v34 = vpop.f32.mrb[16].mxu1 }
 0x13a   : > { %2235 = vst.msk [vmem:[%s3311_s4 + $0x1c] sm:$0xf] %vm2227_vm0, %v2695_v31  ;;  %v1132_v35 = vadd.f32 %v3297_v63, %v1131_v33  ;;  %v1133_v36 = vpop.f32.mrb[17].mxu0  ;;  %2299 = vst.msk [vmem:[%s3311_s4 + $0x11c] sm:$0xf] %vm2227_vm0, %v2759_v32  ;;  %v1388_v38 = vadd.f32 %v3297_v63, %v1387_v34  ;;  %v1389_v39 = vpop.f32.mrb[17].mxu1 }
 0x13b   : > { %v1134_v40 = vpop.f32.mrb[18].mxu0  ;;  %v1390_v41 = vpop.f32.mrb[18].mxu1 }
 0x13c   : > { %v1609_v42 = vmax.f32 %v1132_v35, 0.0  ;;  %v1135_v43 = vadd.f32 %v3297_v63, %v1134_v40  ;;  %v1136_v44 = vpop.f32.mrb[19].mxu0  ;;  %v1673_v45 = vmax.f32 %v1388_v38, 0.0  ;;  %v1391_v46 = vadd.f32 %v3297_v63, %v1390_v41  ;;  %v1392_v47 = vpop.f32.mrb[19].mxu1 }
 0x13e   : > { %v2696_v48 = vpack.c.bf16 %v1609_v42, %v1609_v42  ;;  %v1610_v49 = vmax.f32 %v1135_v43, 0.0  ;;  %1346 = vmatmul.mubr.bf16.gmra.mrb[124].mxu0 %v3057_v37  ;;  %v2760_v50 = vpack.c.bf16 %v1673_v45, %v1673_v45  ;;  %v1674_v51 = vmax.f32 %v1391_v46, 0.0 }
 0x140   : > { %2236 = vst.msk [vmem:[%s3311_s4 + $0x20] sm:$0xf] %vm2227_vm0, %v2696_v48  ;;  %v2697_v52 = vpack.c.bf16 %v1610_v49, %v1610_v49  ;;  %2300 = vst.msk [vmem:[%s3311_s4 + $0x120] sm:$0xf] %vm2227_vm0, %v2760_v50  ;;  %v2761_v53 = vpack.c.bf16 %v1674_v51, %v1674_v51 }
 0x141   : > { %v1139_v54 = vpop.f32.mrb[20].mxu0  ;;  %v1395_v55 = vpop.f32.mrb[20].mxu1 }
 0x142   : > { %2237 = vst.msk [vmem:[%s3311_s4 + $0x24] sm:$0xf] %vm2227_vm0, %v2697_v52  ;;  %v1140_v56 = vadd.f32 %v3297_v63, %v1139_v54  ;;  %v1141_v57 = vpop.f32.mrb[21].mxu0  ;;  %2301 = vst.msk [vmem:[%s3311_s4 + $0x124] sm:$0xf] %vm2227_vm0, %v2761_v53  ;;  %v1396_v58 = vadd.f32 %v3297_v63, %v1395_v55  ;;  %v1397_v59 = vpop.f32.mrb[21].mxu1 }
 0x143   : > { %v1142_v60 = vpop.f32.mrb[22].mxu0  ;;  %v1398_v61 = vpop.f32.mrb[22].mxu1 }
 0x144   : > { %v1611_v62 = vmax.f32 %v1140_v56, 0.0  ;;  %v1143_v0 = vadd.f32 %v3297_v63, %v1142_v60  ;;  %v1144_v1 = vpop.f32.mrb[23].mxu0  ;;  %v1675_v2 = vmax.f32 %v1396_v58, 0.0  ;;  %v1399_v3 = vadd.f32 %v3297_v63, %v1398_v61  ;;  %v1400_v4 = vpop.f32.mrb[23].mxu1 }
 0x146   : > { %v2698_v5 = vpack.c.bf16 %v1611_v62, %v1611_v62  ;;  %v1612_v6 = vmax.f32 %v1143_v0, 0.0  ;;  %v2762_v7 = vpack.c.bf16 %v1675_v2, %v1675_v2  ;;  %v1676_v8 = vmax.f32 %v1399_v3, 0.0 }
 0x148   : > { %2238 = vst.msk [vmem:[%s3311_s4 + $0x28] sm:$0xf] %vm2227_vm0, %v2698_v5  ;;  %v2699_v9 = vpack.c.bf16 %v1612_v6, %v1612_v6  ;;  %2302 = vst.msk [vmem:[%s3311_s4 + $0x128] sm:$0xf] %vm2227_vm0, %v2762_v7  ;;  %v2763_v10 = vpack.c.bf16 %v1676_v8, %v1676_v8 }
 0x149   : > { %v1147_v11 = vpop.f32.mrb[24].mxu0  ;;  %v1403_v12 = vpop.f32.mrb[24].mxu1 }
 0x14a   : > { %2239 = vst.msk [vmem:[%s3311_s4 + $0x2c] sm:$0xf] %vm2227_vm0, %v2699_v9  ;;  %v1148_v13 = vadd.f32 %v3297_v63, %v1147_v11  ;;  %v1149_v14 = vpop.f32.mrb[25].mxu0  ;;  %2303 = vst.msk [vmem:[%s3311_s4 + $0x12c] sm:$0xf] %vm2227_vm0, %v2763_v10  ;;  %v1404_v15 = vadd.f32 %v3297_v63, %v1403_v12  ;;  %v1405_v16 = vpop.f32.mrb[25].mxu1 }
 0x14b   : > { %v1150_v17 = vpop.f32.mrb[26].mxu0  ;;  %v1406_v18 = vpop.f32.mrb[26].mxu1 }
 0x14c   : > { %v1613_v19 = vmax.f32 %v1148_v13, 0.0  ;;  %v1151_v20 = vadd.f32 %v3297_v63, %v1150_v17  ;;  %v1152_v21 = vpop.f32.mrb[27].mxu0  ;;  %v1677_v22 = vmax.f32 %v1404_v15, 0.0  ;;  %v1407_v23 = vadd.f32 %v3297_v63, %v1406_v18  ;;  %v1408_v24 = vpop.f32.mrb[27].mxu1 }
 0x14e   : > { %v2700_v25 = vpack.c.bf16 %v1613_v19, %v1613_v19  ;;  %v1614_v26 = vmax.f32 %v1151_v20, 0.0  ;;  %v2764_v27 = vpack.c.bf16 %v1677_v22, %v1677_v22  ;;  %v1678_v28 = vmax.f32 %v1407_v23, 0.0 }
 0x150   : > { %2240 = vst.msk [vmem:[%s3311_s4 + $0x30] sm:$0xf] %vm2227_vm0, %v2700_v25  ;;  %v2701_v29 = vpack.c.bf16 %v1614_v26, %v1614_v26  ;;  %2304 = vst.msk [vmem:[%s3311_s4 + $0x130] sm:$0xf] %vm2227_vm0, %v2764_v27  ;;  %v2765_v30 = vpack.c.bf16 %v1678_v28, %v1678_v28 }
 0x151   : > { %v1155_v31 = vpop.f32.mrb[28].mxu0  ;;  %v1411_v32 = vpop.f32.mrb[28].mxu1 }
 0x152   : > { %2241 = vst.msk [vmem:[%s3311_s4 + $0x34] sm:$0xf] %vm2227_vm0, %v2701_v29  ;;  %v1156_v33 = vadd.f32 %v3297_v63, %v1155_v31  ;;  %v1157_v34 = vpop.f32.mrb[29].mxu0  ;;  %2305 = vst.msk [vmem:[%s3311_s4 + $0x134] sm:$0xf] %vm2227_vm0, %v2765_v30  ;;  %v1412_v35 = vadd.f32 %v3297_v63, %v1411_v32  ;;  %v1413_v36 = vpop.f32.mrb[29].mxu1 }
 0x153   : > { %v1158_v37 = vpop.f32.mrb[30].mxu0  ;;  %v1414_v38 = vpop.f32.mrb[30].mxu1 }
 0x154   : > { %v1615_v39 = vmax.f32 %v1156_v33, 0.0  ;;  %v1159_v40 = vadd.f32 %v3297_v63, %v1158_v37  ;;  %v1160_v41 = vpop.f32.mrb[31].mxu0  ;;  %v1679_v42 = vmax.f32 %v1412_v35, 0.0  ;;  %v1415_v43 = vadd.f32 %v3297_v63, %v1414_v38  ;;  %v1416_v44 = vpop.f32.mrb[31].mxu1 }
 0x156   : > { %v2702_v45 = vpack.c.bf16 %v1615_v39, %v1615_v39  ;;  %v1616_v46 = vmax.f32 %v1159_v40, 0.0  ;;  %v2766_v47 = vpack.c.bf16 %v1679_v42, %v1679_v42  ;;  %v1680_v48 = vmax.f32 %v1415_v43, 0.0 }
 0x158   : > { %2242 = vst.msk [vmem:[%s3311_s4 + $0x38] sm:$0xf] %vm2227_vm0, %v2702_v45  ;;  %v2703_v49 = vpack.c.bf16 %v1616_v46, %v1616_v46  ;;  %2306 = vst.msk [vmem:[%s3311_s4 + $0x138] sm:$0xf] %vm2227_vm0, %v2766_v47  ;;  %v2767_v50 = vpack.c.bf16 %v1680_v48, %v1680_v48 }
 0x159   : > { %v1163_v51 = vpop.f32.mrb[32].mxu0  ;;  %v1419_v52 = vpop.f32.mrb[32].mxu1 }
 0x15a   : > { %2243 = vst.msk [vmem:[%s3311_s4 + $0x3c] sm:$0xf] %vm2227_vm0, %v2703_v49  ;;  %v1164_v53 = vadd.f32 %v3297_v63, %v1163_v51  ;;  %v1165_v54 = vpop.f32.mrb[33].mxu0  ;;  %2307 = vst.msk [vmem:[%s3311_s4 + $0x13c] sm:$0xf] %vm2227_vm0, %v2767_v50  ;;  %v1420_v55 = vadd.f32 %v3297_v63, %v1419_v52  ;;  %v1421_v56 = vpop.f32.mrb[33].mxu1 }
 0x15b   : > { %v1166_v57 = vpop.f32.mrb[34].mxu0  ;;  %v1422_v58 = vpop.f32.mrb[34].mxu1 }
 0x15c   : > { %v1617_v59 = vmax.f32 %v1164_v53, 0.0  ;;  %v1167_v60 = vadd.f32 %v3297_v63, %v1166_v57  ;;  %v1168_v61 = vpop.f32.mrb[35].mxu0  ;;  %v1681_v62 = vmax.f32 %v1420_v55, 0.0  ;;  %v1423_v0 = vadd.f32 %v3297_v63, %v1422_v58  ;;  %v1424_v1 = vpop.f32.mrb[35].mxu1 }
 0x15e   : > { %v2704_v2 = vpack.c.bf16 %v1617_v59, %v1617_v59  ;;  %v1618_v3 = vmax.f32 %v1167_v60, 0.0  ;;  %v2768_v4 = vpack.c.bf16 %v1681_v62, %v1681_v62  ;;  %v1682_v5 = vmax.f32 %v1423_v0, 0.0 }
 0x160   : > { %2244 = vst.msk [vmem:[%s3311_s4 + $0x40] sm:$0xf] %vm2227_vm0, %v2704_v2  ;;  %v2705_v6 = vpack.c.bf16 %v1618_v3, %v1618_v3  ;;  %2308 = vst.msk [vmem:[%s3311_s4 + $0x140] sm:$0xf] %vm2227_vm0, %v2768_v4  ;;  %v2769_v7 = vpack.c.bf16 %v1682_v5, %v1682_v5 }
 0x161   : > { %v1171_v8 = vpop.f32.mrb[36].mxu0  ;;  %v1427_v9 = vpop.f32.mrb[36].mxu1 }
 0x162   : > { %2245 = vst.msk [vmem:[%s3311_s4 + $0x44] sm:$0xf] %vm2227_vm0, %v2705_v6  ;;  %v1172_v10 = vadd.f32 %v3297_v63, %v1171_v8  ;;  %v1173_v11 = vpop.f32.mrb[37].mxu0  ;;  %2309 = vst.msk [vmem:[%s3311_s4 + $0x144] sm:$0xf] %vm2227_vm0, %v2769_v7  ;;  %v1428_v12 = vadd.f32 %v3297_v63, %v1427_v9  ;;  %v1429_v13 = vpop.f32.mrb[37].mxu1 }
 0x163   : > { %v1174_v14 = vpop.f32.mrb[38].mxu0  ;;  %v1430_v15 = vpop.f32.mrb[38].mxu1 }
 0x164   : > { %v1619_v16 = vmax.f32 %v1172_v10, 0.0  ;;  %v1175_v17 = vadd.f32 %v3297_v63, %v1174_v14  ;;  %v1176_v18 = vpop.f32.mrb[39].mxu0  ;;  %v1683_v19 = vmax.f32 %v1428_v12, 0.0  ;;  %v1431_v20 = vadd.f32 %v3297_v63, %v1430_v15  ;;  %v1432_v21 = vpop.f32.mrb[39].mxu1 }
 0x166   : > { %v2706_v22 = vpack.c.bf16 %v1619_v16, %v1619_v16  ;;  %v1620_v23 = vmax.f32 %v1175_v17, 0.0  ;;  %v2770_v24 = vpack.c.bf16 %v1683_v19, %v1683_v19  ;;  %v1684_v25 = vmax.f32 %v1431_v20, 0.0 }
 0x168   : > { %2246 = vst.msk [vmem:[%s3311_s4 + $0x48] sm:$0xf] %vm2227_vm0, %v2706_v22  ;;  %v2707_v26 = vpack.c.bf16 %v1620_v23, %v1620_v23  ;;  %2310 = vst.msk [vmem:[%s3311_s4 + $0x148] sm:$0xf] %vm2227_vm0, %v2770_v24  ;;  %v2771_v27 = vpack.c.bf16 %v1684_v25, %v1684_v25 }
 0x169   : > { %v1179_v28 = vpop.f32.mrb[40].mxu0  ;;  %v1435_v29 = vpop.f32.mrb[40].mxu1 }
 0x16a   : > { %2247 = vst.msk [vmem:[%s3311_s4 + $0x4c] sm:$0xf] %vm2227_vm0, %v2707_v26  ;;  %v1180_v30 = vadd.f32 %v3297_v63, %v1179_v28  ;;  %v1181_v31 = vpop.f32.mrb[41].mxu0  ;;  %2311 = vst.msk [vmem:[%s3311_s4 + $0x14c] sm:$0xf] %vm2227_vm0, %v2771_v27  ;;  %v1436_v32 = vadd.f32 %v3297_v63, %v1435_v29  ;;  %v1437_v33 = vpop.f32.mrb[41].mxu1 }
 0x16b   : > { %v1182_v34 = vpop.f32.mrb[42].mxu0  ;;  %v1438_v35 = vpop.f32.mrb[42].mxu1 }
 0x16c   : > { %v1621_v36 = vmax.f32 %v1180_v30, 0.0  ;;  %v1183_v37 = vadd.f32 %v3297_v63, %v1182_v34  ;;  %v1184_v38 = vpop.f32.mrb[43].mxu0  ;;  %v1685_v39 = vmax.f32 %v1436_v32, 0.0  ;;  %v1439_v40 = vadd.f32 %v3297_v63, %v1438_v35  ;;  %v1440_v41 = vpop.f32.mrb[43].mxu1 }
 0x16e   : > { %v2708_v42 = vpack.c.bf16 %v1621_v36, %v1621_v36  ;;  %v1622_v43 = vmax.f32 %v1183_v37, 0.0  ;;  %v2772_v44 = vpack.c.bf16 %v1685_v39, %v1685_v39  ;;  %v1686_v45 = vmax.f32 %v1439_v40, 0.0 }
 0x170   : > { %2248 = vst.msk [vmem:[%s3311_s4 + $0x50] sm:$0xf] %vm2227_vm0, %v2708_v42  ;;  %v2709_v46 = vpack.c.bf16 %v1622_v43, %v1622_v43  ;;  %2312 = vst.msk [vmem:[%s3311_s4 + $0x150] sm:$0xf] %vm2227_vm0, %v2772_v44  ;;  %v2773_v47 = vpack.c.bf16 %v1686_v45, %v1686_v45 }
 0x171   : > { %v1187_v48 = vpop.f32.mrb[44].mxu0  ;;  %v1443_v49 = vpop.f32.mrb[44].mxu1 }
 0x172   : > { %2249 = vst.msk [vmem:[%s3311_s4 + $0x54] sm:$0xf] %vm2227_vm0, %v2709_v46  ;;  %v1188_v50 = vadd.f32 %v3297_v63, %v1187_v48  ;;  %v1189_v51 = vpop.f32.mrb[45].mxu0  ;;  %2313 = vst.msk [vmem:[%s3311_s4 + $0x154] sm:$0xf] %vm2227_vm0, %v2773_v47  ;;  %v1444_v52 = vadd.f32 %v3297_v63, %v1443_v49  ;;  %v1445_v53 = vpop.f32.mrb[45].mxu1 }
 0x173   : > { %v1190_v54 = vpop.f32.mrb[46].mxu0  ;;  %v1446_v55 = vpop.f32.mrb[46].mxu1 }
 0x174   : > { %v1623_v56 = vmax.f32 %v1188_v50, 0.0  ;;  %v1191_v57 = vadd.f32 %v3297_v63, %v1190_v54  ;;  %v1192_v58 = vpop.f32.mrb[47].mxu0  ;;  %v1687_v59 = vmax.f32 %v1444_v52, 0.0  ;;  %v1447_v60 = vadd.f32 %v3297_v63, %v1446_v55  ;;  %v1448_v61 = vpop.f32.mrb[47].mxu1 }
 0x176   : > { %v2710_v62 = vpack.c.bf16 %v1623_v56, %v1623_v56  ;;  %v1624_v0 = vmax.f32 %v1191_v57, 0.0  ;;  %v2774_v1 = vpack.c.bf16 %v1687_v59, %v1687_v59  ;;  %v1688_v2 = vmax.f32 %v1447_v60, 0.0 }
 0x178   : > { %2250 = vst.msk [vmem:[%s3311_s4 + $0x58] sm:$0xf] %vm2227_vm0, %v2710_v62  ;;  %v2711_v3 = vpack.c.bf16 %v1624_v0, %v1624_v0  ;;  %2314 = vst.msk [vmem:[%s3311_s4 + $0x158] sm:$0xf] %vm2227_vm0, %v2774_v1  ;;  %v2775_v4 = vpack.c.bf16 %v1688_v2, %v1688_v2 }
 0x179   : > { %v1195_v5 = vpop.f32.mrb[48].mxu0  ;;  %v1451_v6 = vpop.f32.mrb[48].mxu1 }
 0x17a   : > { %2251 = vst.msk [vmem:[%s3311_s4 + $0x5c] sm:$0xf] %vm2227_vm0, %v2711_v3  ;;  %v1196_v7 = vadd.f32 %v3297_v63, %v1195_v5  ;;  %v1197_v8 = vpop.f32.mrb[49].mxu0  ;;  %2315 = vst.msk [vmem:[%s3311_s4 + $0x15c] sm:$0xf] %vm2227_vm0, %v2775_v4  ;;  %v1452_v9 = vadd.f32 %v3297_v63, %v1451_v6  ;;  %v1453_v10 = vpop.f32.mrb[49].mxu1 }
 0x17b   : > { %v1198_v11 = vpop.f32.mrb[50].mxu0  ;;  %v1454_v12 = vpop.f32.mrb[50].mxu1 }
 0x17c   : > { %v1625_v13 = vmax.f32 %v1196_v7, 0.0  ;;  %v1199_v14 = vadd.f32 %v3297_v63, %v1198_v11  ;;  %v1200_v15 = vpop.f32.mrb[51].mxu0  ;;  %v1689_v16 = vmax.f32 %v1452_v9, 0.0  ;;  %v1455_v17 = vadd.f32 %v3297_v63, %v1454_v12  ;;  %v1456_v18 = vpop.f32.mrb[51].mxu1 }
 0x17e   : > { %v2712_v19 = vpack.c.bf16 %v1625_v13, %v1625_v13  ;;  %v1626_v20 = vmax.f32 %v1199_v14, 0.0  ;;  %v2776_v21 = vpack.c.bf16 %v1689_v16, %v1689_v16  ;;  %v1690_v22 = vmax.f32 %v1455_v17, 0.0 }
 0x180   : > { %2252 = vst.msk [vmem:[%s3311_s4 + $0x60] sm:$0xf] %vm2227_vm0, %v2712_v19  ;;  %v2713_v23 = vpack.c.bf16 %v1626_v20, %v1626_v20  ;;  %2316 = vst.msk [vmem:[%s3311_s4 + $0x160] sm:$0xf] %vm2227_vm0, %v2776_v21  ;;  %v2777_v24 = vpack.c.bf16 %v1690_v22, %v1690_v22 }
 0x181   : > { %v1203_v25 = vpop.f32.mrb[52].mxu0  ;;  %v1459_v26 = vpop.f32.mrb[52].mxu1 }
 0x182   : > { %2253 = vst.msk [vmem:[%s3311_s4 + $0x64] sm:$0xf] %vm2227_vm0, %v2713_v23  ;;  %v1204_v27 = vadd.f32 %v3297_v63, %v1203_v25  ;;  %v1205_v28 = vpop.f32.mrb[53].mxu0  ;;  %2317 = vst.msk [vmem:[%s3311_s4 + $0x164] sm:$0xf] %vm2227_vm0, %v2777_v24  ;;  %v1460_v29 = vadd.f32 %v3297_v63, %v1459_v26  ;;  %v1461_v30 = vpop.f32.mrb[53].mxu1 }
 0x183   : > { %v1206_v31 = vpop.f32.mrb[54].mxu0  ;;  %v1462_v32 = vpop.f32.mrb[54].mxu1 }
 0x184   : > { %v1627_v33 = vmax.f32 %v1204_v27, 0.0  ;;  %v1207_v34 = vadd.f32 %v3297_v63, %v1206_v31  ;;  %v1208_v35 = vpop.f32.mrb[55].mxu0  ;;  %v1691_v36 = vmax.f32 %v1460_v29, 0.0  ;;  %v1463_v37 = vadd.f32 %v3297_v63, %v1462_v32  ;;  %v1464_v38 = vpop.f32.mrb[55].mxu1 }
 0x186   : > { %v2714_v39 = vpack.c.bf16 %v1627_v33, %v1627_v33  ;;  %v1628_v40 = vmax.f32 %v1207_v34, 0.0  ;;  %v2778_v41 = vpack.c.bf16 %v1691_v36, %v1691_v36  ;;  %v1692_v42 = vmax.f32 %v1463_v37, 0.0 }
 0x188   : > { %2254 = vst.msk [vmem:[%s3311_s4 + $0x68] sm:$0xf] %vm2227_vm0, %v2714_v39  ;;  %v2715_v43 = vpack.c.bf16 %v1628_v40, %v1628_v40  ;;  %2318 = vst.msk [vmem:[%s3311_s4 + $0x168] sm:$0xf] %vm2227_vm0, %v2778_v41  ;;  %v2779_v44 = vpack.c.bf16 %v1692_v42, %v1692_v42 }
 0x189   : > { %v1211_v45 = vpop.f32.mrb[56].mxu0  ;;  %v1467_v46 = vpop.f32.mrb[56].mxu1 }
 0x18a   : > { %2255 = vst.msk [vmem:[%s3311_s4 + $0x6c] sm:$0xf] %vm2227_vm0, %v2715_v43  ;;  %v1212_v47 = vadd.f32 %v3297_v63, %v1211_v45  ;;  %v1213_v48 = vpop.f32.mrb[57].mxu0  ;;  %2319 = vst.msk [vmem:[%s3311_s4 + $0x16c] sm:$0xf] %vm2227_vm0, %v2779_v44  ;;  %v1468_v49 = vadd.f32 %v3297_v63, %v1467_v46  ;;  %v1469_v50 = vpop.f32.mrb[57].mxu1 }
 0x18b   : > { %v1214_v51 = vpop.f32.mrb[58].mxu0  ;;  %v1470_v52 = vpop.f32.mrb[58].mxu1 }
 0x18c   : > { %v1629_v53 = vmax.f32 %v1212_v47, 0.0  ;;  %v1215_v54 = vadd.f32 %v3297_v63, %v1214_v51  ;;  %v1216_v55 = vpop.f32.mrb[59].mxu0  ;;  %v1693_v56 = vmax.f32 %v1468_v49, 0.0  ;;  %v1471_v57 = vadd.f32 %v3297_v63, %v1470_v52  ;;  %v1472_v58 = vpop.f32.mrb[59].mxu1 }
 0x18e   : > { %v2716_v59 = vpack.c.bf16 %v1629_v53, %v1629_v53  ;;  %v1630_v60 = vmax.f32 %v1215_v54, 0.0  ;;  %v2780_v61 = vpack.c.bf16 %v1693_v56, %v1693_v56  ;;  %v1694_v62 = vmax.f32 %v1471_v57, 0.0 }
 0x190   : > { %2256 = vst.msk [vmem:[%s3311_s4 + $0x70] sm:$0xf] %vm2227_vm0, %v2716_v59  ;;  %v2717_v0 = vpack.c.bf16 %v1630_v60, %v1630_v60  ;;  %2320 = vst.msk [vmem:[%s3311_s4 + $0x170] sm:$0xf] %vm2227_vm0, %v2780_v61  ;;  %v2781_v1 = vpack.c.bf16 %v1694_v62, %v1694_v62 }
 0x191   : > { %v1219_v2 = vpop.f32.mrb[60].mxu0  ;;  %v1475_v3 = vpop.f32.mrb[60].mxu1 }
 0x192   : > { %2257 = vst.msk [vmem:[%s3311_s4 + $0x74] sm:$0xf] %vm2227_vm0, %v2717_v0  ;;  %v1220_v4 = vadd.f32 %v3297_v63, %v1219_v2  ;;  %v1221_v5 = vpop.f32.mrb[61].mxu0  ;;  %2321 = vst.msk [vmem:[%s3311_s4 + $0x174] sm:$0xf] %vm2227_vm0, %v2781_v1  ;;  %v1476_v6 = vadd.f32 %v3297_v63, %v1475_v3  ;;  %v1477_v7 = vpop.f32.mrb[61].mxu1 }
 0x193   : > { %v1222_v8 = vpop.f32.mrb[62].mxu0  ;;  %v1478_v9 = vpop.f32.mrb[62].mxu1 }
 0x194   : > { %v1631_v10 = vmax.f32 %v1220_v4, 0.0  ;;  %v1223_v11 = vadd.f32 %v3297_v63, %v1222_v8  ;;  %v1224_v12 = vpop.f32.mrb[63].mxu0  ;;  %v1695_v13 = vmax.f32 %v1476_v6, 0.0  ;;  %v1479_v14 = vadd.f32 %v3297_v63, %v1478_v9  ;;  %v1480_v15 = vpop.f32.mrb[63].mxu1 }
 0x196   : > { %v2718_v16 = vpack.c.bf16 %v1631_v10, %v1631_v10  ;;  %v1632_v17 = vmax.f32 %v1223_v11, 0.0  ;;  %v2782_v18 = vpack.c.bf16 %v1695_v13, %v1695_v13  ;;  %v1696_v19 = vmax.f32 %v1479_v14, 0.0 }
 0x198   : > { %2258 = vst.msk [vmem:[%s3311_s4 + $0x78] sm:$0xf] %vm2227_vm0, %v2718_v16  ;;  %v2719_v20 = vpack.c.bf16 %v1632_v17, %v1632_v17  ;;  %2322 = vst.msk [vmem:[%s3311_s4 + $0x178] sm:$0xf] %vm2227_vm0, %v2782_v18  ;;  %v2783_v21 = vpack.c.bf16 %v1696_v19, %v1696_v19 }
 0x199   : > { %v1227_v22 = vpop.f32.mrb[64].mxu0  ;;  %v1483_v23 = vpop.f32.mrb[64].mxu1 }
 0x19a   : > { %2259 = vst.msk [vmem:[%s3311_s4 + $0x7c] sm:$0xf] %vm2227_vm0, %v2719_v20  ;;  %v1228_v24 = vadd.f32 %v3297_v63, %v1227_v22  ;;  %v1229_v25 = vpop.f32.mrb[65].mxu0  ;;  %2323 = vst.msk [vmem:[%s3311_s4 + $0x17c] sm:$0xf] %vm2227_vm0, %v2783_v21  ;;  %v1484_v26 = vadd.f32 %v3297_v63, %v1483_v23  ;;  %v1485_v27 = vpop.f32.mrb[65].mxu1 }
 0x19b   : > { %v1230_v28 = vpop.f32.mrb[66].mxu0  ;;  %v1486_v29 = vpop.f32.mrb[66].mxu1 }
 0x19c   : > { %v1633_v30 = vmax.f32 %v1228_v24, 0.0  ;;  %v1231_v31 = vadd.f32 %v3297_v63, %v1230_v28  ;;  %v1232_v32 = vpop.f32.mrb[67].mxu0  ;;  %v1697_v33 = vmax.f32 %v1484_v26, 0.0  ;;  %v1487_v34 = vadd.f32 %v3297_v63, %v1486_v29  ;;  %v1488_v35 = vpop.f32.mrb[67].mxu1 }
 0x19e   : > { %v2720_v36 = vpack.c.bf16 %v1633_v30, %v1633_v30  ;;  %v1634_v37 = vmax.f32 %v1231_v31, 0.0  ;;  %v2784_v38 = vpack.c.bf16 %v1697_v33, %v1697_v33  ;;  %v1698_v39 = vmax.f32 %v1487_v34, 0.0 }
 0x1a0   : > { %2260 = vst.msk [vmem:[%s3311_s4 + $0x80] sm:$0xf] %vm2227_vm0, %v2720_v36  ;;  %v2721_v40 = vpack.c.bf16 %v1634_v37, %v1634_v37  ;;  %2324 = vst.msk [vmem:[%s3311_s4 + $0x180] sm:$0xf] %vm2227_vm0, %v2784_v38  ;;  %v2785_v41 = vpack.c.bf16 %v1698_v39, %v1698_v39 }
 0x1a1   : > { %v1235_v42 = vpop.f32.mrb[68].mxu0  ;;  %v1491_v43 = vpop.f32.mrb[68].mxu1 }
 0x1a2   : > { %2261 = vst.msk [vmem:[%s3311_s4 + $0x84] sm:$0xf] %vm2227_vm0, %v2721_v40  ;;  %v1236_v44 = vadd.f32 %v3297_v63, %v1235_v42  ;;  %v1237_v45 = vpop.f32.mrb[69].mxu0  ;;  %2325 = vst.msk [vmem:[%s3311_s4 + $0x184] sm:$0xf] %vm2227_vm0, %v2785_v41  ;;  %v1492_v46 = vadd.f32 %v3297_v63, %v1491_v43  ;;  %v1493_v47 = vpop.f32.mrb[69].mxu1 }
 0x1a3   : > { %v1238_v48 = vpop.f32.mrb[70].mxu0  ;;  %v1494_v49 = vpop.f32.mrb[70].mxu1 }
 0x1a4   : > { %v1635_v50 = vmax.f32 %v1236_v44, 0.0  ;;  %v1239_v51 = vadd.f32 %v3297_v63, %v1238_v48  ;;  %v1240_v52 = vpop.f32.mrb[71].mxu0  ;;  %v1699_v53 = vmax.f32 %v1492_v46, 0.0  ;;  %v1495_v54 = vadd.f32 %v3297_v63, %v1494_v49  ;;  %v1496_v55 = vpop.f32.mrb[71].mxu1 }
 0x1a6   : > { %v2722_v56 = vpack.c.bf16 %v1635_v50, %v1635_v50  ;;  %v1636_v57 = vmax.f32 %v1239_v51, 0.0  ;;  %v2786_v58 = vpack.c.bf16 %v1699_v53, %v1699_v53  ;;  %v1700_v59 = vmax.f32 %v1495_v54, 0.0 }
 0x1a8   : > { %2262 = vst.msk [vmem:[%s3311_s4 + $0x88] sm:$0xf] %vm2227_vm0, %v2722_v56  ;;  %v2723_v60 = vpack.c.bf16 %v1636_v57, %v1636_v57  ;;  %2326 = vst.msk [vmem:[%s3311_s4 + $0x188] sm:$0xf] %vm2227_vm0, %v2786_v58  ;;  %v2787_v61 = vpack.c.bf16 %v1700_v59, %v1700_v59 }
 0x1a9   : > { %v1243_v62 = vpop.f32.mrb[72].mxu0  ;;  %v1499_v0 = vpop.f32.mrb[72].mxu1 }
 0x1aa   : > { %2263 = vst.msk [vmem:[%s3311_s4 + $0x8c] sm:$0xf] %vm2227_vm0, %v2723_v60  ;;  %v1244_v1 = vadd.f32 %v3297_v63, %v1243_v62  ;;  %v1245_v2 = vpop.f32.mrb[73].mxu0  ;;  %2327 = vst.msk [vmem:[%s3311_s4 + $0x18c] sm:$0xf] %vm2227_vm0, %v2787_v61  ;;  %v1500_v3 = vadd.f32 %v3297_v63, %v1499_v0  ;;  %v1501_v4 = vpop.f32.mrb[73].mxu1 }
 0x1ab   : > { %v1246_v5 = vpop.f32.mrb[74].mxu0  ;;  %v1502_v6 = vpop.f32.mrb[74].mxu1 }
 0x1ac   : > { %v1637_v7 = vmax.f32 %v1244_v1, 0.0  ;;  %v1247_v8 = vadd.f32 %v3297_v63, %v1246_v5  ;;  %v1248_v9 = vpop.f32.mrb[75].mxu0  ;;  %v1701_v10 = vmax.f32 %v1500_v3, 0.0  ;;  %v1503_v11 = vadd.f32 %v3297_v63, %v1502_v6  ;;  %v1504_v12 = vpop.f32.mrb[75].mxu1 }
 0x1ae   : > { %v2724_v13 = vpack.c.bf16 %v1637_v7, %v1637_v7  ;;  %v1638_v14 = vmax.f32 %v1247_v8, 0.0  ;;  %v2788_v15 = vpack.c.bf16 %v1701_v10, %v1701_v10  ;;  %v1702_v16 = vmax.f32 %v1503_v11, 0.0 }
 0x1b0   : > { %2264 = vst.msk [vmem:[%s3311_s4 + $0x90] sm:$0xf] %vm2227_vm0, %v2724_v13  ;;  %v2725_v17 = vpack.c.bf16 %v1638_v14, %v1638_v14  ;;  %2328 = vst.msk [vmem:[%s3311_s4 + $0x190] sm:$0xf] %vm2227_vm0, %v2788_v15  ;;  %v2789_v18 = vpack.c.bf16 %v1702_v16, %v1702_v16 }
 0x1b1   : > { %v1251_v19 = vpop.f32.mrb[76].mxu0  ;;  %v1507_v20 = vpop.f32.mrb[76].mxu1 }
 0x1b2   : > { %2265 = vst.msk [vmem:[%s3311_s4 + $0x94] sm:$0xf] %vm2227_vm0, %v2725_v17  ;;  %v1252_v21 = vadd.f32 %v3297_v63, %v1251_v19  ;;  %v1253_v22 = vpop.f32.mrb[77].mxu0  ;;  %2329 = vst.msk [vmem:[%s3311_s4 + $0x194] sm:$0xf] %vm2227_vm0, %v2789_v18  ;;  %v1508_v23 = vadd.f32 %v3297_v63, %v1507_v20  ;;  %v1509_v24 = vpop.f32.mrb[77].mxu1 }
 0x1b3   : > { %v1254_v25 = vpop.f32.mrb[78].mxu0  ;;  %v1510_v26 = vpop.f32.mrb[78].mxu1 }
 0x1b4   : > { %v1639_v27 = vmax.f32 %v1252_v21, 0.0  ;;  %v1255_v28 = vadd.f32 %v3297_v63, %v1254_v25  ;;  %v1256_v29 = vpop.f32.mrb[79].mxu0  ;;  %v1703_v30 = vmax.f32 %v1508_v23, 0.0  ;;  %v1511_v31 = vadd.f32 %v3297_v63, %v1510_v26  ;;  %v1512_v32 = vpop.f32.mrb[79].mxu1  ;;  %v3561_v63 = vld [vmem:[%s3705_s2] ss:$0 sm:$0xff] }
 0x1b6   : > { %v2726_v33 = vpack.c.bf16 %v1639_v27, %v1639_v27  ;;  %v1640_v34 = vmax.f32 %v1255_v28, 0.0  ;;  %v2790_v35 = vpack.c.bf16 %v1703_v30, %v1703_v30  ;;  %v1704_v36 = vmax.f32 %v1511_v31, 0.0 }
 0x1b8   : > { %2266 = vst.msk [vmem:[%s3311_s4 + $0x98] sm:$0xf] %vm2227_vm0, %v2726_v33  ;;  %v2727_v37 = vpack.c.bf16 %v1640_v34, %v1640_v34  ;;  %2330 = vst.msk [vmem:[%s3311_s4 + $0x198] sm:$0xf] %vm2227_vm0, %v2790_v35  ;;  %v2791_v38 = vpack.c.bf16 %v1704_v36, %v1704_v36 }
 0x1b9   : > { %v1259_v39 = vpop.f32.mrb[80].mxu0  ;;  %v1515_v40 = vpop.f32.mrb[80].mxu1 }
 0x1ba   : > { %2267 = vst.msk [vmem:[%s3311_s4 + $0x9c] sm:$0xf] %vm2227_vm0, %v2727_v37  ;;  %v1260_v41 = vadd.f32 %v3561_v63, %v1259_v39  ;;  %v1261_v42 = vpop.f32.mrb[81].mxu0  ;;  %2331 = vst.msk [vmem:[%s3311_s4 + $0x19c] sm:$0xf] %vm2227_vm0, %v2791_v38  ;;  %v1516_v43 = vadd.f32 %v3561_v63, %v1515_v40  ;;  %v1517_v44 = vpop.f32.mrb[81].mxu1 }
 0x1bb   : > { %v1262_v45 = vpop.f32.mrb[82].mxu0  ;;  %v1518_v46 = vpop.f32.mrb[82].mxu1 }
 0x1bc   : > { %v1641_v47 = vmax.f32 %v1260_v41, 0.0  ;;  %v1263_v48 = vadd.f32 %v3561_v63, %v1262_v45  ;;  %v1264_v49 = vpop.f32.mrb[83].mxu0  ;;  %v1705_v50 = vmax.f32 %v1516_v43, 0.0  ;;  %v1519_v51 = vadd.f32 %v3561_v63, %v1518_v46  ;;  %v1520_v52 = vpop.f32.mrb[83].mxu1 }
 0x1be   : > { %v2728_v53 = vpack.c.bf16 %v1641_v47, %v1641_v47  ;;  %v1642_v54 = vmax.f32 %v1263_v48, 0.0  ;;  %v2792_v55 = vpack.c.bf16 %v1705_v50, %v1705_v50  ;;  %v1706_v56 = vmax.f32 %v1519_v51, 0.0 }
 0x1c0   : > { %2268 = vst.msk [vmem:[%s3311_s4 + $0xa0] sm:$0xf] %vm2227_vm0, %v2728_v53  ;;  %v2729_v57 = vpack.c.bf16 %v1642_v54, %v1642_v54  ;;  %2332 = vst.msk [vmem:[%s3311_s4 + $0x1a0] sm:$0xf] %vm2227_vm0, %v2792_v55  ;;  %v2793_v58 = vpack.c.bf16 %v1706_v56, %v1706_v56 }
 0x1c1   : > { %v1267_v59 = vpop.f32.mrb[84].mxu0  ;;  %v1523_v60 = vpop.f32.mrb[84].mxu1 }
 0x1c2   : > { %2269 = vst.msk [vmem:[%s3311_s4 + $0xa4] sm:$0xf] %vm2227_vm0, %v2729_v57  ;;  %v1268_v61 = vadd.f32 %v3561_v63, %v1267_v59  ;;  %v1269_v62 = vpop.f32.mrb[85].mxu0  ;;  %2333 = vst.msk [vmem:[%s3311_s4 + $0x1a4] sm:$0xf] %vm2227_vm0, %v2793_v58  ;;  %v1524_v0 = vadd.f32 %v3561_v63, %v1523_v60  ;;  %v1525_v1 = vpop.f32.mrb[85].mxu1 }
 0x1c3   : > { %v1270_v2 = vpop.f32.mrb[86].mxu0  ;;  %v1526_v3 = vpop.f32.mrb[86].mxu1 }
 0x1c4   : > { %v1643_v4 = vmax.f32 %v1268_v61, 0.0  ;;  %v1271_v5 = vadd.f32 %v3561_v63, %v1270_v2  ;;  %v1272_v6 = vpop.f32.mrb[87].mxu0  ;;  %v1707_v7 = vmax.f32 %v1524_v0, 0.0  ;;  %v1527_v8 = vadd.f32 %v3561_v63, %v1526_v3  ;;  %v1528_v9 = vpop.f32.mrb[87].mxu1 }
 0x1c6   : > { %v2730_v10 = vpack.c.bf16 %v1643_v4, %v1643_v4  ;;  %v1644_v11 = vmax.f32 %v1271_v5, 0.0  ;;  %v2794_v12 = vpack.c.bf16 %v1707_v7, %v1707_v7  ;;  %v1708_v13 = vmax.f32 %v1527_v8, 0.0 }
 0x1c8   : > { %2270 = vst.msk [vmem:[%s3311_s4 + $0xa8] sm:$0xf] %vm2227_vm0, %v2730_v10  ;;  %v2731_v14 = vpack.c.bf16 %v1644_v11, %v1644_v11  ;;  %2334 = vst.msk [vmem:[%s3311_s4 + $0x1a8] sm:$0xf] %vm2227_vm0, %v2794_v12  ;;  %v2795_v15 = vpack.c.bf16 %v1708_v13, %v1708_v13 }
 0x1c9   : > { %v1275_v16 = vpop.f32.mrb[88].mxu0  ;;  %v1531_v17 = vpop.f32.mrb[88].mxu1 }
 0x1ca   : > { %2271 = vst.msk [vmem:[%s3311_s4 + $0xac] sm:$0xf] %vm2227_vm0, %v2731_v14  ;;  %v1276_v18 = vadd.f32 %v3561_v63, %v1275_v16  ;;  %v1277_v19 = vpop.f32.mrb[89].mxu0  ;;  %2335 = vst.msk [vmem:[%s3311_s4 + $0x1ac] sm:$0xf] %vm2227_vm0, %v2795_v15  ;;  %v1532_v20 = vadd.f32 %v3561_v63, %v1531_v17  ;;  %v1533_v21 = vpop.f32.mrb[89].mxu1 }
 0x1cb   : > { %v1278_v22 = vpop.f32.mrb[90].mxu0  ;;  %v1534_v23 = vpop.f32.mrb[90].mxu1 }
 0x1cc   : > { %v1645_v24 = vmax.f32 %v1276_v18, 0.0  ;;  %v1279_v25 = vadd.f32 %v3561_v63, %v1278_v22  ;;  %v1280_v26 = vpop.f32.mrb[91].mxu0  ;;  %v1709_v27 = vmax.f32 %v1532_v20, 0.0  ;;  %v1535_v28 = vadd.f32 %v3561_v63, %v1534_v23  ;;  %v1536_v29 = vpop.f32.mrb[91].mxu1 }
 0x1ce   : > { %v2732_v30 = vpack.c.bf16 %v1645_v24, %v1645_v24  ;;  %v1646_v31 = vmax.f32 %v1279_v25, 0.0  ;;  %v2796_v32 = vpack.c.bf16 %v1709_v27, %v1709_v27  ;;  %v1710_v33 = vmax.f32 %v1535_v28, 0.0 }
 0x1d0   : > { %2272 = vst.msk [vmem:[%s3311_s4 + $0xb0] sm:$0xf] %vm2227_vm0, %v2732_v30  ;;  %v2733_v34 = vpack.c.bf16 %v1646_v31, %v1646_v31  ;;  %2336 = vst.msk [vmem:[%s3311_s4 + $0x1b0] sm:$0xf] %vm2227_vm0, %v2796_v32  ;;  %v2797_v35 = vpack.c.bf16 %v1710_v33, %v1710_v33 }
 0x1d1   : > { %v1283_v36 = vpop.f32.mrb[92].mxu0  ;;  %v1539_v37 = vpop.f32.mrb[92].mxu1 }
 0x1d2   : > { %2273 = vst.msk [vmem:[%s3311_s4 + $0xb4] sm:$0xf] %vm2227_vm0, %v2733_v34  ;;  %v1284_v38 = vadd.f32 %v3561_v63, %v1283_v36  ;;  %v1285_v39 = vpop.f32.mrb[93].mxu0  ;;  %2337 = vst.msk [vmem:[%s3311_s4 + $0x1b4] sm:$0xf] %vm2227_vm0, %v2797_v35  ;;  %v1540_v40 = vadd.f32 %v3561_v63, %v1539_v37  ;;  %v1541_v41 = vpop.f32.mrb[93].mxu1 }
 0x1d3   : > { %v1286_v42 = vpop.f32.mrb[94].mxu0  ;;  %v1542_v43 = vpop.f32.mrb[94].mxu1 }
 0x1d4   : > { %v1647_v44 = vmax.f32 %v1284_v38, 0.0  ;;  %v1287_v45 = vadd.f32 %v3561_v63, %v1286_v42  ;;  %v1288_v46 = vpop.f32.mrb[95].mxu0  ;;  %v1711_v47 = vmax.f32 %v1540_v40, 0.0  ;;  %v1543_v48 = vadd.f32 %v3561_v63, %v1542_v43  ;;  %v1544_v49 = vpop.f32.mrb[95].mxu1 }
 0x1d6   : > { %v2734_v50 = vpack.c.bf16 %v1647_v44, %v1647_v44  ;;  %v1648_v51 = vmax.f32 %v1287_v45, 0.0  ;;  %v2798_v52 = vpack.c.bf16 %v1711_v47, %v1711_v47  ;;  %v1712_v53 = vmax.f32 %v1543_v48, 0.0 }
 0x1d8   : > { %2274 = vst.msk [vmem:[%s3311_s4 + $0xb8] sm:$0xf] %vm2227_vm0, %v2734_v50  ;;  %v2735_v54 = vpack.c.bf16 %v1648_v51, %v1648_v51  ;;  %2338 = vst.msk [vmem:[%s3311_s4 + $0x1b8] sm:$0xf] %vm2227_vm0, %v2798_v52  ;;  %v2799_v55 = vpack.c.bf16 %v1712_v53, %v1712_v53 }
 0x1d9   : > { %v1291_v56 = vpop.f32.mrb[96].mxu0  ;;  %v1547_v57 = vpop.f32.mrb[96].mxu1 }
 0x1da   : > { %2275 = vst.msk [vmem:[%s3311_s4 + $0xbc] sm:$0xf] %vm2227_vm0, %v2735_v54  ;;  %v1292_v58 = vadd.f32 %v3561_v63, %v1291_v56  ;;  %v1293_v59 = vpop.f32.mrb[97].mxu0  ;;  %2339 = vst.msk [vmem:[%s3311_s4 + $0x1bc] sm:$0xf] %vm2227_vm0, %v2799_v55  ;;  %v1548_v60 = vadd.f32 %v3561_v63, %v1547_v57  ;;  %v1549_v61 = vpop.f32.mrb[97].mxu1 }
 0x1db   : > { %v1294_v62 = vpop.f32.mrb[98].mxu0  ;;  %v1550_v0 = vpop.f32.mrb[98].mxu1 }
 0x1dc   : > { %v1649_v1 = vmax.f32 %v1292_v58, 0.0  ;;  %v1295_v2 = vadd.f32 %v3561_v63, %v1294_v62  ;;  %v1296_v3 = vpop.f32.mrb[99].mxu0  ;;  %v1713_v4 = vmax.f32 %v1548_v60, 0.0  ;;  %v1551_v5 = vadd.f32 %v3561_v63, %v1550_v0  ;;  %v1552_v6 = vpop.f32.mrb[99].mxu1 }
 0x1de   : > { %v2736_v7 = vpack.c.bf16 %v1649_v1, %v1649_v1  ;;  %v1650_v8 = vmax.f32 %v1295_v2, 0.0  ;;  %v2800_v9 = vpack.c.bf16 %v1713_v4, %v1713_v4  ;;  %v1714_v10 = vmax.f32 %v1551_v5, 0.0 }
 0x1e0   : > { %2276 = vst.msk [vmem:[%s3311_s4 + $0xc0] sm:$0xf] %vm2227_vm0, %v2736_v7  ;;  %v2737_v11 = vpack.c.bf16 %v1650_v8, %v1650_v8  ;;  %2340 = vst.msk [vmem:[%s3311_s4 + $0x1c0] sm:$0xf] %vm2227_vm0, %v2800_v9  ;;  %v2801_v12 = vpack.c.bf16 %v1714_v10, %v1714_v10 }
 0x1e1   : > { %v1299_v13 = vpop.f32.mrb[100].mxu0  ;;  %v1555_v14 = vpop.f32.mrb[100].mxu1 }
 0x1e2   : > { %2277 = vst.msk [vmem:[%s3311_s4 + $0xc4] sm:$0xf] %vm2227_vm0, %v2737_v11  ;;  %v1300_v15 = vadd.f32 %v3561_v63, %v1299_v13  ;;  %v1301_v16 = vpop.f32.mrb[101].mxu0  ;;  %2341 = vst.msk [vmem:[%s3311_s4 + $0x1c4] sm:$0xf] %vm2227_vm0, %v2801_v12  ;;  %v1556_v17 = vadd.f32 %v3561_v63, %v1555_v14  ;;  %v1557_v18 = vpop.f32.mrb[101].mxu1 }
 0x1e3   : > { %v1302_v19 = vpop.f32.mrb[102].mxu0  ;;  %v1558_v20 = vpop.f32.mrb[102].mxu1 }
 0x1e4   : > { %v1651_v21 = vmax.f32 %v1300_v15, 0.0  ;;  %v1303_v22 = vadd.f32 %v3561_v63, %v1302_v19  ;;  %v1304_v23 = vpop.f32.mrb[103].mxu0  ;;  %v1715_v24 = vmax.f32 %v1556_v17, 0.0  ;;  %v1559_v25 = vadd.f32 %v3561_v63, %v1558_v20  ;;  %v1560_v26 = vpop.f32.mrb[103].mxu1 }
 0x1e6   : > { %v2738_v27 = vpack.c.bf16 %v1651_v21, %v1651_v21  ;;  %v1652_v28 = vmax.f32 %v1303_v22, 0.0  ;;  %v2802_v29 = vpack.c.bf16 %v1715_v24, %v1715_v24  ;;  %v1716_v30 = vmax.f32 %v1559_v25, 0.0 }
 0x1e8   : > { %2278 = vst.msk [vmem:[%s3311_s4 + $0xc8] sm:$0xf] %vm2227_vm0, %v2738_v27  ;;  %v2739_v31 = vpack.c.bf16 %v1652_v28, %v1652_v28  ;;  %2342 = vst.msk [vmem:[%s3311_s4 + $0x1c8] sm:$0xf] %vm2227_vm0, %v2802_v29  ;;  %v2803_v32 = vpack.c.bf16 %v1716_v30, %v1716_v30 }
 0x1e9   : > { %v1307_v33 = vpop.f32.mrb[104].mxu0  ;;  %v1563_v34 = vpop.f32.mrb[104].mxu1 }
 0x1ea   : > { %2279 = vst.msk [vmem:[%s3311_s4 + $0xcc] sm:$0xf] %vm2227_vm0, %v2739_v31  ;;  %v1308_v35 = vadd.f32 %v3561_v63, %v1307_v33  ;;  %v1309_v36 = vpop.f32.mrb[105].mxu0  ;;  %2343 = vst.msk [vmem:[%s3311_s4 + $0x1cc] sm:$0xf] %vm2227_vm0, %v2803_v32  ;;  %v1564_v37 = vadd.f32 %v3561_v63, %v1563_v34  ;;  %v1565_v38 = vpop.f32.mrb[105].mxu1 }
 0x1eb   : > { %v1310_v39 = vpop.f32.mrb[106].mxu0  ;;  %v1566_v40 = vpop.f32.mrb[106].mxu1 }
 0x1ec   : > { %v1653_v41 = vmax.f32 %v1308_v35, 0.0  ;;  %v1311_v42 = vadd.f32 %v3561_v63, %v1310_v39  ;;  %v1312_v43 = vpop.f32.mrb[107].mxu0  ;;  %v1717_v44 = vmax.f32 %v1564_v37, 0.0  ;;  %v1567_v45 = vadd.f32 %v3561_v63, %v1566_v40  ;;  %v1568_v46 = vpop.f32.mrb[107].mxu1 }
 0x1ee   : > { %v2740_v47 = vpack.c.bf16 %v1653_v41, %v1653_v41  ;;  %v1654_v48 = vmax.f32 %v1311_v42, 0.0  ;;  %v2804_v49 = vpack.c.bf16 %v1717_v44, %v1717_v44  ;;  %v1718_v50 = vmax.f32 %v1567_v45, 0.0 }
 0x1f0   : > { %2280 = vst.msk [vmem:[%s3311_s4 + $0xd0] sm:$0xf] %vm2227_vm0, %v2740_v47  ;;  %v2741_v51 = vpack.c.bf16 %v1654_v48, %v1654_v48  ;;  %2344 = vst.msk [vmem:[%s3311_s4 + $0x1d0] sm:$0xf] %vm2227_vm0, %v2804_v49  ;;  %v2805_v52 = vpack.c.bf16 %v1718_v50, %v1718_v50 }
 0x1f1   : > { %v1315_v53 = vpop.f32.mrb[108].mxu0  ;;  %v1571_v54 = vpop.f32.mrb[108].mxu1 }
 0x1f2   : > { %2281 = vst.msk [vmem:[%s3311_s4 + $0xd4] sm:$0xf] %vm2227_vm0, %v2741_v51  ;;  %v1316_v55 = vadd.f32 %v3561_v63, %v1315_v53  ;;  %v1317_v56 = vpop.f32.mrb[109].mxu0  ;;  %2345 = vst.msk [vmem:[%s3311_s4 + $0x1d4] sm:$0xf] %vm2227_vm0, %v2805_v52  ;;  %v1572_v57 = vadd.f32 %v3561_v63, %v1571_v54  ;;  %v1573_v58 = vpop.f32.mrb[109].mxu1 }
 0x1f3   : > { %v1318_v59 = vpop.f32.mrb[110].mxu0  ;;  %v1574_v60 = vpop.f32.mrb[110].mxu1 }
 0x1f4   : > { %v1655_v61 = vmax.f32 %v1316_v55, 0.0  ;;  %v1319_v62 = vadd.f32 %v3561_v63, %v1318_v59  ;;  %v1320_v0 = vpop.f32.mrb[111].mxu0  ;;  %v1719_v1 = vmax.f32 %v1572_v57, 0.0  ;;  %v1575_v2 = vadd.f32 %v3561_v63, %v1574_v60  ;;  %v1576_v3 = vpop.f32.mrb[111].mxu1 }
 0x1f6   : > { %v2742_v4 = vpack.c.bf16 %v1655_v61, %v1655_v61  ;;  %v1656_v5 = vmax.f32 %v1319_v62, 0.0  ;;  %v2806_v6 = vpack.c.bf16 %v1719_v1, %v1719_v1  ;;  %v1720_v7 = vmax.f32 %v1575_v2, 0.0 }
 0x1f8   : > { %2282 = vst.msk [vmem:[%s3311_s4 + $0xd8] sm:$0xf] %vm2227_vm0, %v2742_v4  ;;  %v2743_v8 = vpack.c.bf16 %v1656_v5, %v1656_v5  ;;  %2346 = vst.msk [vmem:[%s3311_s4 + $0x1d8] sm:$0xf] %vm2227_vm0, %v2806_v6  ;;  %v2807_v9 = vpack.c.bf16 %v1720_v7, %v1720_v7 }
 0x1f9   : > { %v1323_v10 = vpop.f32.mrb[112].mxu0  ;;  %v1579_v11 = vpop.f32.mrb[112].mxu1 }
 0x1fa   : > { %2283 = vst.msk [vmem:[%s3311_s4 + $0xdc] sm:$0xf] %vm2227_vm0, %v2743_v8  ;;  %v1324_v12 = vadd.f32 %v3561_v63, %v1323_v10  ;;  %v1325_v13 = vpop.f32.mrb[113].mxu0  ;;  %2347 = vst.msk [vmem:[%s3311_s4 + $0x1dc] sm:$0xf] %vm2227_vm0, %v2807_v9  ;;  %v1580_v14 = vadd.f32 %v3561_v63, %v1579_v11  ;;  %v1581_v15 = vpop.f32.mrb[113].mxu1 }
 0x1fb   : > { %v1326_v16 = vpop.f32.mrb[114].mxu0  ;;  %v1582_v17 = vpop.f32.mrb[114].mxu1 }
 0x1fc   : > { %v1657_v18 = vmax.f32 %v1324_v12, 0.0  ;;  %v1327_v19 = vadd.f32 %v3561_v63, %v1326_v16  ;;  %v1328_v20 = vpop.f32.mrb[115].mxu0  ;;  %v1721_v21 = vmax.f32 %v1580_v14, 0.0  ;;  %v1583_v22 = vadd.f32 %v3561_v63, %v1582_v17  ;;  %v1584_v23 = vpop.f32.mrb[115].mxu1 }
 0x1fe   : > { %v2744_v24 = vpack.c.bf16 %v1657_v18, %v1657_v18  ;;  %v1658_v25 = vmax.f32 %v1327_v19, 0.0  ;;  %v2808_v26 = vpack.c.bf16 %v1721_v21, %v1721_v21  ;;  %v1722_v27 = vmax.f32 %v1583_v22, 0.0 }
 0x200   : > { %2284 = vst.msk [vmem:[%s3311_s4 + $0xe0] sm:$0xf] %vm2227_vm0, %v2744_v24  ;;  %v2745_v28 = vpack.c.bf16 %v1658_v25, %v1658_v25  ;;  %2348 = vst.msk [vmem:[%s3311_s4 + $0x1e0] sm:$0xf] %vm2227_vm0, %v2808_v26  ;;  %v2809_v29 = vpack.c.bf16 %v1722_v27, %v1722_v27 }
 0x201   : > { %v1331_v30 = vpop.f32.mrb[116].mxu0  ;;  %v1587_v31 = vpop.f32.mrb[116].mxu1 }
 0x202   : > { %2285 = vst.msk [vmem:[%s3311_s4 + $0xe4] sm:$0xf] %vm2227_vm0, %v2745_v28  ;;  %v1332_v32 = vadd.f32 %v3561_v63, %v1331_v30  ;;  %v1333_v33 = vpop.f32.mrb[117].mxu0  ;;  %2349 = vst.msk [vmem:[%s3311_s4 + $0x1e4] sm:$0xf] %vm2227_vm0, %v2809_v29  ;;  %v1588_v34 = vadd.f32 %v3561_v63, %v1587_v31  ;;  %v1589_v35 = vpop.f32.mrb[117].mxu1 }
 0x203   : > { %v1334_v36 = vpop.f32.mrb[118].mxu0  ;;  %v1590_v37 = vpop.f32.mrb[118].mxu1 }
 0x204   : > { %v1659_v38 = vmax.f32 %v1332_v32, 0.0  ;;  %v1335_v39 = vadd.f32 %v3561_v63, %v1334_v36  ;;  %v1336_v40 = vpop.f32.mrb[119].mxu0  ;;  %v1723_v41 = vmax.f32 %v1588_v34, 0.0  ;;  %v1591_v42 = vadd.f32 %v3561_v63, %v1590_v37  ;;  %v1592_v43 = vpop.f32.mrb[119].mxu1 }
 0x206   : > { %v2746_v44 = vpack.c.bf16 %v1659_v38, %v1659_v38  ;;  %v1660_v45 = vmax.f32 %v1335_v39, 0.0  ;;  %v2810_v46 = vpack.c.bf16 %v1723_v41, %v1723_v41  ;;  %v1724_v47 = vmax.f32 %v1591_v42, 0.0 }
 0x208   : > { %2286 = vst.msk [vmem:[%s3311_s4 + $0xe8] sm:$0xf] %vm2227_vm0, %v2746_v44  ;;  %v2747_v48 = vpack.c.bf16 %v1660_v45, %v1660_v45  ;;  %2350 = vst.msk [vmem:[%s3311_s4 + $0x1e8] sm:$0xf] %vm2227_vm0, %v2810_v46  ;;  %v2811_v49 = vpack.c.bf16 %v1724_v47, %v1724_v47 }
 0x209   : > { %v1339_v50 = vpop.f32.mrb[120].mxu0  ;;  %v1595_v51 = vpop.f32.mrb[120].mxu1 }
 0x20a   : > { %2287 = vst.msk [vmem:[%s3311_s4 + $0xec] sm:$0xf] %vm2227_vm0, %v2747_v48  ;;  %v1340_v52 = vadd.f32 %v3561_v63, %v1339_v50  ;;  %v1341_v53 = vpop.f32.mrb[121].mxu0  ;;  %2351 = vst.msk [vmem:[%s3311_s4 + $0x1ec] sm:$0xf] %vm2227_vm0, %v2811_v49  ;;  %v1596_v54 = vadd.f32 %v3561_v63, %v1595_v51  ;;  %v1597_v55 = vpop.f32.mrb[121].mxu1 }
 0x20b   : > { %v1342_v56 = vpop.f32.mrb[122].mxu0  ;;  %v1598_v57 = vpop.f32.mrb[122].mxu1 }
 0x20c   : > { %v1661_v58 = vmax.f32 %v1340_v52, 0.0  ;;  %v1343_v59 = vadd.f32 %v3561_v63, %v1342_v56  ;;  %v1344_v60 = vpop.f32.mrb[123].mxu0  ;;  %v1725_v61 = vmax.f32 %v1596_v54, 0.0  ;;  %v1599_v62 = vpop.f32.mrb[123].mxu1 }
 0x20e   : > { %v2748_v0 = vpack.c.bf16 %v1661_v58, %v1661_v58  ;;  %v1662_v1 = vmax.f32 %v1343_v59, 0.0  ;;  %v2812_v2 = vpack.c.bf16 %v1725_v61, %v1725_v61 }
 0x210   : > { %2288 = vst.msk [vmem:[%s3311_s4 + $0xf0] sm:$0xf] %vm2227_vm0, %v2748_v0  ;;  %v2749_v3 = vpack.c.bf16 %v1662_v1, %v1662_v1  ;;  %2352 = vst.msk [vmem:[%s3311_s4 + $0x1f0] sm:$0xf] %vm2227_vm0, %v2812_v2 }
 0x211   : > { %v1347_v4 = vpop.f32.mrb[124].mxu0 }
 0x212   : > { %2289 = vst.msk [vmem:[%s3311_s4 + $0xf4] sm:$0xf] %vm2227_vm0, %v2749_v3  ;;  %v1348_v5 = vadd.f32 %v3561_v63, %v1347_v4  ;;  %v1349_v6 = vpop.f32.mrb[125].mxu0 }
 0x213   : > { %v1350_v7 = vpop.f32.mrb[126].mxu0 }
 0x214   : > { %v1663_v8 = vmax.f32 %v1348_v5, 0.0  ;;  %v1351_v9 = vadd.f32 %v3561_v63, %v1350_v7  ;;  %v1352_v10 = vpop.f32.mrb[127].mxu0 }
 0x216   : > { %v2750_v11 = vpack.c.bf16 %v1663_v8, %v1663_v8  ;;  %v1664_v12 = vmax.f32 %v1351_v9, 0.0 }
 0x218   : > { %2290 = vst.msk [vmem:[%s3311_s4 + $0xf8] sm:$0xf] %vm2227_vm0, %v2750_v11  ;;  %v2751_v13 = vpack.c.bf16 %v1664_v12, %v1664_v12 }
 0x21a   : > { %2291 = vst.msk [vmem:[%s3311_s4 + $0xfc] sm:$0xf] %vm2227_vm0, %v2751_v13 }
 0x21b PF: > { %s13_s12 = sadd.s32 1, %s3065_s12  }
 0x21c   : > { %p10_p4 = scmp.ge.s32.totalorder %s13_s12, 4  }
 0x21e   :  { %12 = sbr.rel (!%p10_p4) target bundleno = 1 (0x1), region = 62 }

// kernel: prediction_model_forward.6
= control target key start
LH: loop header
LB: loop body
LE: loop exit
PB: predicated region body
PF: predicated region fallthrough
CT: control target
= control target key end

     0   :  { %s1722_s12 = smov 0   ;;  %s1980_s0 = inlined_call_operand.vmem [shape: bf16[416,512], index: 0, kind: input, shape index: {}]   ;;  %s1981_s1 = inlined_call_operand.vmem [shape: bf16[512,64], index: 1, kind: input, shape index: {}]   ;;  %s1982_s2 = inlined_call_operand.vmem [shape: f32[1,64], index: 2, kind: input, shape index: {}]   ;;  %s1983_s3 = inlined_call_operand.vmem [shape: bf16[416,64], index: 3, kind: output, shape index: {}]  }
   0x1 LB: > { %s1240_s13 = sadd.s32 4294967295, %s1700_s12   ;;  %p1244_p0 = scmp.ge.s32.totalorder %s1700_s12, 1  ;;  %s1700_s12 = sphi %s1722_s12, %s13_s12  }
   0x2   : > { %p139_p1 = scmp.lt.s32.totalorder %s1700_s12, 3 }
   0x4   : > { %p140_p2 = pnand %p1244_p0, %p139_p1 }
   0x5   : > { %v1584_v0 = vld [vmem:[%s1981_s1 + $0x40] sm:$0xff] (!%p140_p2)   ;;  %v1588_v4 = vld [vmem:[%s1981_s1 + $0x48] sm:$0xff] (!%p140_p2)   ;;  %v1592_v8 = vld [vmem:[%s1981_s1 + $0x50] sm:$0xff] (!%p140_p2)   ;;  %s164_s19 = smul.u32 (!%p140_p2), 26, %s1240_s13  ;;  %vm1157_vm0 = vcmask (!%p140_p2), 519168  }
   0x6   : > { %143 = sbr.rel (%p140_p2) target bundleno = 361 (0x169), region = 32  ;;  %v1585_v1 = vld [vmem:[%s1981_s1 + $0xc0] sm:$0xff] (!%p140_p2)   ;;  %1388 = vmatprep.subr.bf16.mxu0 (!%p140_p2), %v1584_v0  ;;  %v1589_v5 = vld [vmem:[%s1981_s1 + $0xc8] sm:$0xff] (!%p140_p2)   ;;  %v1593_v9 = vld [vmem:[%s1981_s1 + $0xd0] sm:$0xff] (!%p140_p2)  }
   0x7   : > { %v1586_v2 = vld [vmem:[%s1981_s1] sm:$0xff] (!%p140_p2)   ;;  %1482 = vmatprep.subr.bf16.mxu1 (!%p140_p2), %v1585_v1  ;;  %v1590_v6 = vld [vmem:[%s1981_s1 + $0x8] sm:$0xff] (!%p140_p2)   ;;  %v1594_v10 = vld [vmem:[%s1981_s1 + $0x10] sm:$0xff] (!%p140_p2)   ;;  %p165_p3 = scmp.lt.s32.totalorder (!%p140_p2), %s164_s19, 51 }
   0x8   : > { %v1587_v3 = vld [vmem:[%s1981_s1 + $0x80] sm:$0xff] (!%p140_p2)   ;;  %1389 = vmatpush3.bf16.msra.mxu0 (!%p140_p2), %v1586_v2  ;;  %v1591_v7 = vld [vmem:[%s1981_s1 + $0x88] sm:$0xff] (!%p140_p2)   ;;  %v1595_v11 = vld [vmem:[%s1981_s1 + $0x90] sm:$0xff] (!%p140_p2)  }
   0x9   : > { %1483 = vmatpush3.bf16.msra.mxu1 (!%p140_p2), %v1587_v3  ;;  %1390 = vmatprep.subr.bf16.mxu0 (!%p140_p2), %v1588_v4  ;;  %v1596_v12 = vld [vmem:[%s1981_s1 + $0x58] sm:$0xff] (!%p140_p2)   ;;  %v1600_v16 = vld [vmem:[%s1981_s1 + $0x60] sm:$0xff] (!%p140_p2)   ;;  %v1604_v20 = vld [vmem:[%s1981_s1 + $0x68] sm:$0xff] (!%p140_p2)  }
   0xa   : > { %1484 = vmatprep.subr.bf16.mxu1 (!%p140_p2), %v1589_v5  ;;  %v1597_v13 = vld [vmem:[%s1981_s1 + $0xd8] sm:$0xff] (!%p140_p2)   ;;  %v1601_v17 = vld [vmem:[%s1981_s1 + $0xe0] sm:$0xff] (!%p140_p2)   ;;  %v1605_v21 = vld [vmem:[%s1981_s1 + $0xe8] sm:$0xff] (!%p140_p2)  }
   0xb   : > { %v1598_v14 = vld [vmem:[%s1981_s1 + $0x18] sm:$0xff] (!%p140_p2)   ;;  %v1602_v18 = vld [vmem:[%s1981_s1 + $0x20] sm:$0xff] (!%p140_p2)   ;;  %v1606_v22 = vld [vmem:[%s1981_s1 + $0x28] sm:$0xff] (!%p140_p2)  }
   0xc   : > { %1391 = vmatpush3.bf16.msra.mxu0 (!%p140_p2), %v1590_v6  ;;  %v1599_v15 = vld [vmem:[%s1981_s1 + $0x98] sm:$0xff] (!%p140_p2)   ;;  %v1603_v19 = vld [vmem:[%s1981_s1 + $0xa0] sm:$0xff] (!%p140_p2)   ;;  %v1607_v23 = vld [vmem:[%s1981_s1 + $0xa8] sm:$0xff] (!%p140_p2)  }
   0xd   : > { %1485 = vmatpush3.bf16.msra.mxu1 %v1591_v7  ;;  %1392 = vmatprep.subr.bf16.mxu0 %v1592_v8  ;;  %s1985_s19 = smov (!%p165_p3, %s164_s19), 51  ;;  %v1608_v24 = vld [vmem:[%s1981_s1 + $0x70] sm:$0xff]   ;;  %v1612_v28 = vld [vmem:[%s1981_s1 + $0x78] sm:$0xff]  }
   0xe   : > { %1486 = vmatprep.subr.bf16.mxu1 %v1593_v9  ;;  %v1609_v25 = vld [vmem:[%s1981_s1 + $0xf0] sm:$0xff]   ;;  %s1361_s18 = sshll.u32 %s1985_s19, 4  ;;  %v1613_v29 = vld [vmem:[%s1981_s1 + $0xf8] sm:$0xff]   ;;  %s1247_s7 = sshll.u32 %s1985_s19, 2 }
   0xf   : > { %v1610_v26 = vld [vmem:[%s1981_s1 + $0x30] sm:$0xff]   ;;  %s1828_s13 = scalar_lea.vmem %s1980_s0, %s1361_s18  ;;  %v1614_v30 = vld [vmem:[%s1981_s1 + $0x38] sm:$0xff]   ;;  %s1899_s10 = scalar_lea.vmem %s1983_s3, %s1247_s7 }
  0x10   : > { %1393 = vmatpush3.bf16.msra.mxu0 %v1594_v10  ;;  %v1611_v27 = vld [vmem:[%s1981_s1 + $0xb0] sm:$0xff]   ;;  %v1615_v31 = vld [vmem:[%s1981_s1 + $0xb8] sm:$0xff]  }
  0x11   : > { %1487 = vmatpush3.bf16.msra.mxu1 %v1595_v11  ;;  %1394 = vmatprep.subr.bf16.mxu0 %v1596_v12  ;;  %v1616_v32 = vld [vmem:[%s1828_s13] ss:$16 sps:$4 sm:$0xff]   ;;  %v1618_v33 = vld [vmem:[%s1828_s13 + $0x4] ss:$16 sps:$4 sm:$0xff]   ;;  %v1619_v34 = vld [vmem:[%s1828_s13 + $0x8] ss:$16 sps:$4 sm:$0xff]  }
  0x12   : > { %1488 = vmatprep.subr.bf16.mxu1 %v1597_v13  ;;  %v1621_v35 = vld [vmem:[%s1828_s13 + $0xc] ss:$16 sps:$4 sm:$0xff]   ;;  %785 = vmatprep.mubr.bf16.mxu0 %v1618_v33  ;;  %v1622_v36 = vld [vmem:[%s1828_s13 + $0x24] ss:$16 sps:$4 sm:$0xff]   ;;  %v1626_v38 = vld [vmem:[%s1828_s13 + $0x20] ss:$16 sps:$4 sm:$0xff]  }
  0x13   : > { %922 = vmatprep.mubr.bf16.mxu1 %v1621_v35  ;;  %v1624_v37 = vld [vmem:[%s1828_s13 + $0x2c] ss:$16 sps:$4 sm:$0xff]   ;;  %v1627_v39 = vld [vmem:[%s1828_s13 + $0x28] ss:$16 sps:$4 sm:$0xff]   ;;  %v1628_v40 = vld [vmem:[%s1828_s13 + $0x44] ss:$16 sps:$4 sm:$0xff]  }
  0x14   : > { %1395 = vmatpush3.bf16.msra.mxu0 %v1598_v14  ;;  %v1630_v41 = vld [vmem:[%s1828_s13 + $0x4c] ss:$16 sps:$4 sm:$0xff]   ;;  %v1632_v42 = vld [vmem:[%s1828_s13 + $0x40] ss:$16 sps:$4 sm:$0xff]   ;;  %v1633_v43 = vld [vmem:[%s1828_s13 + $0x48] ss:$16 sps:$4 sm:$0xff]  }
  0x15   : > { %1489 = vmatpush3.bf16.msra.mxu1 %v1599_v15  ;;  %1396 = vmatprep.subr.bf16.mxu0 %v1600_v16  ;;  %v1634_v44 = vld [vmem:[%s1828_s13 + $0x64] ss:$16 sps:$4 sm:$0xff]   ;;  %v1636_v45 = vld [vmem:[%s1828_s13 + $0x6c] ss:$16 sps:$4 sm:$0xff]   ;;  %v1638_v46 = vld [vmem:[%s1828_s13 + $0x60] ss:$16 sps:$4 sm:$0xff]  }
  0x16   : > { %1490 = vmatprep.subr.bf16.mxu1 %v1601_v17  ;;  %v1639_v47 = vld [vmem:[%s1828_s13 + $0x68] ss:$16 sps:$4 sm:$0xff]   ;;  %v1640_v48 = vld [vmem:[%s1828_s13 + $0x84] ss:$16 sps:$4 sm:$0xff]   ;;  %v1642_v49 = vld [vmem:[%s1828_s13 + $0x8c] ss:$16 sps:$4 sm:$0xff]  }
  0x17   : > { %v1644_v50 = vld [vmem:[%s1828_s13 + $0x80] ss:$16 sps:$4 sm:$0xff]   ;;  %v1645_v51 = vld [vmem:[%s1828_s13 + $0x88] ss:$16 sps:$4 sm:$0xff]   ;;  %v1646_v52 = vld [vmem:[%s1828_s13 + $0xa4] ss:$16 sps:$4 sm:$0xff]  }
  0x18   : > { %1397 = vmatpush3.bf16.msra.mxu0 %v1602_v18  ;;  %v1648_v53 = vld [vmem:[%s1828_s13 + $0xac] ss:$16 sps:$4 sm:$0xff]   ;;  %v1650_v54 = vld [vmem:[%s1828_s13 + $0xa0] ss:$16 sps:$4 sm:$0xff]   ;;  %v1651_v55 = vld [vmem:[%s1828_s13 + $0xa8] ss:$16 sps:$4 sm:$0xff]  }
  0x19   : > { %1491 = vmatpush3.bf16.msra.mxu1 %v1603_v19  ;;  %1398 = vmatprep.subr.bf16.mxu0 %v1604_v20  ;;  %v1652_v56 = vld [vmem:[%s1828_s13 + $0xc4] ss:$16 sps:$4 sm:$0xff]   ;;  %v1654_v57 = vld [vmem:[%s1828_s13 + $0xcc] ss:$16 sps:$4 sm:$0xff]   ;;  %v1656_v58 = vld [vmem:[%s1828_s13 + $0xc0] ss:$16 sps:$4 sm:$0xff]  }
  0x1a   : > { %1492 = vmatprep.subr.bf16.mxu1 %v1605_v21  ;;  %v1657_v59 = vld [vmem:[%s1828_s13 + $0xc8] ss:$16 sps:$4 sm:$0xff]   ;;  %v1658_v60 = vld [vmem:[%s1828_s13 + $0xe4] ss:$16 sps:$4 sm:$0xff]   ;;  %v1660_v61 = vld [vmem:[%s1828_s13 + $0xec] ss:$16 sps:$4 sm:$0xff]  }
  0x1b   : > { %v1662_v62 = vld [vmem:[%s1828_s13 + $0xe0] ss:$16 sps:$4 sm:$0xff]   ;;  %v1663_v63 = vld [vmem:[%s1828_s13 + $0xe8] ss:$16 sps:$4 sm:$0xff]   ;;  %v1664_v0 = vld [vmem:[%s1828_s13 + $0x104] ss:$16 sps:$4 sm:$0xff]  }
  0x1c   : > { %1399 = vmatpush3.bf16.msra.mxu0 %v1606_v22  ;;  %v1666_v1 = vld [vmem:[%s1828_s13 + $0x10c] ss:$16 sps:$4 sm:$0xff]   ;;  %v1668_v2 = vld [vmem:[%s1828_s13 + $0x100] ss:$16 sps:$4 sm:$0xff]   ;;  %v1669_v3 = vld [vmem:[%s1828_s13 + $0x108] ss:$16 sps:$4 sm:$0xff]  }
  0x1d   : > { %1493 = vmatpush3.bf16.msra.mxu1 %v1607_v23  ;;  %1400 = vmatprep.subr.bf16.mxu0 %v1608_v24  ;;  %v1670_v4 = vld [vmem:[%s1828_s13 + $0x124] ss:$16 sps:$4 sm:$0xff]   ;;  %v1672_v5 = vld [vmem:[%s1828_s13 + $0x12c] ss:$16 sps:$4 sm:$0xff]   ;;  %v1674_v6 = vld [vmem:[%s1828_s13 + $0x120] ss:$16 sps:$4 sm:$0xff]  }
  0x1e   : > { %1494 = vmatprep.subr.bf16.mxu1 %v1609_v25  ;;  %v1675_v7 = vld [vmem:[%s1828_s13 + $0x128] ss:$16 sps:$4 sm:$0xff]   ;;  %v1676_v8 = vld [vmem:[%s1828_s13 + $0x144] ss:$16 sps:$4 sm:$0xff]   ;;  %v1678_v9 = vld [vmem:[%s1828_s13 + $0x14c] ss:$16 sps:$4 sm:$0xff]  }
  0x1f   : > { %v1680_v10 = vld [vmem:[%s1828_s13 + $0x140] ss:$16 sps:$4 sm:$0xff]   ;;  %v1681_v11 = vld [vmem:[%s1828_s13 + $0x148] ss:$16 sps:$4 sm:$0xff]   ;;  %v1682_v12 = vld [vmem:[%s1828_s13 + $0x164] ss:$16 sps:$4 sm:$0xff]  }
  0x20   : > { %1401 = vmatpush3.bf16.msra.mxu0 %v1610_v26  ;;  %v1684_v13 = vld [vmem:[%s1828_s13 + $0x16c] ss:$16 sps:$4 sm:$0xff]   ;;  %v1686_v14 = vld [vmem:[%s1828_s13 + $0x160] ss:$16 sps:$4 sm:$0xff]   ;;  %v1687_v15 = vld [vmem:[%s1828_s13 + $0x168] ss:$16 sps:$4 sm:$0xff]  }
  0x21   : > { %1495 = vmatpush3.bf16.msra.mxu1 %v1611_v27  ;;  %1402 = vmatprep.subr.bf16.mxu0 %v1612_v28  ;;  %v1688_v16 = vld [vmem:[%s1828_s13 + $0x184] ss:$16 sps:$4 sm:$0xff]   ;;  %v1690_v17 = vld [vmem:[%s1828_s13 + $0x18c] ss:$16 sps:$4 sm:$0xff]   ;;  %v1692_v18 = vld [vmem:[%s1828_s13 + $0x180] ss:$16 sps:$4 sm:$0xff]  }
  0x22   : > { %1496 = vmatprep.subr.bf16.mxu1 %v1613_v29  ;;  %v1693_v19 = vld [vmem:[%s1828_s13 + $0x188] ss:$16 sps:$4 sm:$0xff]   ;;  %v1891_v22 = vld [vmem:[%s1982_s2] ss:$0 sm:$0xff] }
  0x24   : > { %1403 = vmatpush3.bf16.msra.mxu0 %v1614_v30 }
  0x25   : > { %1497 = vmatpush3.bf16.msra.mxu1 %v1615_v31 }
  0x27   : > { %786 = vmatmul.mubr.bf16.vlgmr.msra.gmra.mrb[0].mxu0 %v1616_v32 }
  0x28   : > { %923 = vmatmul.mubr.bf16.vlgmr.msra.gmra.mrb[0].mxu1 %v1619_v34  ;;  %793 = vmatprep.mubr.bf16.mxu0 %v1622_v36 }
  0x29   : > { %930 = vmatprep.mubr.bf16.mxu1 %v1624_v37 }
  0x2f   : > { %794 = vmatmul.mubr.bf16.gmra.mrb[4].mxu0 %v1626_v38 }
  0x30   : > { %931 = vmatmul.mubr.bf16.gmra.mrb[4].mxu1 %v1627_v39  ;;  %801 = vmatprep.mubr.bf16.mxu0 %v1628_v40 }
  0x31   : > { %938 = vmatprep.mubr.bf16.mxu1 %v1630_v41 }
  0x37   : > { %802 = vmatmul.mubr.bf16.gmra.mrb[8].mxu0 %v1632_v42 }
  0x38   : > { %939 = vmatmul.mubr.bf16.gmra.mrb[8].mxu1 %v1633_v43  ;;  %809 = vmatprep.mubr.bf16.mxu0 %v1634_v44 }
  0x39   : > { %946 = vmatprep.mubr.bf16.mxu1 %v1636_v45 }
  0x3f   : > { %810 = vmatmul.mubr.bf16.gmra.mrb[12].mxu0 %v1638_v46 }
  0x40   : > { %947 = vmatmul.mubr.bf16.gmra.mrb[12].mxu1 %v1639_v47  ;;  %817 = vmatprep.mubr.bf16.mxu0 %v1640_v48 }
  0x41   : > { %954 = vmatprep.mubr.bf16.mxu1 %v1642_v49 }
  0x47   : > { %818 = vmatmul.mubr.bf16.gmra.mrb[16].mxu0 %v1644_v50 }
  0x48   : > { %955 = vmatmul.mubr.bf16.gmra.mrb[16].mxu1 %v1645_v51  ;;  %825 = vmatprep.mubr.bf16.mxu0 %v1646_v52 }
  0x49   : > { %962 = vmatprep.mubr.bf16.mxu1 %v1648_v53 }
  0x4f   : > { %826 = vmatmul.mubr.bf16.gmra.mrb[20].mxu0 %v1650_v54 }
  0x50   : > { %963 = vmatmul.mubr.bf16.gmra.mrb[20].mxu1 %v1651_v55  ;;  %833 = vmatprep.mubr.bf16.mxu0 %v1652_v56 }
  0x51   : > { %970 = vmatprep.mubr.bf16.mxu1 %v1654_v57 }
  0x57   : > { %834 = vmatmul.mubr.bf16.gmra.mrb[24].mxu0 %v1656_v58 }
  0x58   : > { %971 = vmatmul.mubr.bf16.gmra.mrb[24].mxu1 %v1657_v59  ;;  %841 = vmatprep.mubr.bf16.mxu0 %v1658_v60 }
  0x59   : > { %978 = vmatprep.mubr.bf16.mxu1 %v1660_v61 }
  0x5f   : > { %842 = vmatmul.mubr.bf16.gmra.mrb[28].mxu0 %v1662_v62 }
  0x60   : > { %979 = vmatmul.mubr.bf16.gmra.mrb[28].mxu1 %v1663_v63  ;;  %849 = vmatprep.mubr.bf16.mxu0 %v1664_v0 }
  0x61   : > { %986 = vmatprep.mubr.bf16.mxu1 %v1666_v1 }
  0x67   : > { %850 = vmatmul.mubr.bf16.gmra.mrb[32].mxu0 %v1668_v2 }
  0x68   : > { %987 = vmatmul.mubr.bf16.gmra.mrb[32].mxu1 %v1669_v3  ;;  %857 = vmatprep.mubr.bf16.mxu0 %v1670_v4 }
  0x69   : > { %994 = vmatprep.mubr.bf16.mxu1 %v1672_v5 }
  0x6f   : > { %858 = vmatmul.mubr.bf16.gmra.mrb[36].mxu0 %v1674_v6 }
  0x70   : > { %995 = vmatmul.mubr.bf16.gmra.mrb[36].mxu1 %v1675_v7  ;;  %865 = vmatprep.mubr.bf16.mxu0 %v1676_v8 }
  0x71   : > { %1002 = vmatprep.mubr.bf16.mxu1 %v1678_v9 }
  0x77   : > { %866 = vmatmul.mubr.bf16.gmra.mrb[40].mxu0 %v1680_v10 }
  0x78   : > { %1003 = vmatmul.mubr.bf16.gmra.mrb[40].mxu1 %v1681_v11  ;;  %873 = vmatprep.mubr.bf16.mxu0 %v1682_v12 }
  0x79   : > { %1010 = vmatprep.mubr.bf16.mxu1 %v1684_v13 }
  0x7f   : > { %874 = vmatmul.mubr.bf16.gmra.mrb[44].mxu0 %v1686_v14 }
  0x80   : > { %1011 = vmatmul.mubr.bf16.gmra.mrb[44].mxu1 %v1687_v15  ;;  %881 = vmatprep.mubr.bf16.mxu0 %v1688_v16 }
  0x81   : > { %1018 = vmatprep.mubr.bf16.mxu1 %v1690_v17 }
  0x87   : > { %882 = vmatmul.mubr.bf16.gmra.mrb[48].mxu0 %v1692_v18 }
  0x88   : > { %1019 = vmatmul.mubr.bf16.gmra.mrb[48].mxu1 %v1693_v19 }
  0xfa   : > { %v1404_v20 = vpop.f32.mrb[0].mxu0 }
  0xfb   : > { %v1498_v21 = vpop.f32.mrb[0].mxu1  ;;  %v1405_v23 = vpop.f32.mrb[1].mxu0 }
  0xfc   : > { %v1406_v24 = vadd.f32 %v1405_v23, %v1404_v20  ;;  %v1499_v25 = vpop.f32.mrb[1].mxu1  ;;  %v1407_v26 = vpop.f32.mrb[2].mxu0 }
  0xfd   : > { %v1500_v27 = vadd.f32 %v1499_v25, %v1498_v21  ;;  %v1501_v28 = vpop.f32.mrb[2].mxu1  ;;  %v1408_v29 = vpop.f32.mrb[3].mxu0 }
  0xfe   : > { %v788_v30 = vadd.f32 %v1406_v24, %v1891_v22  ;;  %v1409_v31 = vadd.f32 %v1408_v29, %v1407_v26  ;;  %v1502_v32 = vpop.f32.mrb[3].mxu1 }
  0xff   : > { %v1503_v33 = vadd.f32 %v1502_v32, %v1501_v28 }
 0x100   : > { %v925_v34 = vadd.f32 %v1500_v27, %v788_v30  ;;  %v791_v35 = vadd.f32 %v1409_v31, %v1891_v22 }
 0x102   : > { %v1027_v36 = vmax.f32 %v925_v34, 0.0  ;;  %v928_v37 = vadd.f32 %v1503_v33, %v791_v35  ;;  %v1410_v38 = vpop.f32.mrb[4].mxu0 }
 0x103   : > { %v1504_v39 = vpop.f32.mrb[4].mxu1  ;;  %v1411_v40 = vpop.f32.mrb[5].mxu0 }
 0x104   : > { %v1362_v41 = vpack.c.bf16 %v1027_v36, %v1027_v36  ;;  %v1028_v42 = vmax.f32 %v928_v37, 0.0  ;;  %v1412_v43 = vadd.f32 %v1411_v40, %v1410_v38  ;;  %v1505_v44 = vpop.f32.mrb[5].mxu1  ;;  %v1413_v45 = vpop.f32.mrb[6].mxu0 }
 0x105   : > { %v1506_v46 = vadd.f32 %v1505_v44, %v1504_v39  ;;  %v1507_v47 = vpop.f32.mrb[6].mxu1  ;;  %v1414_v48 = vpop.f32.mrb[7].mxu0 }
 0x106   : > { %1158 = vst.msk [vmem:[%s1899_s10] sm:$0xf] %vm1157_vm0, %v1362_v41  ;;  %v1363_v49 = vpack.c.bf16 %v1028_v42, %v1028_v42  ;;  %v796_v50 = vadd.f32 %v1412_v43, %v1891_v22  ;;  %v1415_v51 = vadd.f32 %v1414_v48, %v1413_v45  ;;  %v1508_v52 = vpop.f32.mrb[7].mxu1 }
 0x107   : > { %v1509_v53 = vadd.f32 %v1508_v52, %v1507_v47 }
 0x108   : > { %1159 = vst.msk [vmem:[%s1899_s10 + $0x4] sm:$0xf] %vm1157_vm0, %v1363_v49  ;;  %v933_v54 = vadd.f32 %v1506_v46, %v796_v50  ;;  %v799_v55 = vadd.f32 %v1415_v51, %v1891_v22 }
 0x10a   : > { %v1029_v56 = vmax.f32 %v933_v54, 0.0  ;;  %v936_v57 = vadd.f32 %v1509_v53, %v799_v55  ;;  %v1416_v58 = vpop.f32.mrb[8].mxu0 }
 0x10b   : > { %v1510_v59 = vpop.f32.mrb[8].mxu1  ;;  %v1417_v60 = vpop.f32.mrb[9].mxu0 }
 0x10c   : > { %v1364_v61 = vpack.c.bf16 %v1029_v56, %v1029_v56  ;;  %v1030_v62 = vmax.f32 %v936_v57, 0.0  ;;  %v1418_v63 = vadd.f32 %v1417_v60, %v1416_v58  ;;  %v1511_v0 = vpop.f32.mrb[9].mxu1  ;;  %v1419_v1 = vpop.f32.mrb[10].mxu0 }
 0x10d   : > { %v1512_v2 = vadd.f32 %v1511_v0, %v1510_v59  ;;  %v1513_v3 = vpop.f32.mrb[10].mxu1  ;;  %v1420_v4 = vpop.f32.mrb[11].mxu0 }
 0x10e   : > { %1160 = vst.msk [vmem:[%s1899_s10 + $0x8] sm:$0xf] %vm1157_vm0, %v1364_v61  ;;  %v1365_v5 = vpack.c.bf16 %v1030_v62, %v1030_v62  ;;  %v804_v6 = vadd.f32 %v1418_v63, %v1891_v22  ;;  %v1421_v7 = vadd.f32 %v1420_v4, %v1419_v1  ;;  %v1514_v8 = vpop.f32.mrb[11].mxu1 }
 0x10f   : > { %v1515_v9 = vadd.f32 %v1514_v8, %v1513_v3 }
 0x110   : > { %1161 = vst.msk [vmem:[%s1899_s10 + $0xc] sm:$0xf] %vm1157_vm0, %v1365_v5  ;;  %v941_v10 = vadd.f32 %v1512_v2, %v804_v6  ;;  %v807_v11 = vadd.f32 %v1421_v7, %v1891_v22 }
 0x112   : > { %v1031_v12 = vmax.f32 %v941_v10, 0.0  ;;  %v944_v13 = vadd.f32 %v1515_v9, %v807_v11  ;;  %v1422_v14 = vpop.f32.mrb[12].mxu0 }
 0x113   : > { %v1516_v15 = vpop.f32.mrb[12].mxu1  ;;  %v1423_v16 = vpop.f32.mrb[13].mxu0 }
 0x114   : > { %v1366_v17 = vpack.c.bf16 %v1031_v12, %v1031_v12  ;;  %v1032_v18 = vmax.f32 %v944_v13, 0.0  ;;  %v1424_v19 = vadd.f32 %v1423_v16, %v1422_v14  ;;  %v1517_v20 = vpop.f32.mrb[13].mxu1  ;;  %v1425_v21 = vpop.f32.mrb[14].mxu0 }
 0x115   : > { %v1518_v23 = vadd.f32 %v1517_v20, %v1516_v15  ;;  %v1519_v24 = vpop.f32.mrb[14].mxu1  ;;  %v1426_v25 = vpop.f32.mrb[15].mxu0 }
 0x116   : > { %1162 = vst.msk [vmem:[%s1899_s10 + $0x10] sm:$0xf] %vm1157_vm0, %v1366_v17  ;;  %v1367_v26 = vpack.c.bf16 %v1032_v18, %v1032_v18  ;;  %v812_v27 = vadd.f32 %v1424_v19, %v1891_v22  ;;  %v1427_v28 = vadd.f32 %v1426_v25, %v1425_v21  ;;  %v1520_v29 = vpop.f32.mrb[15].mxu1 }
 0x117   : > { %v1521_v30 = vadd.f32 %v1520_v29, %v1519_v24 }
 0x118   : > { %1163 = vst.msk [vmem:[%s1899_s10 + $0x14] sm:$0xf] %vm1157_vm0, %v1367_v26  ;;  %v949_v31 = vadd.f32 %v1518_v23, %v812_v27  ;;  %v815_v32 = vadd.f32 %v1427_v28, %v1891_v22 }
 0x11a   : > { %v1033_v33 = vmax.f32 %v949_v31, 0.0  ;;  %v952_v34 = vadd.f32 %v1521_v30, %v815_v32  ;;  %v1428_v35 = vpop.f32.mrb[16].mxu0 }
 0x11b   : > { %v1522_v36 = vpop.f32.mrb[16].mxu1  ;;  %v1429_v37 = vpop.f32.mrb[17].mxu0 }
 0x11c   : > { %v1368_v38 = vpack.c.bf16 %v1033_v33, %v1033_v33  ;;  %v1034_v39 = vmax.f32 %v952_v34, 0.0  ;;  %v1430_v40 = vadd.f32 %v1429_v37, %v1428_v35  ;;  %v1523_v41 = vpop.f32.mrb[17].mxu1  ;;  %v1431_v42 = vpop.f32.mrb[18].mxu0 }
 0x11d   : > { %v1524_v43 = vadd.f32 %v1523_v41, %v1522_v36  ;;  %v1525_v44 = vpop.f32.mrb[18].mxu1  ;;  %v1432_v45 = vpop.f32.mrb[19].mxu0 }
 0x11e   : > { %1164 = vst.msk [vmem:[%s1899_s10 + $0x18] sm:$0xf] %vm1157_vm0, %v1368_v38  ;;  %v1369_v46 = vpack.c.bf16 %v1034_v39, %v1034_v39  ;;  %v820_v47 = vadd.f32 %v1430_v40, %v1891_v22  ;;  %v1433_v48 = vadd.f32 %v1432_v45, %v1431_v42  ;;  %v1526_v49 = vpop.f32.mrb[19].mxu1 }
 0x11f   : > { %v1527_v50 = vadd.f32 %v1526_v49, %v1525_v44 }
 0x120   : > { %1165 = vst.msk [vmem:[%s1899_s10 + $0x1c] sm:$0xf] %vm1157_vm0, %v1369_v46  ;;  %v957_v51 = vadd.f32 %v1524_v43, %v820_v47  ;;  %v823_v52 = vadd.f32 %v1433_v48, %v1891_v22 }
 0x122   : > { %v1035_v53 = vmax.f32 %v957_v51, 0.0  ;;  %v960_v54 = vadd.f32 %v1527_v50, %v823_v52  ;;  %v1434_v55 = vpop.f32.mrb[20].mxu0 }
 0x123   : > { %v1528_v56 = vpop.f32.mrb[20].mxu1  ;;  %v1435_v57 = vpop.f32.mrb[21].mxu0 }
 0x124   : > { %v1370_v58 = vpack.c.bf16 %v1035_v53, %v1035_v53  ;;  %v1036_v59 = vmax.f32 %v960_v54, 0.0  ;;  %v1436_v60 = vadd.f32 %v1435_v57, %v1434_v55  ;;  %v1529_v61 = vpop.f32.mrb[21].mxu1  ;;  %v1437_v62 = vpop.f32.mrb[22].mxu0 }
 0x125   : > { %v1530_v63 = vadd.f32 %v1529_v61, %v1528_v56  ;;  %v1531_v0 = vpop.f32.mrb[22].mxu1  ;;  %v1438_v1 = vpop.f32.mrb[23].mxu0 }
 0x126   : > { %1166 = vst.msk [vmem:[%s1899_s10 + $0x20] sm:$0xf] %vm1157_vm0, %v1370_v58  ;;  %v1371_v2 = vpack.c.bf16 %v1036_v59, %v1036_v59  ;;  %v828_v3 = vadd.f32 %v1436_v60, %v1891_v22  ;;  %v1439_v4 = vadd.f32 %v1438_v1, %v1437_v62  ;;  %v1532_v5 = vpop.f32.mrb[23].mxu1 }
 0x127   : > { %v1533_v6 = vadd.f32 %v1532_v5, %v1531_v0 }
 0x128   : > { %1167 = vst.msk [vmem:[%s1899_s10 + $0x24] sm:$0xf] %vm1157_vm0, %v1371_v2  ;;  %v965_v7 = vadd.f32 %v1530_v63, %v828_v3  ;;  %v831_v8 = vadd.f32 %v1439_v4, %v1891_v22 }
 0x12a   : > { %v1037_v9 = vmax.f32 %v965_v7, 0.0  ;;  %v968_v10 = vadd.f32 %v1533_v6, %v831_v8  ;;  %v1440_v11 = vpop.f32.mrb[24].mxu0 }
 0x12b   : > { %v1534_v12 = vpop.f32.mrb[24].mxu1  ;;  %v1441_v13 = vpop.f32.mrb[25].mxu0 }
 0x12c   : > { %v1372_v14 = vpack.c.bf16 %v1037_v9, %v1037_v9  ;;  %v1038_v15 = vmax.f32 %v968_v10, 0.0  ;;  %v1442_v16 = vadd.f32 %v1441_v13, %v1440_v11  ;;  %v1535_v17 = vpop.f32.mrb[25].mxu1  ;;  %v1443_v18 = vpop.f32.mrb[26].mxu0 }
 0x12d   : > { %v1536_v19 = vadd.f32 %v1535_v17, %v1534_v12  ;;  %v1537_v20 = vpop.f32.mrb[26].mxu1  ;;  %v1444_v21 = vpop.f32.mrb[27].mxu0 }
 0x12e   : > { %1168 = vst.msk [vmem:[%s1899_s10 + $0x28] sm:$0xf] %vm1157_vm0, %v1372_v14  ;;  %v1373_v23 = vpack.c.bf16 %v1038_v15, %v1038_v15  ;;  %v836_v24 = vadd.f32 %v1442_v16, %v1891_v22  ;;  %v1445_v25 = vadd.f32 %v1444_v21, %v1443_v18  ;;  %v1538_v26 = vpop.f32.mrb[27].mxu1 }
 0x12f   : > { %v1539_v27 = vadd.f32 %v1538_v26, %v1537_v20 }
 0x130   : > { %1169 = vst.msk [vmem:[%s1899_s10 + $0x2c] sm:$0xf] %vm1157_vm0, %v1373_v23  ;;  %v973_v28 = vadd.f32 %v1536_v19, %v836_v24  ;;  %v839_v29 = vadd.f32 %v1445_v25, %v1891_v22 }
 0x132   : > { %v1039_v30 = vmax.f32 %v973_v28, 0.0  ;;  %v976_v31 = vadd.f32 %v1539_v27, %v839_v29  ;;  %v1446_v32 = vpop.f32.mrb[28].mxu0 }
 0x133   : > { %v1540_v33 = vpop.f32.mrb[28].mxu1  ;;  %v1447_v34 = vpop.f32.mrb[29].mxu0 }
 0x134   : > { %v1374_v35 = vpack.c.bf16 %v1039_v30, %v1039_v30  ;;  %v1040_v36 = vmax.f32 %v976_v31, 0.0  ;;  %v1448_v37 = vadd.f32 %v1447_v34, %v1446_v32  ;;  %v1541_v38 = vpop.f32.mrb[29].mxu1  ;;  %v1449_v39 = vpop.f32.mrb[30].mxu0 }
 0x135   : > { %v1542_v40 = vadd.f32 %v1541_v38, %v1540_v33  ;;  %v1543_v41 = vpop.f32.mrb[30].mxu1  ;;  %v1450_v42 = vpop.f32.mrb[31].mxu0 }
 0x136   : > { %1170 = vst.msk [vmem:[%s1899_s10 + $0x30] sm:$0xf] %vm1157_vm0, %v1374_v35  ;;  %v1375_v43 = vpack.c.bf16 %v1040_v36, %v1040_v36  ;;  %v844_v44 = vadd.f32 %v1448_v37, %v1891_v22  ;;  %v1451_v45 = vadd.f32 %v1450_v42, %v1449_v39  ;;  %v1544_v46 = vpop.f32.mrb[31].mxu1 }
 0x137   : > { %v1545_v47 = vadd.f32 %v1544_v46, %v1543_v41 }
 0x138   : > { %1171 = vst.msk [vmem:[%s1899_s10 + $0x34] sm:$0xf] %vm1157_vm0, %v1375_v43  ;;  %v981_v48 = vadd.f32 %v1542_v40, %v844_v44  ;;  %v847_v49 = vadd.f32 %v1451_v45, %v1891_v22 }
 0x13a   : > { %v1041_v50 = vmax.f32 %v981_v48, 0.0  ;;  %v984_v51 = vadd.f32 %v1545_v47, %v847_v49  ;;  %v1452_v52 = vpop.f32.mrb[32].mxu0 }
 0x13b   : > { %v1546_v53 = vpop.f32.mrb[32].mxu1  ;;  %v1453_v54 = vpop.f32.mrb[33].mxu0 }
 0x13c   : > { %v1376_v55 = vpack.c.bf16 %v1041_v50, %v1041_v50  ;;  %v1042_v56 = vmax.f32 %v984_v51, 0.0  ;;  %v1454_v57 = vadd.f32 %v1453_v54, %v1452_v52  ;;  %v1547_v58 = vpop.f32.mrb[33].mxu1  ;;  %v1455_v59 = vpop.f32.mrb[34].mxu0 }
 0x13d   : > { %v1548_v60 = vadd.f32 %v1547_v58, %v1546_v53  ;;  %v1549_v61 = vpop.f32.mrb[34].mxu1  ;;  %v1456_v62 = vpop.f32.mrb[35].mxu0 }
 0x13e   : > { %1172 = vst.msk [vmem:[%s1899_s10 + $0x38] sm:$0xf] %vm1157_vm0, %v1376_v55  ;;  %v1377_v63 = vpack.c.bf16 %v1042_v56, %v1042_v56  ;;  %v852_v0 = vadd.f32 %v1454_v57, %v1891_v22  ;;  %v1457_v1 = vadd.f32 %v1456_v62, %v1455_v59  ;;  %v1550_v2 = vpop.f32.mrb[35].mxu1 }
 0x13f   : > { %v1551_v3 = vadd.f32 %v1550_v2, %v1549_v61 }
 0x140   : > { %1173 = vst.msk [vmem:[%s1899_s10 + $0x3c] sm:$0xf] %vm1157_vm0, %v1377_v63  ;;  %v989_v4 = vadd.f32 %v1548_v60, %v852_v0  ;;  %v855_v5 = vadd.f32 %v1457_v1, %v1891_v22 }
 0x142   : > { %v1043_v6 = vmax.f32 %v989_v4, 0.0  ;;  %v992_v7 = vadd.f32 %v1551_v3, %v855_v5  ;;  %v1458_v8 = vpop.f32.mrb[36].mxu0 }
 0x143   : > { %v1552_v9 = vpop.f32.mrb[36].mxu1  ;;  %v1459_v10 = vpop.f32.mrb[37].mxu0 }
 0x144   : > { %v1378_v11 = vpack.c.bf16 %v1043_v6, %v1043_v6  ;;  %v1044_v12 = vmax.f32 %v992_v7, 0.0  ;;  %v1460_v13 = vadd.f32 %v1459_v10, %v1458_v8  ;;  %v1553_v14 = vpop.f32.mrb[37].mxu1  ;;  %v1461_v15 = vpop.f32.mrb[38].mxu0 }
 0x145   : > { %v1554_v16 = vadd.f32 %v1553_v14, %v1552_v9  ;;  %v1555_v17 = vpop.f32.mrb[38].mxu1  ;;  %v1462_v18 = vpop.f32.mrb[39].mxu0 }
 0x146   : > { %1174 = vst.msk [vmem:[%s1899_s10 + $0x40] sm:$0xf] %vm1157_vm0, %v1378_v11  ;;  %v1379_v19 = vpack.c.bf16 %v1044_v12, %v1044_v12  ;;  %v860_v20 = vadd.f32 %v1460_v13, %v1891_v22  ;;  %v1463_v21 = vadd.f32 %v1462_v18, %v1461_v15  ;;  %v1556_v23 = vpop.f32.mrb[39].mxu1 }
 0x147   : > { %v1557_v24 = vadd.f32 %v1556_v23, %v1555_v17 }
 0x148   : > { %1175 = vst.msk [vmem:[%s1899_s10 + $0x44] sm:$0xf] %vm1157_vm0, %v1379_v19  ;;  %v997_v25 = vadd.f32 %v1554_v16, %v860_v20  ;;  %v863_v26 = vadd.f32 %v1463_v21, %v1891_v22 }
 0x14a   : > { %v1045_v27 = vmax.f32 %v997_v25, 0.0  ;;  %v1000_v28 = vadd.f32 %v1557_v24, %v863_v26  ;;  %v1464_v29 = vpop.f32.mrb[40].mxu0 }
 0x14b   : > { %v1558_v30 = vpop.f32.mrb[40].mxu1  ;;  %v1465_v31 = vpop.f32.mrb[41].mxu0 }
 0x14c   : > { %v1380_v32 = vpack.c.bf16 %v1045_v27, %v1045_v27  ;;  %v1046_v33 = vmax.f32 %v1000_v28, 0.0  ;;  %v1466_v34 = vadd.f32 %v1465_v31, %v1464_v29  ;;  %v1559_v35 = vpop.f32.mrb[41].mxu1  ;;  %v1467_v36 = vpop.f32.mrb[42].mxu0 }
 0x14d   : > { %v1560_v37 = vadd.f32 %v1559_v35, %v1558_v30  ;;  %v1561_v38 = vpop.f32.mrb[42].mxu1  ;;  %v1468_v39 = vpop.f32.mrb[43].mxu0 }
 0x14e   : > { %1176 = vst.msk [vmem:[%s1899_s10 + $0x48] sm:$0xf] %vm1157_vm0, %v1380_v32  ;;  %v1381_v40 = vpack.c.bf16 %v1046_v33, %v1046_v33  ;;  %v868_v41 = vadd.f32 %v1466_v34, %v1891_v22  ;;  %v1469_v42 = vadd.f32 %v1468_v39, %v1467_v36  ;;  %v1562_v43 = vpop.f32.mrb[43].mxu1 }
 0x14f   : > { %v1563_v44 = vadd.f32 %v1562_v43, %v1561_v38 }
 0x150   : > { %1177 = vst.msk [vmem:[%s1899_s10 + $0x4c] sm:$0xf] %vm1157_vm0, %v1381_v40  ;;  %v1005_v45 = vadd.f32 %v1560_v37, %v868_v41  ;;  %v871_v46 = vadd.f32 %v1469_v42, %v1891_v22 }
 0x152   : > { %v1047_v47 = vmax.f32 %v1005_v45, 0.0  ;;  %v1008_v48 = vadd.f32 %v1563_v44, %v871_v46  ;;  %v1470_v49 = vpop.f32.mrb[44].mxu0 }
 0x153   : > { %v1564_v50 = vpop.f32.mrb[44].mxu1  ;;  %v1471_v51 = vpop.f32.mrb[45].mxu0 }
 0x154   : > { %v1382_v52 = vpack.c.bf16 %v1047_v47, %v1047_v47  ;;  %v1048_v53 = vmax.f32 %v1008_v48, 0.0  ;;  %v1472_v54 = vadd.f32 %v1471_v51, %v1470_v49  ;;  %v1565_v55 = vpop.f32.mrb[45].mxu1  ;;  %v1473_v56 = vpop.f32.mrb[46].mxu0 }
 0x155   : > { %v1566_v57 = vadd.f32 %v1565_v55, %v1564_v50  ;;  %v1567_v58 = vpop.f32.mrb[46].mxu1  ;;  %v1474_v59 = vpop.f32.mrb[47].mxu0 }
 0x156   : > { %1178 = vst.msk [vmem:[%s1899_s10 + $0x50] sm:$0xf] %vm1157_vm0, %v1382_v52  ;;  %v1383_v60 = vpack.c.bf16 %v1048_v53, %v1048_v53  ;;  %v876_v61 = vadd.f32 %v1472_v54, %v1891_v22  ;;  %v1475_v62 = vadd.f32 %v1474_v59, %v1473_v56  ;;  %v1568_v63 = vpop.f32.mrb[47].mxu1 }
 0x157   : > { %v1569_v0 = vadd.f32 %v1568_v63, %v1567_v58 }
 0x158   : > { %1179 = vst.msk [vmem:[%s1899_s10 + $0x54] sm:$0xf] %vm1157_vm0, %v1383_v60  ;;  %v1013_v1 = vadd.f32 %v1566_v57, %v876_v61  ;;  %v879_v2 = vadd.f32 %v1475_v62, %v1891_v22 }
 0x15a   : > { %v1049_v3 = vmax.f32 %v1013_v1, 0.0  ;;  %v1016_v4 = vadd.f32 %v1569_v0, %v879_v2  ;;  %v1476_v5 = vpop.f32.mrb[48].mxu0 }
 0x15b   : > { %v1570_v6 = vpop.f32.mrb[48].mxu1  ;;  %v1477_v7 = vpop.f32.mrb[49].mxu0 }
 0x15c   : > { %v1384_v8 = vpack.c.bf16 %v1049_v3, %v1049_v3  ;;  %v1050_v9 = vmax.f32 %v1016_v4, 0.0  ;;  %v1478_v10 = vadd.f32 %v1477_v7, %v1476_v5  ;;  %v1571_v11 = vpop.f32.mrb[49].mxu1  ;;  %v1479_v12 = vpop.f32.mrb[50].mxu0 }
 0x15d   : > { %v1572_v13 = vadd.f32 %v1571_v11, %v1570_v6  ;;  %v1573_v14 = vpop.f32.mrb[50].mxu1  ;;  %v1480_v15 = vpop.f32.mrb[51].mxu0 }
 0x15e   : > { %1180 = vst.msk [vmem:[%s1899_s10 + $0x58] sm:$0xf] %vm1157_vm0, %v1384_v8  ;;  %v1385_v16 = vpack.c.bf16 %v1050_v9, %v1050_v9  ;;  %v884_v17 = vadd.f32 %v1478_v10, %v1891_v22  ;;  %v1481_v18 = vadd.f32 %v1480_v15, %v1479_v12  ;;  %v1574_v19 = vpop.f32.mrb[51].mxu1 }
 0x15f   : > { %v1575_v20 = vadd.f32 %v1574_v19, %v1573_v14 }
 0x160   : > { %1181 = vst.msk [vmem:[%s1899_s10 + $0x5c] sm:$0xf] %vm1157_vm0, %v1385_v16  ;;  %v1021_v21 = vadd.f32 %v1572_v13, %v884_v17  ;;  %v887_v23 = vadd.f32 %v1481_v18, %v1891_v22 }
 0x162   : > { %v1051_v24 = vmax.f32 %v1021_v21, 0.0  ;;  %v1024_v25 = vadd.f32 %v1575_v20, %v887_v23 }
 0x164   : > { %v1386_v26 = vpack.c.bf16 %v1051_v24, %v1051_v24  ;;  %v1052_v27 = vmax.f32 %v1024_v25, 0.0 }
 0x166   : > { %1182 = vst.msk [vmem:[%s1899_s10 + $0x60] sm:$0xf] %vm1157_vm0, %v1386_v26  ;;  %v1387_v28 = vpack.c.bf16 %v1052_v27, %v1052_v27 }
 0x168   : > { %1183 = vst.msk [vmem:[%s1899_s10 + $0x64] sm:$0xf] %vm1157_vm0, %v1387_v28 }
 0x169 PF: > { %s13_s12 = sadd.s32 1, %s1700_s12  }
 0x16a   : > { %p10_p4 = scmp.ge.s32.totalorder %s13_s12, 4  }
 0x16c   :  { %12 = sbr.rel (!%p10_p4) target bundleno = 1 (0x1), region = 62 }

// kernel: prediction_model_forward.7
= control target key start
LH: loop header
LB: loop body
LE: loop exit
PB: predicated region body
PF: predicated region fallthrough
CT: control target
= control target key end

     0   :  { %s1654_s12 = smov 0   ;;  %s1927_s0 = inlined_call_operand.vmem [shape: bf16[256,640], index: 0, kind: input, shape index: {}]   ;;  %s1928_s1 = inlined_call_operand.vmem [shape: bf16[640,64], index: 1, kind: input, shape index: {}]   ;;  %s1929_s2 = inlined_call_operand.vmem [shape: f32[1,64], index: 2, kind: input, shape index: {}]   ;;  %s1930_s3 = inlined_call_operand.vmem [shape: bf16[256,64], index: 3, kind: output, shape index: {}]  }
   0x1 LB: > { %s1205_s13 = sadd.s32 4294967295, %s1632_s12   ;;  %p1209_p0 = scmp.ge.s32.totalorder %s1632_s12, 1  ;;  %s1632_s12 = sphi %s1654_s12, %s13_s12  }
   0x2   : > { %p139_p1 = scmp.lt.s32.totalorder %s1632_s12, 3 }
   0x4   : > { %p140_p2 = pnand %p1209_p0, %p139_p1 }
   0x5   : > { %v1530_v0 = vld [vmem:[%s1928_s1 + $0x40] sm:$0xff] (!%p140_p2)   ;;  %v1534_v4 = vld [vmem:[%s1928_s1 + $0x48] sm:$0xff] (!%p140_p2)   ;;  %v1538_v8 = vld [vmem:[%s1928_s1 + $0x50] sm:$0xff] (!%p140_p2)   ;;  %s1210_s19 = sshll.u32 (!%p140_p2), %s1205_s13, 4  ;;  %vm1132_vm0 = vcmask (!%p140_p2), 519168  }
   0x6   : > { %143 = sbr.rel (%p140_p2) target bundleno = 334 (0x14e), region = 32  ;;  %v1531_v1 = vld [vmem:[%s1928_s1 + $0xc0] sm:$0xff] (!%p140_p2)   ;;  %1329 = vmatprep.subr.bf16.mxu0 (!%p140_p2), %v1530_v0  ;;  %v1535_v5 = vld [vmem:[%s1928_s1 + $0xc8] sm:$0xff] (!%p140_p2)   ;;  %v1539_v9 = vld [vmem:[%s1928_s1 + $0xd0] sm:$0xff] (!%p140_p2)   ;;  %p165_p3 = scmp.lt.s32.totalorder (!%p140_p2), %s1210_s19, 31 }
   0x7   : > { %v1532_v2 = vld [vmem:[%s1928_s1] sm:$0xff] (!%p140_p2)   ;;  %1393 = vmatprep.subr.bf16.mxu1 (!%p140_p2), %v1531_v1  ;;  %v1536_v6 = vld [vmem:[%s1928_s1 + $0x8] sm:$0xff] (!%p140_p2)   ;;  %v1540_v10 = vld [vmem:[%s1928_s1 + $0x10] sm:$0xff] (!%p140_p2)  }
   0x8   : > { %v1533_v3 = vld [vmem:[%s1928_s1 + $0x80] sm:$0xff] (!%p140_p2)   ;;  %1330 = vmatpush3.bf16.msra.mxu0 (!%p140_p2), %v1532_v2  ;;  %v1537_v7 = vld [vmem:[%s1928_s1 + $0x88] sm:$0xff] (!%p140_p2)   ;;  %v1541_v11 = vld [vmem:[%s1928_s1 + $0x90] sm:$0xff] (!%p140_p2)  }
   0x9   : > { %1394 = vmatpush3.bf16.msra.mxu1 (!%p140_p2), %v1533_v3  ;;  %1331 = vmatprep.subr.bf16.mxu0 (!%p140_p2), %v1534_v4  ;;  %v1542_v12 = vld [vmem:[%s1928_s1 + $0x58] sm:$0xff] (!%p140_p2)   ;;  %v1546_v16 = vld [vmem:[%s1928_s1 + $0x60] sm:$0xff] (!%p140_p2)   ;;  %v1550_v20 = vld [vmem:[%s1928_s1 + $0x68] sm:$0xff] (!%p140_p2)  }
   0xa   : > { %1395 = vmatprep.subr.bf16.mxu1 (!%p140_p2), %v1535_v5  ;;  %v1543_v13 = vld [vmem:[%s1928_s1 + $0xd8] sm:$0xff] (!%p140_p2)   ;;  %v1547_v17 = vld [vmem:[%s1928_s1 + $0xe0] sm:$0xff] (!%p140_p2)   ;;  %v1551_v21 = vld [vmem:[%s1928_s1 + $0xe8] sm:$0xff] (!%p140_p2)  }
   0xb   : > { %v1544_v14 = vld [vmem:[%s1928_s1 + $0x18] sm:$0xff] (!%p140_p2)   ;;  %v1548_v18 = vld [vmem:[%s1928_s1 + $0x20] sm:$0xff] (!%p140_p2)   ;;  %v1552_v22 = vld [vmem:[%s1928_s1 + $0x28] sm:$0xff] (!%p140_p2)  }
   0xc   : > { %1332 = vmatpush3.bf16.msra.mxu0 (!%p140_p2), %v1536_v6  ;;  %v1545_v15 = vld [vmem:[%s1928_s1 + $0x98] sm:$0xff] (!%p140_p2)   ;;  %v1549_v19 = vld [vmem:[%s1928_s1 + $0xa0] sm:$0xff] (!%p140_p2)   ;;  %v1553_v23 = vld [vmem:[%s1928_s1 + $0xa8] sm:$0xff] (!%p140_p2)  }
   0xd   : > { %1396 = vmatpush3.bf16.msra.mxu1 %v1537_v7  ;;  %1333 = vmatprep.subr.bf16.mxu0 %v1538_v8  ;;  %s1932_s19 = smov (!%p165_p3, %s1210_s19), 31  ;;  %v1554_v24 = vld [vmem:[%s1928_s1 + $0x70] sm:$0xff]   ;;  %v1558_v28 = vld [vmem:[%s1928_s1 + $0x78] sm:$0xff]   ;;  %v1568_v36 = vld [vmem:[%s1928_s1 + $0x100] sm:$0xff]  }
   0xe   : > { %1397 = vmatprep.subr.bf16.mxu1 %v1539_v9  ;;  %v1555_v25 = vld [vmem:[%s1928_s1 + $0xf0] sm:$0xff]   ;;  %s1521_s16 = smul.u32 20, %s1932_s19  ;;  %v1559_v29 = vld [vmem:[%s1928_s1 + $0xf8] sm:$0xff]   ;;  %v1575_v39 = vld [vmem:[%s1928_s1 + $0x108] sm:$0xff]   ;;  %s1213_s26 = sshll.u32 %s1932_s19, 2 }
   0xf   : > { %v1556_v26 = vld [vmem:[%s1928_s1 + $0x30] sm:$0xff]   ;;  %v1560_v30 = vld [vmem:[%s1928_s1 + $0x38] sm:$0xff]   ;;  %v1596_v50 = vld [vmem:[%s1928_s1 + $0x120] sm:$0xff]   ;;  %s1882_s19 = scalar_lea.vmem %s1930_s3, %s1213_s26 }
  0x10   : > { %1334 = vmatpush3.bf16.msra.mxu0 %v1540_v10  ;;  %v1557_v27 = vld [vmem:[%s1928_s1 + $0xb0] sm:$0xff]   ;;  %s1760_s13 = scalar_lea.vmem %s1927_s0, %s1521_s16  ;;  %v1561_v31 = vld [vmem:[%s1928_s1 + $0xb8] sm:$0xff]   ;;  %v1603_v51 = vld [vmem:[%s1928_s1 + $0x128] sm:$0xff]  }
  0x11   : > { %1398 = vmatpush3.bf16.msra.mxu1 %v1541_v11  ;;  %1335 = vmatprep.subr.bf16.mxu0 %v1542_v12  ;;  %v1562_v32 = vld [vmem:[%s1760_s13] ss:$20 sps:$4 sm:$0xff]   ;;  %v1564_v33 = vld [vmem:[%s1760_s13 + $0x4] ss:$20 sps:$4 sm:$0xff]   ;;  %v1565_v34 = vld [vmem:[%s1760_s13 + $0x8] ss:$20 sps:$4 sm:$0xff]  }
  0x12   : > { %1399 = vmatprep.subr.bf16.mxu1 %v1543_v13  ;;  %v1567_v35 = vld [vmem:[%s1760_s13 + $0xc] ss:$20 sps:$4 sm:$0xff]   ;;  %793 = vmatprep.mubr.bf16.mxu0 %v1564_v33  ;;  %v1571_v38 = vld [vmem:[%s1760_s13 + $0x34] ss:$20 sps:$4 sm:$0xff]   ;;  %v1574_v41 = vld [vmem:[%s1760_s13 + $0x30] ss:$20 sps:$4 sm:$0xff]  }
  0x13   : > { %890 = vmatprep.mubr.bf16.mxu1 %v1567_v35  ;;  %v1569_v37 = vld [vmem:[%s1760_s13 + $0x2c] ss:$20 sps:$4 sm:$0xff]   ;;  %v1573_v40 = vld [vmem:[%s1760_s13 + $0x28] ss:$20 sps:$4 sm:$0xff]   ;;  %v1582_v44 = vld [vmem:[%s1928_s1 + $0x110] sm:$0xff]  }
  0x14   : > { %1336 = vmatpush3.bf16.msra.mxu0 %v1544_v14  ;;  %v1576_v42 = vld [vmem:[%s1760_s13 + $0x54] ss:$20 sps:$4 sm:$0xff]   ;;  %v1578_v43 = vld [vmem:[%s1760_s13 + $0x5c] ss:$20 sps:$4 sm:$0xff]   ;;  %v1581_v47 = vld [vmem:[%s1760_s13 + $0x58] ss:$20 sps:$4 sm:$0xff]  }
  0x15   : > { %1400 = vmatpush3.bf16.msra.mxu1 %v1545_v15  ;;  %1337 = vmatprep.subr.bf16.mxu0 %v1546_v16  ;;  %v1589_v45 = vld [vmem:[%s1928_s1 + $0x118] sm:$0xff]   ;;  %v1580_v46 = vld [vmem:[%s1760_s13 + $0x50] ss:$20 sps:$4 sm:$0xff]   ;;  %v1588_v53 = vld [vmem:[%s1760_s13 + $0x80] ss:$20 sps:$4 sm:$0xff]  }
  0x16   : > { %1401 = vmatprep.subr.bf16.mxu1 %v1547_v17  ;;  %v1583_v48 = vld [vmem:[%s1760_s13 + $0x7c] ss:$20 sps:$4 sm:$0xff]   ;;  %v1585_v49 = vld [vmem:[%s1760_s13 + $0x84] ss:$20 sps:$4 sm:$0xff]   ;;  %v1592_v56 = vld [vmem:[%s1760_s13 + $0xac] ss:$20 sps:$4 sm:$0xff]  }
  0x17   : > { %v1587_v52 = vld [vmem:[%s1760_s13 + $0x78] ss:$20 sps:$4 sm:$0xff]   ;;  %v1610_v55 = vld [vmem:[%s1928_s1 + $0x130] sm:$0xff]   ;;  %v1595_v59 = vld [vmem:[%s1760_s13 + $0xa8] ss:$20 sps:$4 sm:$0xff]  }
  0x18   : > { %1338 = vmatpush3.bf16.msra.mxu0 %v1548_v18  ;;  %v1590_v54 = vld [vmem:[%s1760_s13 + $0xa4] ss:$20 sps:$4 sm:$0xff]   ;;  %v1594_v58 = vld [vmem:[%s1760_s13 + $0xa0] ss:$20 sps:$4 sm:$0xff]   ;;  %v1601_v62 = vld [vmem:[%s1760_s13 + $0xc8] ss:$20 sps:$4 sm:$0xff]  }
  0x19   : > { %1402 = vmatpush3.bf16.msra.mxu1 %v1549_v19  ;;  %1339 = vmatprep.subr.bf16.mxu0 %v1550_v20  ;;  %v1617_v57 = vld [vmem:[%s1928_s1 + $0x138] sm:$0xff]   ;;  %v1597_v60 = vld [vmem:[%s1760_s13 + $0xcc] ss:$20 sps:$4 sm:$0xff]   ;;  %v1599_v61 = vld [vmem:[%s1760_s13 + $0xd4] ss:$20 sps:$4 sm:$0xff]  }
  0x1a   : > { %1403 = vmatprep.subr.bf16.mxu1 %v1551_v21  ;;  %v1602_v63 = vld [vmem:[%s1760_s13 + $0xd0] ss:$20 sps:$4 sm:$0xff]   ;;  %v1604_v0 = vld [vmem:[%s1760_s13 + $0xf4] ss:$20 sps:$4 sm:$0xff]   ;;  %v1609_v3 = vld [vmem:[%s1760_s13 + $0xf8] ss:$20 sps:$4 sm:$0xff]  }
  0x1b   : > { %v1606_v1 = vld [vmem:[%s1760_s13 + $0xfc] ss:$20 sps:$4 sm:$0xff]   ;;  %v1613_v5 = vld [vmem:[%s1760_s13 + $0x124] ss:$20 sps:$4 sm:$0xff]   ;;  %v1616_v7 = vld [vmem:[%s1760_s13 + $0x120] ss:$20 sps:$4 sm:$0xff]  }
  0x1c   : > { %1340 = vmatpush3.bf16.msra.mxu0 %v1552_v22  ;;  %v1608_v2 = vld [vmem:[%s1760_s13 + $0xf0] ss:$20 sps:$4 sm:$0xff]   ;;  %v1615_v6 = vld [vmem:[%s1760_s13 + $0x118] ss:$20 sps:$4 sm:$0xff]   ;;  %v1622_v12 = vld [vmem:[%s1760_s13 + $0x60] ss:$20 sps:$4 sm:$0xff]  }
  0x1d   : > { %1404 = vmatpush3.bf16.msra.mxu1 %v1553_v23  ;;  %1341 = vmatprep.subr.bf16.mxu0 %v1554_v24  ;;  %v1611_v4 = vld [vmem:[%s1760_s13 + $0x11c] ss:$20 sps:$4 sm:$0xff]   ;;  %v1620_v10 = vld [vmem:[%s1760_s13 + $0x38] ss:$20 sps:$4 sm:$0xff]   ;;  %v1623_v13 = vld [vmem:[%s1760_s13 + $0x100] ss:$20 sps:$4 sm:$0xff]  }
  0x1e   : > { %1405 = vmatprep.subr.bf16.mxu1 %v1555_v25  ;;  %v1618_v8 = vld [vmem:[%s1760_s13 + $0x10] ss:$20 sps:$4 sm:$0xff]   ;;  %v1621_v11 = vld [vmem:[%s1760_s13 + $0xd8] ss:$20 sps:$4 sm:$0xff]   ;;  %v1624_v14 = vld [vmem:[%s1760_s13 + $0x88] ss:$20 sps:$4 sm:$0xff]  }
  0x1f   : > { %v1619_v9 = vld [vmem:[%s1760_s13 + $0xb0] ss:$20 sps:$4 sm:$0xff]   ;;  %v1625_v15 = vld [vmem:[%s1760_s13 + $0x128] ss:$20 sps:$4 sm:$0xff]   ;;  %v1835_v18 = vld [vmem:[%s1929_s2] ss:$0 sm:$0xff] }
  0x20   : > { %1342 = vmatpush3.bf16.msra.mxu0 %v1556_v26 }
  0x21   : > { %1406 = vmatpush3.bf16.msra.mxu1 %v1557_v27  ;;  %1343 = vmatprep.subr.bf16.mxu0 %v1558_v28 }
  0x22   : > { %1407 = vmatprep.subr.bf16.mxu1 %v1559_v29 }
  0x24   : > { %1344 = vmatpush3.bf16.msra.mxu0 %v1560_v30 }
  0x25   : > { %1408 = vmatpush3.bf16.msra.mxu1 %v1561_v31  ;;  %1473 = vmatprep.subr.bf16.mxu0 %v1568_v36 }
  0x26   : > { %1505 = vmatprep.subr.bf16.mxu1 %v1568_v36 }
  0x27   : > { %794 = vmatmul.mubr.bf16.vlgmr.msra.gmra.mrb[0].mxu0 %v1562_v32 }
  0x28   : > { %891 = vmatmul.mubr.bf16.vlgmr.msra.gmra.mrb[0].mxu1 %v1565_v34  ;;  %1474 = vmatpush3.bf16.msra.mxu0 %v1568_v36 }
  0x29   : > { %1513 = vmatpush3.bf16.msra.mxu1 %v1568_v36  ;;  %801 = vmatprep.mubr.bf16.mxu0 %v1569_v37 }
  0x2a   : > { %898 = vmatprep.mubr.bf16.mxu1 %v1571_v38  ;;  %1475 = vmatprep.subr.bf16.mxu0 %v1575_v39 }
  0x2b   : > { %1506 = vmatprep.subr.bf16.mxu1 %v1575_v39 }
  0x2c   : > { %1476 = vmatpush3.bf16.msra.mxu0 %v1575_v39 }
  0x2d   : > { %1514 = vmatpush3.bf16.msra.mxu1 %v1575_v39  ;;  %1477 = vmatprep.subr.bf16.mxu0 %v1582_v44 }
  0x2e   : > { %1507 = vmatprep.subr.bf16.mxu1 %v1582_v44 }
  0x2f   : > { %802 = vmatmul.mubr.bf16.gmra.mrb[4].mxu0 %v1573_v40 }
  0x30   : > { %899 = vmatmul.mubr.bf16.gmra.mrb[4].mxu1 %v1574_v41  ;;  %809 = vmatprep.mubr.bf16.mxu0 %v1576_v42 }
  0x31   : > { %906 = vmatprep.mubr.bf16.mxu1 %v1578_v43  ;;  %1478 = vmatpush3.bf16.msra.mxu0 %v1582_v44 }
  0x32   : > { %1515 = vmatpush3.bf16.msra.mxu1 %v1582_v44  ;;  %1479 = vmatprep.subr.bf16.mxu0 %v1589_v45 }
  0x33   : > { %1508 = vmatprep.subr.bf16.mxu1 %v1589_v45 }
  0x35   : > { %1480 = vmatpush3.bf16.msra.mxu0 %v1589_v45 }
  0x36   : > { %1516 = vmatpush3.bf16.msra.mxu1 %v1589_v45  ;;  %1481 = vmatprep.subr.bf16.mxu0 %v1596_v50 }
  0x37   : > { %810 = vmatmul.mubr.bf16.gmra.mrb[8].mxu0 %v1580_v46  ;;  %1509 = vmatprep.subr.bf16.mxu1 %v1596_v50 }
  0x38   : > { %907 = vmatmul.mubr.bf16.gmra.mrb[8].mxu1 %v1581_v47  ;;  %817 = vmatprep.mubr.bf16.mxu0 %v1583_v48 }
  0x39   : > { %914 = vmatprep.mubr.bf16.mxu1 %v1585_v49  ;;  %1482 = vmatpush3.bf16.msra.mxu0 %v1596_v50 }
  0x3a   : > { %1517 = vmatpush3.bf16.msra.mxu1 %v1596_v50  ;;  %1483 = vmatprep.subr.bf16.mxu0 %v1603_v51 }
  0x3b   : > { %1510 = vmatprep.subr.bf16.mxu1 %v1603_v51 }
  0x3d   : > { %1484 = vmatpush3.bf16.msra.mxu0 %v1603_v51 }
  0x3e   : > { %1518 = vmatpush3.bf16.msra.mxu1 %v1603_v51  ;;  %1485 = vmatprep.subr.bf16.mxu0 %v1610_v55 }
  0x3f   : > { %818 = vmatmul.mubr.bf16.gmra.mrb[12].mxu0 %v1587_v52  ;;  %1511 = vmatprep.subr.bf16.mxu1 %v1610_v55 }
  0x40   : > { %915 = vmatmul.mubr.bf16.gmra.mrb[12].mxu1 %v1588_v53  ;;  %825 = vmatprep.mubr.bf16.mxu0 %v1590_v54 }
  0x41   : > { %922 = vmatprep.mubr.bf16.mxu1 %v1592_v56  ;;  %1486 = vmatpush3.bf16.msra.mxu0 %v1610_v55 }
  0x42   : > { %1519 = vmatpush3.bf16.msra.mxu1 %v1610_v55  ;;  %1487 = vmatprep.subr.bf16.mxu0 %v1617_v57 }
  0x43   : > { %1512 = vmatprep.subr.bf16.mxu1 %v1617_v57 }
  0x45   : > { %1488 = vmatpush3.bf16.msra.mxu0 %v1617_v57 }
  0x46   : > { %1520 = vmatpush3.bf16.msra.mxu1 %v1617_v57 }
  0x47   : > { %826 = vmatmul.mubr.bf16.gmra.mrb[16].mxu0 %v1594_v58 }
  0x48   : > { %923 = vmatmul.mubr.bf16.gmra.mrb[16].mxu1 %v1595_v59  ;;  %833 = vmatprep.mubr.bf16.mxu0 %v1597_v60 }
  0x49   : > { %930 = vmatprep.mubr.bf16.mxu1 %v1599_v61 }
  0x4f   : > { %834 = vmatmul.mubr.bf16.gmra.mrb[20].mxu0 %v1601_v62 }
  0x50   : > { %931 = vmatmul.mubr.bf16.gmra.mrb[20].mxu1 %v1602_v63  ;;  %841 = vmatprep.mubr.bf16.mxu0 %v1604_v0 }
  0x51   : > { %938 = vmatprep.mubr.bf16.mxu1 %v1606_v1 }
  0x57   : > { %842 = vmatmul.mubr.bf16.gmra.mrb[24].mxu0 %v1608_v2 }
  0x58   : > { %939 = vmatmul.mubr.bf16.gmra.mrb[24].mxu1 %v1609_v3  ;;  %849 = vmatprep.mubr.bf16.mxu0 %v1611_v4 }
  0x59   : > { %946 = vmatprep.mubr.bf16.mxu1 %v1613_v5 }
  0x5f   : > { %850 = vmatmul.mubr.bf16.gmra.mrb[28].mxu0 %v1615_v6 }
  0x60   : > { %947 = vmatmul.mubr.bf16.gmra.mrb[28].mxu1 %v1616_v7  ;;  %1489 = vmatprep.mubr.bf16.mxu0 %v1618_v8 }
  0x61   : > { %1497 = vmatprep.mubr.bf16.mxu1 %v1619_v9 }
  0x67   : > { %1490 = vmatmul.mubr.bf16.vlgmr.msra.gmra.mrb[32].mxu0 %v1620_v10 }
  0x68   : > { %1498 = vmatmul.mubr.bf16.vlgmr.msra.gmra.mrb[32].mxu1 %v1621_v11  ;;  %1493 = vmatprep.mubr.bf16.mxu0 %v1622_v12 }
  0x69   : > { %1501 = vmatprep.mubr.bf16.mxu1 %v1623_v13 }
  0x6f   : > { %1494 = vmatmul.mubr.bf16.gmra.mrb[36].mxu0 %v1624_v14 }
  0x70   : > { %1502 = vmatmul.mubr.bf16.gmra.mrb[36].mxu1 %v1625_v15 }
  0xfa   : > { %v1345_v16 = vpop.f32.mrb[0].mxu0 }
  0xfb   : > { %v1409_v17 = vpop.f32.mrb[0].mxu1  ;;  %v1346_v19 = vpop.f32.mrb[1].mxu0 }
  0xfc   : > { %v1347_v20 = vadd.f32 %v1346_v19, %v1345_v16  ;;  %v1410_v21 = vpop.f32.mrb[1].mxu1  ;;  %v1348_v22 = vpop.f32.mrb[2].mxu0 }
  0xfd   : > { %v1411_v23 = vadd.f32 %v1410_v21, %v1409_v17  ;;  %v1412_v24 = vpop.f32.mrb[2].mxu1  ;;  %v1349_v25 = vpop.f32.mrb[3].mxu0 }
  0xfe   : > { %v796_v26 = vadd.f32 %v1347_v20, %v1835_v18  ;;  %v1350_v27 = vadd.f32 %v1349_v25, %v1348_v22  ;;  %v1413_v28 = vpop.f32.mrb[3].mxu1 }
  0xff   : > { %v1414_v29 = vadd.f32 %v1413_v28, %v1412_v24 }
 0x100   : > { %v799_v30 = vadd.f32 %v1350_v27, %v1835_v18  ;;  %v1839_v31 = vadd.f32 %v1411_v23, %v796_v26 }
 0x102   : > { %v1351_v32 = vpop.f32.mrb[4].mxu0  ;;  %v1841_v33 = vadd.f32 %v1414_v29, %v799_v30 }
 0x103   : > { %v1415_v34 = vpop.f32.mrb[4].mxu1  ;;  %v1352_v35 = vpop.f32.mrb[5].mxu0 }
 0x104   : > { %v1353_v36 = vadd.f32 %v1352_v35, %v1351_v32  ;;  %v1416_v37 = vpop.f32.mrb[5].mxu1  ;;  %v1354_v38 = vpop.f32.mrb[6].mxu0 }
 0x105   : > { %v1417_v39 = vadd.f32 %v1416_v37, %v1415_v34  ;;  %v1418_v40 = vpop.f32.mrb[6].mxu1  ;;  %v1355_v41 = vpop.f32.mrb[7].mxu0 }
 0x106   : > { %v804_v42 = vadd.f32 %v1353_v36, %v1835_v18  ;;  %v1356_v43 = vadd.f32 %v1355_v41, %v1354_v38  ;;  %v1419_v44 = vpop.f32.mrb[7].mxu1 }
 0x107   : > { %v1420_v45 = vadd.f32 %v1419_v44, %v1418_v40 }
 0x108   : > { %v807_v46 = vadd.f32 %v1356_v43, %v1835_v18  ;;  %v1845_v47 = vadd.f32 %v1417_v39, %v804_v42 }
 0x10a   : > { %v1357_v48 = vpop.f32.mrb[8].mxu0  ;;  %v1847_v49 = vadd.f32 %v1420_v45, %v807_v46 }
 0x10b   : > { %v1421_v50 = vpop.f32.mrb[8].mxu1  ;;  %v1358_v51 = vpop.f32.mrb[9].mxu0 }
 0x10c   : > { %v1359_v52 = vadd.f32 %v1358_v51, %v1357_v48  ;;  %v1422_v53 = vpop.f32.mrb[9].mxu1  ;;  %v1360_v54 = vpop.f32.mrb[10].mxu0 }
 0x10d   : > { %v1423_v55 = vadd.f32 %v1422_v53, %v1421_v50  ;;  %v1424_v56 = vpop.f32.mrb[10].mxu1  ;;  %v1361_v57 = vpop.f32.mrb[11].mxu0 }
 0x10e   : > { %v812_v58 = vadd.f32 %v1359_v52, %v1835_v18  ;;  %v1362_v59 = vadd.f32 %v1361_v57, %v1360_v54  ;;  %v1425_v60 = vpop.f32.mrb[11].mxu1 }
 0x10f   : > { %v1426_v61 = vadd.f32 %v1425_v60, %v1424_v56 }
 0x110   : > { %v815_v62 = vadd.f32 %v1362_v59, %v1835_v18  ;;  %v1851_v63 = vadd.f32 %v1423_v55, %v812_v58 }
 0x112   : > { %v1363_v0 = vpop.f32.mrb[12].mxu0  ;;  %v1853_v1 = vadd.f32 %v1426_v61, %v815_v62 }
 0x113   : > { %v1427_v2 = vpop.f32.mrb[12].mxu1  ;;  %v1364_v3 = vpop.f32.mrb[13].mxu0 }
 0x114   : > { %v1365_v4 = vadd.f32 %v1364_v3, %v1363_v0  ;;  %v1428_v5 = vpop.f32.mrb[13].mxu1  ;;  %v1366_v6 = vpop.f32.mrb[14].mxu0 }
 0x115   : > { %v1429_v7 = vadd.f32 %v1428_v5, %v1427_v2  ;;  %v1430_v8 = vpop.f32.mrb[14].mxu1  ;;  %v1367_v9 = vpop.f32.mrb[15].mxu0 }
 0x116   : > { %v820_v10 = vadd.f32 %v1365_v4, %v1835_v18  ;;  %v1368_v11 = vadd.f32 %v1367_v9, %v1366_v6  ;;  %v1431_v12 = vpop.f32.mrb[15].mxu1 }
 0x117   : > { %v1432_v13 = vadd.f32 %v1431_v12, %v1430_v8 }
 0x118   : > { %v823_v14 = vadd.f32 %v1368_v11, %v1835_v18  ;;  %v1857_v15 = vadd.f32 %v1429_v7, %v820_v10 }
 0x11a   : > { %v1369_v16 = vpop.f32.mrb[16].mxu0  ;;  %v1859_v17 = vadd.f32 %v1432_v13, %v823_v14 }
 0x11b   : > { %v1433_v19 = vpop.f32.mrb[16].mxu1  ;;  %v1370_v20 = vpop.f32.mrb[17].mxu0 }
 0x11c   : > { %v1371_v21 = vadd.f32 %v1370_v20, %v1369_v16  ;;  %v1434_v22 = vpop.f32.mrb[17].mxu1  ;;  %v1372_v23 = vpop.f32.mrb[18].mxu0 }
 0x11d   : > { %v1435_v24 = vadd.f32 %v1434_v22, %v1433_v19  ;;  %v1436_v25 = vpop.f32.mrb[18].mxu1  ;;  %v1373_v26 = vpop.f32.mrb[19].mxu0 }
 0x11e   : > { %v828_v27 = vadd.f32 %v1371_v21, %v1835_v18  ;;  %v1374_v28 = vadd.f32 %v1373_v26, %v1372_v23  ;;  %v1437_v29 = vpop.f32.mrb[19].mxu1 }
 0x11f   : > { %v1438_v30 = vadd.f32 %v1437_v29, %v1436_v25 }
 0x120   : > { %v831_v32 = vadd.f32 %v1374_v28, %v1835_v18  ;;  %v925_v34 = vadd.f32 %v1435_v24, %v828_v27 }
 0x122   : > { %v1375_v35 = vpop.f32.mrb[20].mxu0  ;;  %v1863_v36 = vadd.f32 %v1438_v30, %v831_v32 }
 0x123   : > { %v1439_v37 = vpop.f32.mrb[20].mxu1  ;;  %v1376_v38 = vpop.f32.mrb[21].mxu0 }
 0x124   : > { %v1377_v39 = vadd.f32 %v1376_v38, %v1375_v35  ;;  %v1440_v40 = vpop.f32.mrb[21].mxu1  ;;  %v1378_v41 = vpop.f32.mrb[22].mxu0 }
 0x125   : > { %v1441_v42 = vadd.f32 %v1440_v40, %v1439_v37  ;;  %v1442_v43 = vpop.f32.mrb[22].mxu1  ;;  %v1379_v44 = vpop.f32.mrb[23].mxu0 }
 0x126   : > { %v836_v45 = vadd.f32 %v1377_v39, %v1835_v18  ;;  %v1380_v46 = vadd.f32 %v1379_v44, %v1378_v41  ;;  %v1443_v48 = vpop.f32.mrb[23].mxu1 }
 0x127   : > { %v1444_v50 = vadd.f32 %v1443_v48, %v1442_v43 }
 0x128   : > { %v839_v51 = vadd.f32 %v1380_v46, %v1835_v18  ;;  %v933_v52 = vadd.f32 %v1441_v42, %v836_v45 }
 0x12a   : > { %v1381_v53 = vpop.f32.mrb[24].mxu0  ;;  %v936_v54 = vadd.f32 %v1444_v50, %v839_v51 }
 0x12b   : > { %v1445_v55 = vpop.f32.mrb[24].mxu1  ;;  %v1382_v56 = vpop.f32.mrb[25].mxu0 }
 0x12c   : > { %v1383_v57 = vadd.f32 %v1382_v56, %v1381_v53  ;;  %v1446_v58 = vpop.f32.mrb[25].mxu1  ;;  %v1384_v59 = vpop.f32.mrb[26].mxu0 }
 0x12d   : > { %v1447_v60 = vadd.f32 %v1446_v58, %v1445_v55  ;;  %v1448_v61 = vpop.f32.mrb[26].mxu1  ;;  %v1385_v62 = vpop.f32.mrb[27].mxu0 }
 0x12e   : > { %v844_v0 = vadd.f32 %v1383_v57, %v1835_v18  ;;  %v1386_v2 = vadd.f32 %v1385_v62, %v1384_v59  ;;  %v1449_v3 = vpop.f32.mrb[27].mxu1 }
 0x12f   : > { %v1450_v4 = vadd.f32 %v1449_v3, %v1448_v61 }
 0x130   : > { %v847_v5 = vadd.f32 %v1386_v2, %v1835_v18  ;;  %v1869_v6 = vadd.f32 %v1447_v60, %v844_v0 }
 0x132   : > { %v1387_v7 = vpop.f32.mrb[28].mxu0  ;;  %v1871_v8 = vadd.f32 %v1450_v4, %v847_v5 }
 0x133   : > { %v1451_v9 = vpop.f32.mrb[28].mxu1  ;;  %v1388_v10 = vpop.f32.mrb[29].mxu0 }
 0x134   : > { %v1389_v11 = vadd.f32 %v1388_v10, %v1387_v7  ;;  %v1452_v12 = vpop.f32.mrb[29].mxu1  ;;  %v1390_v13 = vpop.f32.mrb[30].mxu0 }
 0x135   : > { %v1453_v14 = vadd.f32 %v1452_v12, %v1451_v9  ;;  %v1454_v16 = vpop.f32.mrb[30].mxu1  ;;  %v1391_v19 = vpop.f32.mrb[31].mxu0 }
 0x136   : > { %v852_v20 = vadd.f32 %v1389_v11, %v1835_v18  ;;  %v1392_v21 = vadd.f32 %v1391_v19, %v1390_v13  ;;  %v1455_v22 = vpop.f32.mrb[31].mxu1 }
 0x137   : > { %v1456_v23 = vadd.f32 %v1455_v22, %v1454_v16 }
 0x138   : > { %v855_v24 = vadd.f32 %v1392_v21, %v1835_v18  ;;  %v949_v25 = vadd.f32 %v1453_v14, %v852_v20 }
 0x13a   : > { %v1491_v26 = vpop.f32.mrb[32].mxu0  ;;  %v952_v27 = vadd.f32 %v1456_v23, %v855_v24 }
 0x13b   : > { %v998_v28 = vadd.f32 %v1491_v26, %v1845_v47  ;;  %v1499_v29 = vpop.f32.mrb[32].mxu1  ;;  %v989_v30 = vpop.f32.mrb[33].mxu0 }
 0x13c   : > { %v1030_v32 = vadd.f32 %v1499_v29, %v933_v52  ;;  %v990_v35 = vadd.f32 %v989_v30, %v1839_v31  ;;  %v1021_v37 = vpop.f32.mrb[33].mxu1  ;;  %v1492_v38 = vpop.f32.mrb[34].mxu0 }
 0x13d   : > { %v1054_v39 = vmax.f32 %v998_v28, 0.0  ;;  %v1022_v40 = vadd.f32 %v1021_v37, %v925_v34  ;;  %v1001_v41 = vadd.f32 %v1492_v38, %v1847_v49  ;;  %v1500_v42 = vpop.f32.mrb[34].mxu1  ;;  %v992_v18 = vpop.f32.mrb[35].mxu0 }
 0x13e   : > { %v1062_v47 = vmax.f32 %v1030_v32, 0.0  ;;  %v1052_v43 = vmax.f32 %v990_v35, 0.0  ;;  %v1033_v44 = vadd.f32 %v1500_v42, %v936_v54  ;;  %v993_v31 = vadd.f32 %v992_v18, %v1841_v33  ;;  %v1024_v45 = vpop.f32.mrb[35].mxu1 }
 0x13f   : > { %v1315_v46 = vpack.c.bf16 %v1054_v39, %v1054_v39  ;;  %v1060_v34 = vmax.f32 %v1022_v40, 0.0  ;;  %v1055_v49 = vmax.f32 %v1001_v41, 0.0  ;;  %v1025_v48 = vadd.f32 %v1024_v45, %v1863_v36 }
 0x140   : > { %v1323_v50 = vpack.c.bf16 %v1062_v47, %v1062_v47  ;;  %v1313_v51 = vpack.c.bf16 %v1052_v43, %v1052_v43  ;;  %v1063_v52 = vmax.f32 %v1033_v44, 0.0  ;;  %v1053_v53 = vmax.f32 %v993_v31, 0.0 }
 0x141   : > { %1135 = vst.msk [vmem:[%s1882_s19 + $0x8] sm:$0xf] %vm1132_vm0, %v1315_v46  ;;  %v1321_v54 = vpack.c.bf16 %v1060_v34, %v1060_v34  ;;  %v1316_v55 = vpack.c.bf16 %v1055_v49, %v1055_v49  ;;  %v1061_v56 = vmax.f32 %v1025_v48, 0.0 }
 0x142   : > { %1143 = vst.msk [vmem:[%s1882_s19 + $0x28] sm:$0xf] %vm1132_vm0, %v1323_v50  ;;  %1133 = vst.msk [vmem:[%s1882_s19] sm:$0xf] %vm1132_vm0, %v1313_v51  ;;  %v1324_v33 = vpack.c.bf16 %v1063_v52, %v1063_v52  ;;  %v1314_v57 = vpack.c.bf16 %v1053_v53, %v1053_v53  ;;  %v1495_v58 = vpop.f32.mrb[36].mxu0 }
 0x143   : > { %1141 = vst.msk [vmem:[%s1882_s19 + $0x20] sm:$0xf] %vm1132_vm0, %v1321_v54  ;;  %1136 = vst.msk [vmem:[%s1882_s19 + $0xc] sm:$0xf] %vm1132_vm0, %v1316_v55  ;;  %v1322_v36 = vpack.c.bf16 %v1061_v56, %v1061_v56  ;;  %v1014_v59 = vadd.f32 %v1495_v58, %v1857_v15  ;;  %v1503_v60 = vpop.f32.mrb[36].mxu1  ;;  %v1005_v61 = vpop.f32.mrb[37].mxu0 }
 0x144   : > { %1144 = vst.msk [vmem:[%s1882_s19 + $0x2c] sm:$0xf] %vm1132_vm0, %v1324_v33  ;;  %1134 = vst.msk [vmem:[%s1882_s19 + $0x4] sm:$0xf] %vm1132_vm0, %v1314_v57  ;;  %v1046_v62 = vadd.f32 %v1503_v60, %v949_v25  ;;  %v1006_v0 = vadd.f32 %v1005_v61, %v1851_v63  ;;  %v1037_v2 = vpop.f32.mrb[37].mxu1  ;;  %v1496_v3 = vpop.f32.mrb[38].mxu0 }
 0x145   : > { %1142 = vst.msk [vmem:[%s1882_s19 + $0x24] sm:$0xf] %vm1132_vm0, %v1322_v36  ;;  %v1058_v4 = vmax.f32 %v1014_v59, 0.0  ;;  %v1038_v5 = vadd.f32 %v1037_v2, %v1869_v6  ;;  %v1017_v7 = vadd.f32 %v1496_v3, %v1859_v17  ;;  %v1504_v15 = vpop.f32.mrb[38].mxu1  ;;  %v1008_v9 = vpop.f32.mrb[39].mxu0 }
 0x146   : > { %v1066_v10 = vmax.f32 %v1046_v62, 0.0  ;;  %v1056_v11 = vmax.f32 %v1006_v0, 0.0  ;;  %v1049_v12 = vadd.f32 %v1504_v15, %v952_v27  ;;  %v1009_v13 = vadd.f32 %v1008_v9, %v1853_v1  ;;  %v1040_v63 = vpop.f32.mrb[39].mxu1 }
 0x147   : > { %v1319_v14 = vpack.c.bf16 %v1058_v4, %v1058_v4  ;;  %v1064_v16 = vmax.f32 %v1038_v5, 0.0  ;;  %v1059_v19 = vmax.f32 %v1017_v7, 0.0  ;;  %v1041_v6 = vadd.f32 %v1040_v63, %v1871_v8 }
 0x148   : > { %v1327_v17 = vpack.c.bf16 %v1066_v10, %v1066_v10  ;;  %v1317_v20 = vpack.c.bf16 %v1056_v11, %v1056_v11  ;;  %v1067_v21 = vmax.f32 %v1049_v12, 0.0  ;;  %v1057_v22 = vmax.f32 %v1009_v13, 0.0 }
 0x149   : > { %1139 = vst.msk [vmem:[%s1882_s19 + $0x18] sm:$0xf] %vm1132_vm0, %v1319_v14  ;;  %v1325_v23 = vpack.c.bf16 %v1064_v16, %v1064_v16  ;;  %v1320_v24 = vpack.c.bf16 %v1059_v19, %v1059_v19  ;;  %v1065_v1 = vmax.f32 %v1041_v6, 0.0 }
 0x14a   : > { %1147 = vst.msk [vmem:[%s1882_s19 + $0x38] sm:$0xf] %vm1132_vm0, %v1327_v17  ;;  %1137 = vst.msk [vmem:[%s1882_s19 + $0x10] sm:$0xf] %vm1132_vm0, %v1317_v20  ;;  %v1328_v25 = vpack.c.bf16 %v1067_v21, %v1067_v21  ;;  %v1318_v26 = vpack.c.bf16 %v1057_v22, %v1057_v22 }
 0x14b   : > { %1145 = vst.msk [vmem:[%s1882_s19 + $0x30] sm:$0xf] %vm1132_vm0, %v1325_v23  ;;  %1140 = vst.msk [vmem:[%s1882_s19 + $0x1c] sm:$0xf] %vm1132_vm0, %v1320_v24  ;;  %v1326_v8 = vpack.c.bf16 %v1065_v1, %v1065_v1 }
 0x14c   : > { %1148 = vst.msk [vmem:[%s1882_s19 + $0x3c] sm:$0xf] %vm1132_vm0, %v1328_v25  ;;  %1138 = vst.msk [vmem:[%s1882_s19 + $0x14] sm:$0xf] %vm1132_vm0, %v1318_v26 }
 0x14d   : > { %1146 = vst.msk [vmem:[%s1882_s19 + $0x34] sm:$0xf] %vm1132_vm0, %v1326_v8 }
 0x14e PF: > { %s13_s12 = sadd.s32 1, %s1632_s12  }
 0x14f   : > { %p10_p4 = scmp.ge.s32.totalorder %s13_s12, 4  }
 0x151   :  { %12 = sbr.rel (!%p10_p4) target bundleno = 1 (0x1), region = 62 }

// kernel: eq.1
= control target key start
LH: loop header
LB: loop body
LE: loop exit
PB: predicated region body
PF: predicated region fallthrough
CT: control target
= control target key end

     0   :  { %vm7_vm0 = vcmask 15360   ;;  %vm13_vm1 = vcmask 31760   ;;  %s39_s0 = inlined_call_operand.vmem [shape: s32[2,2], index: 0, kind: input, shape index: {}]   ;;  %s40_s1 = inlined_call_operand.vmem [shape: s32[4], index: 1, kind: output, shape index: {}]  }
   0x1   :  { %v4_v0 = vld [vmem:[%s39_s0] sm:$0x3]  ;;  %s22_s0 = smov 2  }
   0x2   :  { %5 = vst [vmem:[#allocation1] sm:$0x3] %v4_v0 }
   0x9   :  { %v10_v1 = vld [vmem:[#allocation1 + $0x1] sm:$0x1]   ;;  %v6_v2 = vld [vmem:[#allocation1] sm:$0x1]  }
   0xa   :  { %11 = vrot.lane.b32.xlu0 %v10_v1, %s22_s0  ;;  %8 = vst.msk [vmem:[#allocation0] sm:$0x1] %vm7_vm0, %v6_v2  }
  0x7c   :  { %v12_v3 = vpop.permute.xlu0 %11  }
  0x7d   :  { %14 = vst.msk [vmem:[#allocation0] sm:$0x1] %vm13_vm1, %v12_v3  }
  0x84   :  { %v18_v4 = vld [vmem:[#allocation0] sm:$0x1] }
  0x85   :  { %20 = vst [vmem:[%s40_s1] sm:$0x1] %v18_v4 }

// kernel: squeeze.3
= control target key start
LH: loop header
LB: loop body
LE: loop exit
PB: predicated region body
PF: predicated region fallthrough
CT: control target
= control target key end

     0   :  { %s85_s0 = inlined_call_operand.vmem [shape: f32[4], index: 0, kind: input, shape index: {}]   ;;  %s86_s1 = inlined_call_operand.hbm [shape: f32[2,2], index: 1, kind: output, shape index: {}]  }
   0x1   :  { %v5_v0 = vld [vmem:[%s85_s0] sm:$0x1] }
   0x2   :  { %2 = vsyncpa [#allocation1], 0  ;;  %6 = vst [vmem:[#allocation3] sm:$0x1] %v5_v0  ;;  %vm8_vm0 = vcmask 15360   ;;  %s58_s0 = smov 126  }
   0x3   :  { %s59_s8 = smov [#allocation0]  }
   0x4   :  { %s26_s9 = sshll.u32 %s59_s8, 4  ;;  %s27_s9 = int_to_ptr.vmem [resolvable:$true] %s26_s9 }
   0x5   :  { %s34_s10 = scalar_lea.vmem %s27_s9, 32  ;;  %p39_p1 = scmp.lt.s32.totalorder %s27_s9, %s27_s9 }
   0x6   :  { %p35_p0 = scmp.ne.s32.totalorder %s27_s9, %s34_s10  ;;  %p40_p2 = scmp.lt.s32.totalorder %s34_s10, %s34_s10 }
   0x8   :  { %p41_p3 = por %p40_p2, %p39_p1 }
   0x9   :  { %v10_v1 = vld [vmem:[#allocation3] sm:$0x1]  }
   0xa   :  { %v7_v2 = vld [vmem:[#allocation3] sm:$0x1]   ;;  %11 = vrot.lane.b32.xlu0 %v10_v1, %s58_s0  ;;  %p42_p4 = pnand %p41_p3, %p35_p0 }
   0xb   :  { %9 = vst.msk [vmem:[#allocation2] sm:$0x1] %vm8_vm0, %v7_v2  }
  0x7c   :  { %v12_v3 = vpop.permute.xlu0 %11  }
  0x7d   :  { %15 = vst.msk [vmem:[#allocation2 + $0x1] sm:$0x1] %vm8_vm0, %v12_v3  }
  0x84   :  { %v19_v4 = vld [vmem:[#allocation2] sm:$0x3] }
  0x85   :  { %21 = vst [vmem:[#allocation0] sm:$0x3] %v19_v4 }
  0x86   :  { %45 = shalt.err (!%p42_p4)
}
  0x87   :  { %s46_s13 = scalar_lea.hbm %s86_s1, 32 }
  0x88   :  { %p47_p5 = scmp.ne.s32.totalorder %s86_s1, %s46_s13  ;;  %p50_p6 = scmp.lt.u32.totalorder %s46_s13, %s86_s1 }
  0x8a   :  { %p52_p7 = pnand %p50_p6, %p47_p5 }
  0x8c   :  { %55 = shalt.err (!%p52_p7)
}
  0x8d   :  { %29 = dma.vmem_to_hbm [thread:$0]  %s27_s9, 32, %s86_s1, [#allocation1]  }
  0x8e   :  { %56 = dma.done.wait [#allocation1], 32  }
  0x8f   :  { %57 = vsyncadd [#allocation1], 4294967264 }
  0x90   :  { %31 = vsyncpa [#allocation1], 1 }

// kernel: prediction_model_forward.9
= control target key start
LH: loop header
LB: loop body
LE: loop exit
PB: predicated region body
PF: predicated region fallthrough
CT: control target
= control target key end

     0   :  { %vm62_vm0 = vcmask 1042432   ;;  %vm63_vm1 = vcmask 1043456   ;;  %v319_v0 = vmov 0.0   ;;  %v320_v2 = vmov 65535   ;;  %s416_s2 = inlined_call_operand.vmem [shape: bf16[39,32], index: 2, kind: input, shape index: {}]   ;;  %s417_s0 = inlined_call_operand.vmem [shape: bf16[8,39], index: 0, kind: input, shape index: {}]   ;;  %s418_s4 = inlined_call_operand.vmem [shape: bf16[32,32], index: 4, kind: input, shape index: {}]   ;;  %s419_s3 = inlined_call_operand.vmem [shape: f32[1,32], index: 3, kind: input, shape index: {}]   ;;  %s420_s6 = inlined_call_operand.vmem [shape: bf16[32,32], index: 6, kind: input, shape index: {}]   ;;  %s421_s5 = inlined_call_operand.vmem [shape: f32[1,32], index: 5, kind: input, shape index: {}]   ;;  %s422_s1 = inlined_call_operand.vmem [shape: f32[8,32], index: 1, kind: input, shape index: {}]   ;;  %s423_s8 = inlined_call_operand.vmem [shape: f32[8,64], index: 8, kind: output, shape index: {}]   ;;  %s424_s7 = inlined_call_operand.vmem [shape: f32[1,32], index: 7, kind: input, shape index: {}]  }
   0x1   :  { %282 = vmatprep.subr.bf16.mxu0 %v319_v0  ;;  %v312_v1 = vld [vmem:[%s416_s2] sm:$0xff]   ;;  %v64_v3 = vsel %vm62_vm0, 4294967295, %v320_v2  ;;  %292 = vmatprep.subr.bf16.mxu1 %v319_v0  ;;  %v313_v4 = vld [vmem:[%s416_s2 + $0x8] sm:$0xff]   ;;  %v314_v5 = vld [vmem:[%s416_s2 + $0x10] ss:$0 sps:$4 sm:$0xff]   ;;  %vm321_vm2 = vmmov 0  }
   0x2   :  { %283 = vmatpush3.bf16.msra.mxu0 %v312_v1  ;;  %v65_v6 = vsel %vm63_vm1, %v64_v3, 0  ;;  %288 = vmatprep.mubr.msk.bf16.mxu0 %vm321_vm2, %v319_v0  ;;  %v30_v8 = vld [vmem:[%s417_s0] sm:$0xf]  ;;  %vm58_vm3 = vcmask 318464   ;;  %v316_v10 = vld [vmem:[%s418_s4 + $0x8] sm:$0xff]   ;;  %vm134_vm4 = vcmask 261120  }
   0x3   :  { %284 = vmatprep.subr.bf16.mxu0 %v319_v0  ;;  %296 = vmatprep.mubr.msk.bf16.mxu1 %vm321_vm2, %v319_v0  ;;  %v67_v7 = vand.u32 %v314_v5, %v65_v6  ;;  %v315_v9 = vld [vmem:[%s418_s4] sm:$0xff]   ;;  %v318_v20 = vld [vmem:[%s420_s6 + $0x8] sm:$0xff]   ;;  %vm253_vm5 = vcmask 523520  }
   0x4   :  { %293 = vmatpush3.bf16.msra.mxu1 %v315_v9  ;;  %v259_v11 = vld [vmem:[%s419_s3] ss:$0 sm:$0xff] }
   0x5   :  { %294 = vmatprep.subr.bf16.mxu1 %v319_v0  ;;  %v317_v19 = vld [vmem:[%s420_s6] sm:$0xff]  }
   0x6   :  { %285 = vmatpush3.bf16.msra.mxu0 %v313_v4  ;;  %v264_v21 = vld [vmem:[%s421_s5] ss:$0 sm:$0xff] }
   0x7   :  { %286 = vmatprep.subr.bf16.mxu0 %v319_v0  ;;  %v179_v25 = vld [vmem:[%s422_s1] sm:$0xff]  ;;  %s322_s1 = smov 32  }
   0x8   :  { %295 = vmatpush3.bf16.msra.mxu1 %v316_v10  ;;  %v268_v31 = vld [vmem:[%s424_s7] ss:$0 sm:$0xff] }
   0x9   :  { %300 = vmatprep.subr.bf16.mxu1 %v319_v0 }
   0xa   :  { %287 = vmatpush3.bf16.msra.mxu0 %v67_v7 }
   0xd   :  { %289 = vmatmul.mubr.msk.bf16.vlgmr.msra.gmra.mrb[0].mxu0 %vm58_vm3, %v30_v8 }
  0xe0   :  { %v103_v12 = vpop.f32.mrb[0].mxu0 }
  0xe1   :  { %v104_v13 = vadd.f32 %v259_v11, %v103_v12  ;;  %v290_v14 = vpop.f32.mrb[1].mxu0 }
  0xe2   :  { %v106_v15 = vpop.f32.mrb[2].mxu0 }
  0xe3   :  { %v109_v16 = vmax.f32 %v104_v13, 0.0  ;;  %v291_v17 = vpop.f32.mrb[3].mxu0 }
  0xe5   :  { %v110_v18 = vpack.c.bf16 %v109_v16, %v109_v16 }
  0xe7   :  { %297 = vmatmul.mubr.msk.bf16.vlgmr.msra.gmra.mrb[0].mxu1 %vm134_vm4, %v110_v18 }
  0xe8   :  { %304 = vmatprep.mubr.msk.bf16.mxu1 %vm321_vm2, %v319_v0  ;;  %301 = vmatpush3.bf16.msra.mxu1 %v317_v19 }
  0xe9   :  { %302 = vmatprep.subr.bf16.mxu1 %v319_v0 }
  0xec   :  { %303 = vmatpush3.bf16.msra.mxu1 %v318_v20 }
 0x1ba   :  { %v172_v22 = vpop.f32.mrb[0].mxu1 }
 0x1bb   :  { %v173_v23 = vadd.f32 %v264_v21, %v172_v22  ;;  %v298_v24 = vpop.f32.mrb[1].mxu1 }
 0x1bc   :  { %v175_v26 = vpop.f32.mrb[2].mxu1 }
 0x1bd   :  { %v178_v27 = vmax.f32 %v173_v23, 0.0  ;;  %v299_v28 = vpop.f32.mrb[3].mxu1 }
 0x1bf   :  { %v180_v29 = vadd.f32 %v179_v25, %v178_v27 }
 0x1c1   :  { %v181_v30 = vpack.c.bf16 %v180_v29, %v180_v29  ;;  %186 = vst.msk [vmem:[%s423_s8] sm:$0xff] %vm134_vm4, %v180_v29 }
 0x1c3   :  { %305 = vmatmul.mubr.msk.bf16.vlgmr.msra.gmra.mrb[4].mxu1 %vm134_vm4, %v181_v30 }
 0x296   :  { %v243_v32 = vpop.f32.mrb[4].mxu1 }
 0x297   :  { %v244_v33 = vadd.f32 %v268_v31, %v243_v32  ;;  %v306_v34 = vpop.f32.mrb[5].mxu1 }
 0x298   :  { %v246_v35 = vpop.f32.mrb[6].mxu1 }
 0x299   :  { %v307_v36 = vpop.f32.mrb[7].mxu1  ;;  %250 = vrot.lane.b32.xlu0 %v244_v33, %s322_s1 }
 0x30b   :  { %v251_v37 = vpop.permute.xlu0 %250 }
 0x30c   :  { %254 = vst.msk [vmem:[%s423_s8] sm:$0xff] %vm253_vm5, %v251_v37 }

// kernel: prediction_model_forward.8
= control target key start
LH: loop header
LB: loop body
LE: loop exit
PB: predicated region body
PF: predicated region fallthrough
CT: control target
= control target key end

     0   :  { %vm3040_vm0 = vmmov 0   ;;  %vm1696_vm1 = vcmask 523264   ;;  %vm2245_vm2 = vcmask 261120   ;;  %s3713_s1 = inlined_call_operand.vmem [shape: bf16[3136,32], index: 1, kind: input, shape index: {}]   ;;  %s3714_s0 = inlined_call_operand.vmem [shape: bf16[8,3136], index: 0, kind: input, shape index: {}]   ;;  %s3715_s2 = inlined_call_operand.vmem [shape: f32[1,32], index: 2, kind: input, shape index: {}]   ;;  %s3716_s3 = inlined_call_operand.vmem [shape: bf16[32,32], index: 3, kind: input, shape index: {}]   ;;  %s3717_s4 = inlined_call_operand.vmem [shape: f32[1,32], index: 4, kind: input, shape index: {}]   ;;  %s3718_s5 = inlined_call_operand.vmem [shape: f32[8,32], index: 5, kind: output, shape index: {}]  }
   0x1   :  { %v2816_v0 = vld [vmem:[%s3713_s1 + $0x40] sm:$0xff]   ;;  %v2820_v4 = vld [vmem:[%s3713_s1 + $0x48] sm:$0xff]   ;;  %v2824_v8 = vld [vmem:[%s3713_s1 + $0x50] sm:$0xff]  }
   0x2   :  { %v2817_v1 = vld [vmem:[%s3713_s1] sm:$0xff]   ;;  %2522 = vmatprep.subr.bf16.mxu0 %v2816_v0  ;;  %v2821_v5 = vld [vmem:[%s3713_s1 + $0x8] sm:$0xff]   ;;  %v2825_v9 = vld [vmem:[%s3713_s1 + $0x10] sm:$0xff]  }
   0x3   :  { %v2818_v2 = vld [vmem:[%s3713_s1 + $0xc0] sm:$0xff]   ;;  %2523 = vmatpush3.bf16.msra.mxu0 %v2817_v1  ;;  %v2822_v6 = vld [vmem:[%s3713_s1 + $0xc8] sm:$0xff]   ;;  %v2826_v10 = vld [vmem:[%s3713_s1 + $0xd0] sm:$0xff]  }
   0x4   :  { %v2819_v3 = vld [vmem:[%s3713_s1 + $0x80] sm:$0xff]   ;;  %2544 = vmatprep.subr.bf16.mxu1 %v2818_v2  ;;  %2524 = vmatprep.subr.bf16.mxu0 %v2820_v4  ;;  %v2823_v7 = vld [vmem:[%s3713_s1 + $0x88] sm:$0xff]   ;;  %v2827_v11 = vld [vmem:[%s3713_s1 + $0x90] sm:$0xff]  }
   0x5   :  { %2545 = vmatpush3.bf16.msra.mxu1 %v2819_v3  ;;  %v2828_v12 = vld [vmem:[%s3713_s1 + $0x58] sm:$0xff]   ;;  %v2832_v16 = vld [vmem:[%s3713_s1 + $0x60] sm:$0xff]   ;;  %v2836_v20 = vld [vmem:[%s3713_s1 + $0x68] sm:$0xff]  }
   0x6   :  { %2546 = vmatprep.subr.bf16.mxu1 %v2822_v6  ;;  %v2829_v13 = vld [vmem:[%s3713_s1 + $0x18] sm:$0xff]   ;;  %v2833_v17 = vld [vmem:[%s3713_s1 + $0x20] sm:$0xff]   ;;  %v2837_v21 = vld [vmem:[%s3713_s1 + $0x28] sm:$0xff]  }
   0x7   :  { %2525 = vmatpush3.bf16.msra.mxu0 %v2821_v5  ;;  %v2830_v14 = vld [vmem:[%s3713_s1 + $0xd8] sm:$0xff]   ;;  %v2834_v18 = vld [vmem:[%s3713_s1 + $0xe0] sm:$0xff]   ;;  %v2838_v22 = vld [vmem:[%s3713_s1 + $0xe8] sm:$0xff]  }
   0x8   :  { %2526 = vmatprep.subr.bf16.mxu0 %v2824_v8  ;;  %v2831_v15 = vld [vmem:[%s3713_s1 + $0x98] sm:$0xff]   ;;  %v2835_v19 = vld [vmem:[%s3713_s1 + $0xa0] sm:$0xff]   ;;  %v2839_v23 = vld [vmem:[%s3713_s1 + $0xa8] sm:$0xff]  }
   0x9   :  { %2547 = vmatpush3.bf16.msra.mxu1 %v2823_v7  ;;  %v2840_v24 = vld [vmem:[%s3713_s1 + $0x70] sm:$0xff]   ;;  %v2844_v28 = vld [vmem:[%s3713_s1 + $0x78] sm:$0xff]   ;;  %v21_v31 = vld [vmem:[%s3714_s0] sm:$0xff] }
   0xa   :  { %2548 = vmatprep.subr.bf16.mxu1 %v2826_v10  ;;  %v2841_v25 = vld [vmem:[%s3713_s1 + $0x30] sm:$0xff]   ;;  %v2845_v29 = vld [vmem:[%s3713_s1 + $0x38] sm:$0xff]   ;;  %v2296_v32 = vcombine.low %v21_v31, %v21_v31  ;;  %v2297_v33 = vcombine.high %v21_v31, %v21_v31  ;;  %v2850_v35 = vld [vmem:[%s3713_s1 + $0x140] sm:$0xff]  }
   0xb   :  { %2527 = vmatpush3.bf16.msra.mxu0 %v2825_v9  ;;  %v2842_v26 = vld [vmem:[%s3713_s1 + $0xf0] sm:$0xff]   ;;  %v2846_v30 = vld [vmem:[%s3713_s1 + $0xf8] sm:$0xff]   ;;  %v22_v36 = vld [vmem:[%s3714_s0 + $0x8] sm:$0xff] }
   0xc   :  { %2528 = vmatprep.subr.bf16.mxu0 %v2828_v12  ;;  %v2843_v27 = vld [vmem:[%s3713_s1 + $0xb0] sm:$0xff]   ;;  %v2849_v34 = vld [vmem:[%s3713_s1 + $0xb8] sm:$0xff]   ;;  %1732 = vmatprep.mubr.bf16.mxu0 %v2297_v33  ;;  %v2298_v37 = vcombine.low %v22_v36, %v22_v36  ;;  %v2299_v38 = vcombine.high %v22_v36, %v22_v36  ;;  %v2853_v39 = vld [vmem:[%s3713_s1 + $0x100] sm:$0xff]  }
   0xd   :  { %2549 = vmatpush3.bf16.msra.mxu1 %v2827_v11  ;;  %v2854_v40 = vld [vmem:[%s3713_s1 + $0x1c0] sm:$0xff]   ;;  %v2856_v42 = vld [vmem:[%s3713_s1 + $0x148] sm:$0xff]   ;;  %v2860_v46 = vld [vmem:[%s3713_s1 + $0x150] sm:$0xff]  }
   0xe   :  { %2550 = vmatprep.subr.bf16.mxu1 %v2830_v14  ;;  %1772 = vmatprep.mubr.bf16.mxu1 %v2299_v38  ;;  %v2855_v41 = vld [vmem:[%s3713_s1 + $0x180] sm:$0xff]   ;;  %v2857_v43 = vld [vmem:[%s3713_s1 + $0x108] sm:$0xff]   ;;  %v2861_v47 = vld [vmem:[%s3713_s1 + $0x110] sm:$0xff]  }
   0xf   :  { %2529 = vmatpush3.bf16.msra.mxu0 %v2829_v13  ;;  %v2858_v44 = vld [vmem:[%s3713_s1 + $0x1c8] sm:$0xff]   ;;  %v2862_v48 = vld [vmem:[%s3713_s1 + $0x1d0] sm:$0xff]   ;;  %v2864_v50 = vld [vmem:[%s3713_s1 + $0x158] sm:$0xff]  }
  0x10   :  { %2530 = vmatprep.subr.bf16.mxu0 %v2832_v16  ;;  %v2859_v45 = vld [vmem:[%s3713_s1 + $0x188] sm:$0xff]   ;;  %v2863_v49 = vld [vmem:[%s3713_s1 + $0x190] sm:$0xff]   ;;  %v2865_v51 = vld [vmem:[%s3713_s1 + $0x118] sm:$0xff]  }
  0x11   :  { %2551 = vmatpush3.bf16.msra.mxu1 %v2831_v15  ;;  %v2866_v52 = vld [vmem:[%s3713_s1 + $0x1d8] sm:$0xff]   ;;  %v2868_v54 = vld [vmem:[%s3713_s1 + $0x160] sm:$0xff]   ;;  %v2872_v58 = vld [vmem:[%s3713_s1 + $0x168] sm:$0xff]  }
  0x12   :  { %2552 = vmatprep.subr.bf16.mxu1 %v2834_v18  ;;  %v2867_v53 = vld [vmem:[%s3713_s1 + $0x198] sm:$0xff]   ;;  %v2869_v55 = vld [vmem:[%s3713_s1 + $0x120] sm:$0xff]   ;;  %v2873_v59 = vld [vmem:[%s3713_s1 + $0x128] sm:$0xff]  }
  0x13   :  { %2531 = vmatpush3.bf16.msra.mxu0 %v2833_v17  ;;  %v2870_v56 = vld [vmem:[%s3713_s1 + $0x1e0] sm:$0xff]   ;;  %v2874_v60 = vld [vmem:[%s3713_s1 + $0x1e8] sm:$0xff]   ;;  %v2876_v62 = vld [vmem:[%s3713_s1 + $0x170] sm:$0xff]  }
  0x14   :  { %2532 = vmatprep.subr.bf16.mxu0 %v2836_v20  ;;  %v2871_v57 = vld [vmem:[%s3713_s1 + $0x1a0] sm:$0xff]   ;;  %v2875_v61 = vld [vmem:[%s3713_s1 + $0x1a8] sm:$0xff]   ;;  %v2877_v63 = vld [vmem:[%s3713_s1 + $0x130] sm:$0xff]  }
  0x15   :  { %2553 = vmatpush3.bf16.msra.mxu1 %v2835_v19  ;;  %v2878_v0 = vld [vmem:[%s3713_s1 + $0x1f0] sm:$0xff]   ;;  %v2880_v2 = vld [vmem:[%s3713_s1 + $0x178] sm:$0xff]   ;;  %v2886_v9 = vld [vmem:[%s3713_s1 + $0x240] sm:$0xff]  }
  0x16   :  { %2554 = vmatprep.subr.bf16.mxu1 %v2838_v22  ;;  %v2879_v1 = vld [vmem:[%s3713_s1 + $0x1b0] sm:$0xff]   ;;  %v2881_v3 = vld [vmem:[%s3713_s1 + $0x138] sm:$0xff]   ;;  %v2889_v13 = vld [vmem:[%s3713_s1 + $0x200] sm:$0xff]  }
  0x17   :  { %2533 = vmatpush3.bf16.msra.mxu0 %v2837_v21  ;;  %v2882_v4 = vld [vmem:[%s3713_s1 + $0x1f8] sm:$0xff]   ;;  %v23_v5 = vld [vmem:[%s3714_s0 + $0x10] sm:$0xff]  ;;  %v2890_v14 = vld [vmem:[%s3713_s1 + $0x2c0] sm:$0xff]  }
  0x18   :  { %2534 = vmatprep.subr.bf16.mxu0 %v2840_v24  ;;  %v2300_v6 = vcombine.low %v23_v5, %v23_v5  ;;  %v2301_v7 = vcombine.high %v23_v5, %v23_v5  ;;  %v2885_v8 = vld [vmem:[%s3713_s1 + $0x1b8] sm:$0xff]   ;;  %v2891_v15 = vld [vmem:[%s3713_s1 + $0x280] sm:$0xff]   ;;  %v2892_v16 = vld [vmem:[%s3713_s1 + $0x248] sm:$0xff]  }
  0x19   :  { %2555 = vmatpush3.bf16.msra.mxu1 %v2839_v23  ;;  %v24_v10 = vld [vmem:[%s3714_s0 + $0x18] sm:$0xff]  ;;  %v2893_v17 = vld [vmem:[%s3713_s1 + $0x208] sm:$0xff]   ;;  %v2896_v20 = vld [vmem:[%s3713_s1 + $0x250] sm:$0xff]  }
  0x1a   :  { %2556 = vmatprep.subr.bf16.mxu1 %v2842_v26  ;;  %v2302_v11 = vcombine.low %v24_v10, %v24_v10  ;;  %v2303_v12 = vcombine.high %v24_v10, %v24_v10  ;;  %v2894_v18 = vld [vmem:[%s3713_s1 + $0x2c8] sm:$0xff]   ;;  %v2897_v21 = vld [vmem:[%s3713_s1 + $0x210] sm:$0xff]   ;;  %v2900_v24 = vld [vmem:[%s3713_s1 + $0x258] sm:$0xff]  }
  0x1b   :  { %2535 = vmatpush3.bf16.msra.mxu0 %v2841_v25  ;;  %v2895_v19 = vld [vmem:[%s3713_s1 + $0x288] sm:$0xff]   ;;  %v2898_v22 = vld [vmem:[%s3713_s1 + $0x2d0] sm:$0xff]   ;;  %v2901_v25 = vld [vmem:[%s3713_s1 + $0x218] sm:$0xff]  }
  0x1c   :  { %2536 = vmatprep.subr.bf16.mxu0 %v2844_v28  ;;  %v2899_v23 = vld [vmem:[%s3713_s1 + $0x290] sm:$0xff]   ;;  %v2902_v26 = vld [vmem:[%s3713_s1 + $0x2d8] sm:$0xff]   ;;  %v2904_v28 = vld [vmem:[%s3713_s1 + $0x260] sm:$0xff]  }
  0x1d   :  { %2557 = vmatpush3.bf16.msra.mxu1 %v2843_v27  ;;  %v2903_v27 = vld [vmem:[%s3713_s1 + $0x298] sm:$0xff]   ;;  %v2907_v31 = vld [vmem:[%s3713_s1 + $0x2a0] sm:$0xff]   ;;  %v2909_v33 = vld [vmem:[%s3713_s1 + $0x228] sm:$0xff]  }
  0x1e   :  { %2558 = vmatprep.subr.bf16.mxu1 %v2846_v30  ;;  %v2906_v30 = vld [vmem:[%s3713_s1 + $0x2e0] sm:$0xff]   ;;  %v2912_v36 = vld [vmem:[%s3713_s1 + $0x270] sm:$0xff]  }
  0x1f   :  { %2537 = vmatpush3.bf16.msra.mxu0 %v2845_v29  ;;  %v2905_v29 = vld [vmem:[%s3713_s1 + $0x220] sm:$0xff]   ;;  %v2914_v38 = vld [vmem:[%s3713_s1 + $0x2f0] sm:$0xff]  }
  0x20   :  { %2566 = vmatprep.subr.bf16.mxu0 %v2850_v35  ;;  %v2911_v35 = vld [vmem:[%s3713_s1 + $0x2a8] sm:$0xff]   ;;  %v2943_v5 = vld [vmem:[%s3713_s1 + $0x3a0] sm:$0xff]   ;;  %v2948_v10 = vld [vmem:[%s3713_s1 + $0x370] sm:$0xff]  }
  0x21   :  { %2559 = vmatpush3.bf16.msra.mxu1 %v2849_v34  ;;  %v2910_v34 = vld [vmem:[%s3713_s1 + $0x2e8] sm:$0xff]  }
  0x22   :  { %1733 = vmatmul.mubr.bf16.vlgmr.msra.gmra.mrb[0].mxu0 %v2296_v32  ;;  %2588 = vmatprep.subr.bf16.mxu1 %v2854_v40  ;;  %v2908_v32 = vld [vmem:[%s3713_s1 + $0x268] sm:$0xff]   ;;  %v2916_v40 = vld [vmem:[%s3713_s1 + $0x278] sm:$0xff]  }
  0x23   :  { %2567 = vmatpush3.bf16.msra.mxu0 %v2853_v39  ;;  %1812 = vmatprep.mubr.bf16.mxu0 %v2301_v7  ;;  %v2915_v39 = vld [vmem:[%s3713_s1 + $0x2b0] sm:$0xff]   ;;  %v2945_v7 = vld [vmem:[%s3713_s1 + $0x328] sm:$0xff]  }
  0x24   :  { %1773 = vmatmul.mubr.bf16.vlgmr.msra.gmra.mrb[0].mxu1 %v2298_v37  ;;  %2568 = vmatprep.subr.bf16.mxu0 %v2856_v42  ;;  %v2913_v37 = vld [vmem:[%s3713_s1 + $0x230] sm:$0xff]   ;;  %v2918_v42 = vld [vmem:[%s3713_s1 + $0x2f8] sm:$0xff]  }
  0x25   :  { %2589 = vmatpush3.bf16.msra.mxu1 %v2855_v41  ;;  %1852 = vmatprep.mubr.bf16.mxu1 %v2303_v12  ;;  %v2917_v41 = vld [vmem:[%s3713_s1 + $0x238] sm:$0xff]   ;;  %v2950_v12 = vld [vmem:[%s3713_s1 + $0x3f0] sm:$0xff]  }
  0x26   :  { %2590 = vmatprep.subr.bf16.mxu1 %v2858_v44 }
  0x27   :  { %2569 = vmatpush3.bf16.msra.mxu0 %v2857_v43  ;;  %v25_v43 = vld [vmem:[%s3714_s0 + $0x20] sm:$0xff] }
  0x28   :  { %2570 = vmatprep.subr.bf16.mxu0 %v2860_v46  ;;  %v2304_v44 = vcombine.low %v25_v43, %v25_v43  ;;  %v2921_v46 = vld [vmem:[%s3713_s1 + $0x2b8] sm:$0xff]  }
  0x29   :  { %2591 = vmatpush3.bf16.msra.mxu1 %v2859_v45  ;;  %v2305_v45 = vcombine.high %v25_v43, %v25_v43  ;;  %v2979_v43 = vld [vmem:[%s3713_s1 + $0x4a0] sm:$0xff]  }
  0x2a   :  { %2592 = vmatprep.subr.bf16.mxu1 %v2862_v48  ;;  %v26_v48 = vld [vmem:[%s3714_s0 + $0x28] sm:$0xff] }
  0x2b   :  { %2571 = vmatpush3.bf16.msra.mxu0 %v2861_v47  ;;  %v2922_v47 = vld [vmem:[%s3713_s1 + $0x340] sm:$0xff]  }
  0x2c   :  { %2572 = vmatprep.subr.bf16.mxu0 %v2864_v50  ;;  %v2307_v50 = vcombine.high %v26_v48, %v26_v48 }
  0x2d   :  { %2593 = vmatpush3.bf16.msra.mxu1 %v2863_v49  ;;  %v2306_v49 = vcombine.low %v26_v48, %v26_v48  ;;  %v2984_v48 = vld [vmem:[%s3713_s1 + $0x470] sm:$0xff]  }
  0x2e   :  { %2594 = vmatprep.subr.bf16.mxu1 %v2866_v52  ;;  %v2926_v52 = vld [vmem:[%s3713_s1 + $0x3c0] sm:$0xff]  }
  0x2f   :  { %2573 = vmatpush3.bf16.msra.mxu0 %v2865_v51  ;;  %v2925_v51 = vld [vmem:[%s3713_s1 + $0x300] sm:$0xff]  }
  0x30   :  { %2574 = vmatprep.subr.bf16.mxu0 %v2868_v54  ;;  %v2928_v54 = vld [vmem:[%s3713_s1 + $0x348] sm:$0xff]  }
  0x31   :  { %2595 = vmatpush3.bf16.msra.mxu1 %v2867_v53  ;;  %v2927_v53 = vld [vmem:[%s3713_s1 + $0x380] sm:$0xff]  }
  0x32   :  { %2596 = vmatprep.subr.bf16.mxu1 %v2870_v56  ;;  %v2930_v56 = vld [vmem:[%s3713_s1 + $0x3c8] sm:$0xff]  }
  0x33   :  { %2575 = vmatpush3.bf16.msra.mxu0 %v2869_v55  ;;  %v2929_v55 = vld [vmem:[%s3713_s1 + $0x308] sm:$0xff]  }
  0x34   :  { %2576 = vmatprep.subr.bf16.mxu0 %v2872_v58  ;;  %v2932_v58 = vld [vmem:[%s3713_s1 + $0x350] sm:$0xff]  }
  0x35   :  { %2597 = vmatpush3.bf16.msra.mxu1 %v2871_v57  ;;  %v2931_v57 = vld [vmem:[%s3713_s1 + $0x388] sm:$0xff]  }
  0x36   :  { %2598 = vmatprep.subr.bf16.mxu1 %v2874_v60  ;;  %v2934_v60 = vld [vmem:[%s3713_s1 + $0x3d0] sm:$0xff]  }
  0x37   :  { %2577 = vmatpush3.bf16.msra.mxu0 %v2873_v59  ;;  %v2933_v59 = vld [vmem:[%s3713_s1 + $0x310] sm:$0xff]  }
  0x38   :  { %2578 = vmatprep.subr.bf16.mxu0 %v2876_v62  ;;  %v2936_v62 = vld [vmem:[%s3713_s1 + $0x358] sm:$0xff]  }
  0x39   :  { %2599 = vmatpush3.bf16.msra.mxu1 %v2875_v61  ;;  %v2935_v61 = vld [vmem:[%s3713_s1 + $0x390] sm:$0xff]  }
  0x3a   :  { %2600 = vmatprep.subr.bf16.mxu1 %v2878_v0  ;;  %v2938_v0 = vld [vmem:[%s3713_s1 + $0x3d8] sm:$0xff]  }
  0x3b   :  { %2579 = vmatpush3.bf16.msra.mxu0 %v2877_v63  ;;  %v2937_v63 = vld [vmem:[%s3713_s1 + $0x318] sm:$0xff]  }
  0x3c   :  { %2580 = vmatprep.subr.bf16.mxu0 %v2880_v2  ;;  %v2940_v2 = vld [vmem:[%s3713_s1 + $0x360] sm:$0xff]  }
  0x3d   :  { %2601 = vmatpush3.bf16.msra.mxu1 %v2879_v1  ;;  %v2939_v1 = vld [vmem:[%s3713_s1 + $0x398] sm:$0xff]  }
  0x3e   :  { %2602 = vmatprep.subr.bf16.mxu1 %v2882_v4  ;;  %v2942_v4 = vld [vmem:[%s3713_s1 + $0x3e0] sm:$0xff]  }
  0x3f   :  { %2581 = vmatpush3.bf16.msra.mxu0 %v2881_v3  ;;  %v2941_v3 = vld [vmem:[%s3713_s1 + $0x320] sm:$0xff]  }
  0x40   :  { %2610 = vmatprep.subr.bf16.mxu0 %v2886_v9  ;;  %v2947_v9 = vld [vmem:[%s3713_s1 + $0x3a8] sm:$0xff]  }
  0x41   :  { %2603 = vmatpush3.bf16.msra.mxu1 %v2885_v8  ;;  %v2946_v8 = vld [vmem:[%s3713_s1 + $0x3e8] sm:$0xff]  }
  0x42   :  { %1813 = vmatmul.mubr.bf16.vlgmr.msra.gmra.mrb[4].mxu0 %v2300_v6  ;;  %2632 = vmatprep.subr.bf16.mxu1 %v2890_v14  ;;  %v2944_v6 = vld [vmem:[%s3713_s1 + $0x368] sm:$0xff]   ;;  %v2952_v14 = vld [vmem:[%s3713_s1 + $0x378] sm:$0xff]  }
  0x43   :  { %2611 = vmatpush3.bf16.msra.mxu0 %v2889_v13  ;;  %1892 = vmatprep.mubr.bf16.mxu0 %v2305_v45  ;;  %v2951_v13 = vld [vmem:[%s3713_s1 + $0x3b0] sm:$0xff]   ;;  %v2981_v45 = vld [vmem:[%s3713_s1 + $0x428] sm:$0xff]  }
  0x44   :  { %1853 = vmatmul.mubr.bf16.vlgmr.msra.gmra.mrb[4].mxu1 %v2302_v11  ;;  %2612 = vmatprep.subr.bf16.mxu0 %v2892_v16  ;;  %v2949_v11 = vld [vmem:[%s3713_s1 + $0x330] sm:$0xff]   ;;  %v2954_v16 = vld [vmem:[%s3713_s1 + $0x3f8] sm:$0xff]  }
  0x45   :  { %2633 = vmatpush3.bf16.msra.mxu1 %v2891_v15  ;;  %1932 = vmatprep.mubr.bf16.mxu1 %v2307_v50  ;;  %v2953_v15 = vld [vmem:[%s3713_s1 + $0x338] sm:$0xff]   ;;  %v2986_v50 = vld [vmem:[%s3713_s1 + $0x4f0] sm:$0xff]  }
  0x46   :  { %2634 = vmatprep.subr.bf16.mxu1 %v2894_v18 }
  0x47   :  { %2613 = vmatpush3.bf16.msra.mxu0 %v2893_v17  ;;  %v27_v17 = vld [vmem:[%s3714_s0 + $0x30] sm:$0xff] }
  0x48   :  { %2614 = vmatprep.subr.bf16.mxu0 %v2896_v20  ;;  %v2308_v18 = vcombine.low %v27_v17, %v27_v17  ;;  %v2957_v20 = vld [vmem:[%s3713_s1 + $0x3b8] sm:$0xff]  }
  0x49   :  { %2635 = vmatpush3.bf16.msra.mxu1 %v2895_v19  ;;  %v2309_v19 = vcombine.high %v27_v17, %v27_v17  ;;  %v3015_v17 = vld [vmem:[%s3713_s1 + $0x5a0] sm:$0xff]  }
  0x4a   :  { %2636 = vmatprep.subr.bf16.mxu1 %v2898_v22  ;;  %v28_v22 = vld [vmem:[%s3714_s0 + $0x38] sm:$0xff] }
  0x4b   :  { %2615 = vmatpush3.bf16.msra.mxu0 %v2897_v21  ;;  %v2958_v21 = vld [vmem:[%s3713_s1 + $0x440] sm:$0xff]  }
  0x4c   :  { %2616 = vmatprep.subr.bf16.mxu0 %v2900_v24  ;;  %v2311_v24 = vcombine.high %v28_v22, %v28_v22 }
  0x4d   :  { %2637 = vmatpush3.bf16.msra.mxu1 %v2899_v23  ;;  %v2310_v23 = vcombine.low %v28_v22, %v28_v22  ;;  %v3020_v22 = vld [vmem:[%s3713_s1 + $0x570] sm:$0xff]  }
  0x4e   :  { %2638 = vmatprep.subr.bf16.mxu1 %v2902_v26  ;;  %v2962_v26 = vld [vmem:[%s3713_s1 + $0x4c0] sm:$0xff]  }
  0x4f   :  { %2617 = vmatpush3.bf16.msra.mxu0 %v2901_v25  ;;  %v2961_v25 = vld [vmem:[%s3713_s1 + $0x400] sm:$0xff]  }
  0x50   :  { %2618 = vmatprep.subr.bf16.mxu0 %v2904_v28  ;;  %v2964_v28 = vld [vmem:[%s3713_s1 + $0x448] sm:$0xff]  }
  0x51   :  { %2639 = vmatpush3.bf16.msra.mxu1 %v2903_v27  ;;  %v2963_v27 = vld [vmem:[%s3713_s1 + $0x480] sm:$0xff]  }
  0x52   :  { %2640 = vmatprep.subr.bf16.mxu1 %v2906_v30  ;;  %v2966_v30 = vld [vmem:[%s3713_s1 + $0x4c8] sm:$0xff]  }
  0x53   :  { %2619 = vmatpush3.bf16.msra.mxu0 %v2905_v29  ;;  %v2965_v29 = vld [vmem:[%s3713_s1 + $0x408] sm:$0xff]  }
  0x54   :  { %2620 = vmatprep.subr.bf16.mxu0 %v2908_v32  ;;  %v2968_v32 = vld [vmem:[%s3713_s1 + $0x450] sm:$0xff]  }
  0x55   :  { %2641 = vmatpush3.bf16.msra.mxu1 %v2907_v31  ;;  %v2967_v31 = vld [vmem:[%s3713_s1 + $0x488] sm:$0xff]  }
  0x56   :  { %2642 = vmatprep.subr.bf16.mxu1 %v2910_v34  ;;  %v2970_v34 = vld [vmem:[%s3713_s1 + $0x4d0] sm:$0xff]  }
  0x57   :  { %2621 = vmatpush3.bf16.msra.mxu0 %v2909_v33  ;;  %v2969_v33 = vld [vmem:[%s3713_s1 + $0x410] sm:$0xff]  }
  0x58   :  { %2622 = vmatprep.subr.bf16.mxu0 %v2912_v36  ;;  %v2972_v36 = vld [vmem:[%s3713_s1 + $0x458] sm:$0xff]  }
  0x59   :  { %2643 = vmatpush3.bf16.msra.mxu1 %v2911_v35  ;;  %v2971_v35 = vld [vmem:[%s3713_s1 + $0x490] sm:$0xff]  }
  0x5a   :  { %2644 = vmatprep.subr.bf16.mxu1 %v2914_v38  ;;  %v2974_v38 = vld [vmem:[%s3713_s1 + $0x4d8] sm:$0xff]  }
  0x5b   :  { %2623 = vmatpush3.bf16.msra.mxu0 %v2913_v37  ;;  %v2973_v37 = vld [vmem:[%s3713_s1 + $0x418] sm:$0xff]  }
  0x5c   :  { %2624 = vmatprep.subr.bf16.mxu0 %v2916_v40  ;;  %v2976_v40 = vld [vmem:[%s3713_s1 + $0x460] sm:$0xff]  }
  0x5d   :  { %2645 = vmatpush3.bf16.msra.mxu1 %v2915_v39  ;;  %v2975_v39 = vld [vmem:[%s3713_s1 + $0x498] sm:$0xff]  }
  0x5e   :  { %2646 = vmatprep.subr.bf16.mxu1 %v2918_v42  ;;  %v2978_v42 = vld [vmem:[%s3713_s1 + $0x4e0] sm:$0xff]  }
  0x5f   :  { %2625 = vmatpush3.bf16.msra.mxu0 %v2917_v41  ;;  %v2977_v41 = vld [vmem:[%s3713_s1 + $0x420] sm:$0xff]  }
  0x60   :  { %2654 = vmatprep.subr.bf16.mxu0 %v2922_v47  ;;  %v2983_v47 = vld [vmem:[%s3713_s1 + $0x4a8] sm:$0xff]  }
  0x61   :  { %2647 = vmatpush3.bf16.msra.mxu1 %v2921_v46  ;;  %v2982_v46 = vld [vmem:[%s3713_s1 + $0x4e8] sm:$0xff]  }
  0x62   :  { %1893 = vmatmul.mubr.bf16.vlgmr.msra.gmra.mrb[8].mxu0 %v2304_v44  ;;  %2676 = vmatprep.subr.bf16.mxu1 %v2926_v52  ;;  %v2980_v44 = vld [vmem:[%s3713_s1 + $0x468] sm:$0xff]   ;;  %v2988_v52 = vld [vmem:[%s3713_s1 + $0x478] sm:$0xff]  }
  0x63   :  { %2655 = vmatpush3.bf16.msra.mxu0 %v2925_v51  ;;  %1972 = vmatprep.mubr.bf16.mxu0 %v2309_v19  ;;  %v2987_v51 = vld [vmem:[%s3713_s1 + $0x4b0] sm:$0xff]   ;;  %v3017_v19 = vld [vmem:[%s3713_s1 + $0x528] sm:$0xff]  }
  0x64   :  { %1933 = vmatmul.mubr.bf16.vlgmr.msra.gmra.mrb[8].mxu1 %v2306_v49  ;;  %2656 = vmatprep.subr.bf16.mxu0 %v2928_v54  ;;  %v2985_v49 = vld [vmem:[%s3713_s1 + $0x430] sm:$0xff]   ;;  %v2990_v54 = vld [vmem:[%s3713_s1 + $0x4f8] sm:$0xff]  }
  0x65   :  { %2677 = vmatpush3.bf16.msra.mxu1 %v2927_v53  ;;  %2012 = vmatprep.mubr.bf16.mxu1 %v2311_v24  ;;  %v2989_v53 = vld [vmem:[%s3713_s1 + $0x438] sm:$0xff]   ;;  %v3022_v24 = vld [vmem:[%s3713_s1 + $0x5f0] sm:$0xff]  }
  0x66   :  { %2678 = vmatprep.subr.bf16.mxu1 %v2930_v56 }
  0x67   :  { %2657 = vmatpush3.bf16.msra.mxu0 %v2929_v55  ;;  %v29_v55 = vld [vmem:[%s3714_s0 + $0x40] sm:$0xff] }
  0x68   :  { %2658 = vmatprep.subr.bf16.mxu0 %v2932_v58  ;;  %v2312_v56 = vcombine.low %v29_v55, %v29_v55  ;;  %v2993_v58 = vld [vmem:[%s3713_s1 + $0x4b8] sm:$0xff]  }
  0x69   :  { %2679 = vmatpush3.bf16.msra.mxu1 %v2931_v57  ;;  %v2313_v57 = vcombine.high %v29_v55, %v29_v55 }
  0x6a   :  { %2680 = vmatprep.subr.bf16.mxu1 %v2934_v60  ;;  %v30_v60 = vld [vmem:[%s3714_s0 + $0x48] sm:$0xff] }
  0x6b   :  { %2659 = vmatpush3.bf16.msra.mxu0 %v2933_v59  ;;  %v2994_v59 = vld [vmem:[%s3713_s1 + $0x540] sm:$0xff]  }
  0x6c   :  { %2660 = vmatprep.subr.bf16.mxu0 %v2936_v62  ;;  %v2315_v62 = vcombine.high %v30_v60, %v30_v60 }
  0x6d   :  { %2681 = vmatpush3.bf16.msra.mxu1 %v2935_v61  ;;  %v2314_v61 = vcombine.low %v30_v60, %v30_v60 }
  0x6e   :  { %2682 = vmatprep.subr.bf16.mxu1 %v2938_v0  ;;  %v2998_v0 = vld [vmem:[%s3713_s1 + $0x5c0] sm:$0xff]  }
  0x6f   :  { %2661 = vmatpush3.bf16.msra.mxu0 %v2937_v63  ;;  %v2997_v63 = vld [vmem:[%s3713_s1 + $0x500] sm:$0xff]  }
  0x70   :  { %2662 = vmatprep.subr.bf16.mxu0 %v2940_v2  ;;  %v3000_v2 = vld [vmem:[%s3713_s1 + $0x548] sm:$0xff]  }
  0x71   :  { %2683 = vmatpush3.bf16.msra.mxu1 %v2939_v1  ;;  %v2999_v1 = vld [vmem:[%s3713_s1 + $0x580] sm:$0xff]  }
  0x72   :  { %2684 = vmatprep.subr.bf16.mxu1 %v2942_v4  ;;  %v3002_v4 = vld [vmem:[%s3713_s1 + $0x5c8] sm:$0xff]  }
  0x73   :  { %2663 = vmatpush3.bf16.msra.mxu0 %v2941_v3  ;;  %v3001_v3 = vld [vmem:[%s3713_s1 + $0x508] sm:$0xff]  }
  0x74   :  { %2664 = vmatprep.subr.bf16.mxu0 %v2944_v6  ;;  %v3004_v6 = vld [vmem:[%s3713_s1 + $0x550] sm:$0xff]  }
  0x75   :  { %2685 = vmatpush3.bf16.msra.mxu1 %v2943_v5  ;;  %v3003_v5 = vld [vmem:[%s3713_s1 + $0x588] sm:$0xff]  }
  0x76   :  { %2686 = vmatprep.subr.bf16.mxu1 %v2946_v8  ;;  %v3006_v8 = vld [vmem:[%s3713_s1 + $0x5d0] sm:$0xff]  }
  0x77   :  { %2665 = vmatpush3.bf16.msra.mxu0 %v2945_v7  ;;  %v3005_v7 = vld [vmem:[%s3713_s1 + $0x510] sm:$0xff]  }
  0x78   :  { %2666 = vmatprep.subr.bf16.mxu0 %v2948_v10  ;;  %v3008_v10 = vld [vmem:[%s3713_s1 + $0x558] sm:$0xff]  }
  0x79   :  { %2687 = vmatpush3.bf16.msra.mxu1 %v2947_v9  ;;  %v3007_v9 = vld [vmem:[%s3713_s1 + $0x590] sm:$0xff]  }
  0x7a   :  { %2688 = vmatprep.subr.bf16.mxu1 %v2950_v12  ;;  %v3010_v12 = vld [vmem:[%s3713_s1 + $0x5d8] sm:$0xff]  }
  0x7b   :  { %2667 = vmatpush3.bf16.msra.mxu0 %v2949_v11  ;;  %v3009_v11 = vld [vmem:[%s3713_s1 + $0x518] sm:$0xff]  }
  0x7c   :  { %2668 = vmatprep.subr.bf16.mxu0 %v2952_v14  ;;  %v3012_v14 = vld [vmem:[%s3713_s1 + $0x560] sm:$0xff]  }
  0x7d   :  { %2689 = vmatpush3.bf16.msra.mxu1 %v2951_v13  ;;  %v3011_v13 = vld [vmem:[%s3713_s1 + $0x598] sm:$0xff]  }
  0x7e   :  { %2690 = vmatprep.subr.bf16.mxu1 %v2954_v16  ;;  %v3014_v16 = vld [vmem:[%s3713_s1 + $0x5e0] sm:$0xff]  }
  0x7f   :  { %2669 = vmatpush3.bf16.msra.mxu0 %v2953_v15  ;;  %v3013_v15 = vld [vmem:[%s3713_s1 + $0x520] sm:$0xff]  }
  0x80   :  { %2698 = vmatprep.subr.bf16.mxu0 %v2958_v21  ;;  %v3019_v21 = vld [vmem:[%s3713_s1 + $0x5a8] sm:$0xff]  }
  0x81   :  { %2691 = vmatpush3.bf16.msra.mxu1 %v2957_v20  ;;  %v3018_v20 = vld [vmem:[%s3713_s1 + $0x5e8] sm:$0xff]  }
  0x82   :  { %1973 = vmatmul.mubr.bf16.vlgmr.msra.gmra.mrb[12].mxu0 %v2308_v18  ;;  %2720 = vmatprep.subr.bf16.mxu1 %v2962_v26  ;;  %v3016_v18 = vld [vmem:[%s3713_s1 + $0x568] sm:$0xff]   ;;  %v3024_v26 = vld [vmem:[%s3713_s1 + $0x578] sm:$0xff]  }
  0x83   :  { %2699 = vmatpush3.bf16.msra.mxu0 %v2961_v25  ;;  %2052 = vmatprep.mubr.bf16.mxu0 %v2313_v57  ;;  %v3023_v25 = vld [vmem:[%s3713_s1 + $0x5b0] sm:$0xff]  }
  0x84   :  { %2013 = vmatmul.mubr.bf16.vlgmr.msra.gmra.mrb[12].mxu1 %v2310_v23  ;;  %2700 = vmatprep.subr.bf16.mxu0 %v2964_v28  ;;  %v3021_v23 = vld [vmem:[%s3713_s1 + $0x530] sm:$0xff]   ;;  %v3026_v28 = vld [vmem:[%s3713_s1 + $0x5f8] sm:$0xff]  }
  0x85   :  { %2721 = vmatpush3.bf16.msra.mxu1 %v2963_v27  ;;  %2092 = vmatprep.mubr.bf16.mxu1 %v2315_v62  ;;  %v3025_v27 = vld [vmem:[%s3713_s1 + $0x538] sm:$0xff]  }
  0x86   :  { %2722 = vmatprep.subr.bf16.mxu1 %v2966_v30 }
  0x87   :  { %2701 = vmatpush3.bf16.msra.mxu0 %v2965_v29  ;;  %v31_v29 = vld [vmem:[%s3714_s0 + $0x50] sm:$0xff] }
  0x88   :  { %2702 = vmatprep.subr.bf16.mxu0 %v2968_v32  ;;  %v2316_v30 = vcombine.low %v31_v29, %v31_v29  ;;  %v3029_v32 = vld [vmem:[%s3713_s1 + $0x5b8] sm:$0xff]  }
  0x89   :  { %2723 = vmatpush3.bf16.msra.mxu1 %v2967_v31  ;;  %v2317_v31 = vcombine.high %v31_v29, %v31_v29 }
  0x8a   :  { %2724 = vmatprep.subr.bf16.mxu1 %v2970_v34  ;;  %v3039_v34 = vmov 0.0  }
  0x8b   :  { %2703 = vmatpush3.bf16.msra.mxu0 %v2969_v33  ;;  %v32_v33 = vld [vmem:[%s3714_s0 + $0x58] sm:$0xff] }
  0x8c   :  { %2704 = vmatprep.subr.bf16.mxu0 %v2972_v36  ;;  %v2319_v36 = vcombine.high %v32_v33, %v32_v33 }
  0x8d   :  { %2725 = vmatpush3.bf16.msra.mxu1 %v2971_v35  ;;  %v2318_v35 = vcombine.low %v32_v33, %v32_v33 }
  0x8e   :  { %2726 = vmatprep.subr.bf16.mxu1 %v2974_v38  ;;  %v3033_v38 = vld [vmem:[%s3713_s1 + $0x608] sm:$0xff]  }
  0x8f   :  { %2705 = vmatpush3.bf16.msra.mxu0 %v2973_v37  ;;  %v3032_v37 = vld [vmem:[%s3713_s1 + $0x600] sm:$0xff]  }
  0x90   :  { %2706 = vmatprep.subr.bf16.mxu0 %v2976_v40  ;;  %v3035_v40 = vld [vmem:[%s3713_s1 + $0x618] sm:$0xff]  }
  0x91   :  { %2727 = vmatpush3.bf16.msra.mxu1 %v2975_v39  ;;  %v3034_v39 = vld [vmem:[%s3713_s1 + $0x610] sm:$0xff]  }
  0x92   :  { %2728 = vmatprep.subr.bf16.mxu1 %v2978_v42 }
  0x93   :  { %2707 = vmatpush3.bf16.msra.mxu0 %v2977_v41  ;;  %v3036_v41 = vld [vmem:[%s3714_s0 + $0x60] ss:$0 sps:$4 sm:$0xff]  }
  0x94   :  { %2708 = vmatprep.subr.bf16.mxu0 %v2980_v44 }
  0x95   :  { %2729 = vmatpush3.bf16.msra.mxu1 %v2979_v43  ;;  %v2295_v43 = vld [vmem:[%s3715_s2] ss:$0 sm:$0xff] }
  0x96   :  { %2730 = vmatprep.subr.bf16.mxu1 %v2982_v46 }
  0x97   :  { %2709 = vmatpush3.bf16.msra.mxu0 %v2981_v45 }
  0x98   :  { %2710 = vmatprep.subr.bf16.mxu0 %v2984_v48 }
  0x99   :  { %2731 = vmatpush3.bf16.msra.mxu1 %v2983_v47 }
  0x9a   :  { %2732 = vmatprep.subr.bf16.mxu1 %v2986_v50 }
  0x9b   :  { %2711 = vmatpush3.bf16.msra.mxu0 %v2985_v49 }
  0x9c   :  { %2712 = vmatprep.subr.bf16.mxu0 %v2988_v52 }
  0x9d   :  { %2733 = vmatpush3.bf16.msra.mxu1 %v2987_v51 }
  0x9e   :  { %2734 = vmatprep.subr.bf16.mxu1 %v2990_v54 }
  0x9f   :  { %2713 = vmatpush3.bf16.msra.mxu0 %v2989_v53 }
  0xa0   :  { %2742 = vmatprep.subr.bf16.mxu0 %v2994_v59 }
  0xa1   :  { %2735 = vmatpush3.bf16.msra.mxu1 %v2993_v58 }
  0xa2   :  { %2053 = vmatmul.mubr.bf16.vlgmr.msra.gmra.mrb[16].mxu0 %v2312_v56  ;;  %2764 = vmatprep.subr.bf16.mxu1 %v2998_v0 }
  0xa3   :  { %2743 = vmatpush3.bf16.msra.mxu0 %v2997_v63  ;;  %2132 = vmatprep.mubr.bf16.mxu0 %v2317_v31 }
  0xa4   :  { %2093 = vmatmul.mubr.bf16.vlgmr.msra.gmra.mrb[16].mxu1 %v2314_v61  ;;  %2744 = vmatprep.subr.bf16.mxu0 %v3000_v2 }
  0xa5   :  { %2765 = vmatpush3.bf16.msra.mxu1 %v2999_v1  ;;  %2172 = vmatprep.mubr.bf16.mxu1 %v2319_v36 }
  0xa6   :  { %2766 = vmatprep.subr.bf16.mxu1 %v3002_v4  ;;  %v3038_v4 = vld [vmem:[%s3716_s3 + $0x8] sm:$0xff]  }
  0xa7   :  { %2745 = vmatpush3.bf16.msra.mxu0 %v3001_v3  ;;  %v3037_v3 = vld [vmem:[%s3716_s3] sm:$0xff]  }
  0xa8   :  { %2746 = vmatprep.subr.bf16.mxu0 %v3004_v6 }
  0xa9   :  { %2767 = vmatpush3.bf16.msra.mxu1 %v3003_v5 }
  0xaa   :  { %2768 = vmatprep.subr.bf16.mxu1 %v3006_v8 }
  0xab   :  { %2747 = vmatpush3.bf16.msra.mxu0 %v3005_v7 }
  0xac   :  { %2748 = vmatprep.subr.bf16.mxu0 %v3008_v10 }
  0xad   :  { %2769 = vmatpush3.bf16.msra.mxu1 %v3007_v9 }
  0xae   :  { %2770 = vmatprep.subr.bf16.mxu1 %v3010_v12 }
  0xaf   :  { %2749 = vmatpush3.bf16.msra.mxu0 %v3009_v11 }
  0xb0   :  { %2750 = vmatprep.subr.bf16.mxu0 %v3012_v14 }
  0xb1   :  { %2771 = vmatpush3.bf16.msra.mxu1 %v3011_v13 }
  0xb2   :  { %2772 = vmatprep.subr.bf16.mxu1 %v3014_v16 }
  0xb3   :  { %2751 = vmatpush3.bf16.msra.mxu0 %v3013_v15 }
  0xb4   :  { %2752 = vmatprep.subr.bf16.mxu0 %v3016_v18 }
  0xb5   :  { %2773 = vmatpush3.bf16.msra.mxu1 %v3015_v17 }
  0xb6   :  { %2774 = vmatprep.subr.bf16.mxu1 %v3018_v20 }
  0xb7   :  { %2753 = vmatpush3.bf16.msra.mxu0 %v3017_v19 }
  0xb8   :  { %2754 = vmatprep.subr.bf16.mxu0 %v3020_v22 }
  0xb9   :  { %2775 = vmatpush3.bf16.msra.mxu1 %v3019_v21 }
  0xba   :  { %2776 = vmatprep.subr.bf16.mxu1 %v3022_v24 }
  0xbb   :  { %2755 = vmatpush3.bf16.msra.mxu0 %v3021_v23 }
  0xbc   :  { %2756 = vmatprep.subr.bf16.mxu0 %v3024_v26 }
  0xbd   :  { %2777 = vmatpush3.bf16.msra.mxu1 %v3023_v25 }
  0xbe   :  { %2778 = vmatprep.subr.bf16.mxu1 %v3026_v28 }
  0xbf   :  { %2757 = vmatpush3.bf16.msra.mxu0 %v3025_v27 }
  0xc0   :  { %2794 = vmatprep.subr.bf16.mxu0 %v3039_v34 }
  0xc1   :  { %2779 = vmatpush3.bf16.msra.mxu1 %v3029_v32 }
  0xc2   :  { %2133 = vmatmul.mubr.bf16.vlgmr.msra.gmra.mrb[20].mxu0 %v2316_v30  ;;  %2806 = vmatprep.subr.bf16.mxu1 %v3039_v34 }
  0xc3   :  { %2795 = vmatpush3.bf16.msra.mxu0 %v3032_v37  ;;  %2802 = vmatprep.mubr.msk.bf16.mxu0 %vm3040_vm0, %v3039_v34 }
  0xc4   :  { %2173 = vmatmul.mubr.bf16.vlgmr.msra.gmra.mrb[20].mxu1 %v2318_v35  ;;  %2796 = vmatprep.subr.bf16.mxu0 %v3039_v34 }
  0xc5   :  { %2810 = vmatprep.mubr.msk.bf16.mxu1 %vm3040_vm0, %v3039_v34  ;;  %2807 = vmatpush3.bf16.msra.mxu1 %v3037_v3 }
  0xc6   :  { %2808 = vmatprep.subr.bf16.mxu1 %v3039_v34 }
  0xc7   :  { %2797 = vmatpush3.bf16.msra.mxu0 %v3033_v38 }
  0xc8   :  { %2798 = vmatprep.subr.bf16.mxu0 %v3039_v34 }
  0xc9   :  { %2809 = vmatpush3.bf16.msra.mxu1 %v3038_v4 }
  0xcb   :  { %2799 = vmatpush3.bf16.msra.mxu0 %v3034_v39 }
  0xcc   :  { %2800 = vmatprep.subr.bf16.mxu0 %v3039_v34 }
  0xcf   :  { %2801 = vmatpush3.bf16.msra.mxu0 %v3035_v40 }
  0xd2   :  { %2803 = vmatmul.mubr.msk.bf16.vlgmr.msra.gmra.mrb[24].mxu0 %vm1696_vm1, %v3036_v41 }
  0xf5   :  { %v2538_v42 = vpop.f32.mrb[0].mxu0 }
  0xf6   :  { %v2539_v44 = vpop.f32.mrb[1].mxu0 }
  0xf7   :  { %v2540_v45 = vadd.f32 %v2539_v44, %v2538_v42  ;;  %v2541_v46 = vpop.f32.mrb[2].mxu0  ;;  %v2560_v47 = vpop.f32.mrb[0].mxu1 }
  0xf8   :  { %v2542_v48 = vpop.f32.mrb[3].mxu0  ;;  %v2561_v49 = vpop.f32.mrb[1].mxu1 }
  0xf9   :  { %v1735_v50 = vadd.f32 %v2540_v45, %v2295_v43  ;;  %v2562_v51 = vadd.f32 %v2561_v49, %v2560_v47  ;;  %v2563_v52 = vpop.f32.mrb[2].mxu1 }
  0xfa   :  { %v2564_v53 = vpop.f32.mrb[3].mxu1 }
  0xfb   :  { %v1775_v54 = vadd.f32 %v2562_v51, %v1735_v50 }
 0x115   :  { %v2582_v55 = vpop.f32.mrb[4].mxu0 }
 0x116   :  { %v2583_v56 = vpop.f32.mrb[5].mxu0 }
 0x117   :  { %v2584_v57 = vadd.f32 %v2583_v56, %v2582_v55  ;;  %v2585_v58 = vpop.f32.mrb[6].mxu0  ;;  %v2604_v59 = vpop.f32.mrb[4].mxu1 }
 0x118   :  { %v2586_v60 = vpop.f32.mrb[7].mxu0  ;;  %v2605_v62 = vpop.f32.mrb[5].mxu1 }
 0x119   :  { %v1815_v61 = vadd.f32 %v2584_v57, %v1775_v54  ;;  %v2606_v63 = vadd.f32 %v2605_v62, %v2604_v59  ;;  %v2607_v0 = vpop.f32.mrb[6].mxu1  ;;  %v2518_v60 = vld [vmem:[%s3717_s4] ss:$0 sm:$0xff] }
 0x11a   :  { %v2608_v1 = vpop.f32.mrb[7].mxu1 }
 0x11b   :  { %v1855_v2 = vadd.f32 %v2606_v63, %v1815_v61 }
 0x135   :  { %v2626_v5 = vpop.f32.mrb[8].mxu0 }
 0x136   :  { %v2627_v6 = vpop.f32.mrb[9].mxu0 }
 0x137   :  { %v2628_v7 = vadd.f32 %v2627_v6, %v2626_v5  ;;  %v2629_v8 = vpop.f32.mrb[10].mxu0  ;;  %v2648_v9 = vpop.f32.mrb[8].mxu1 }
 0x138   :  { %v2630_v10 = vpop.f32.mrb[11].mxu0  ;;  %v2649_v11 = vpop.f32.mrb[9].mxu1 }
 0x139   :  { %v1895_v12 = vadd.f32 %v2628_v7, %v1855_v2  ;;  %v2650_v13 = vadd.f32 %v2649_v11, %v2648_v9  ;;  %v2651_v14 = vpop.f32.mrb[10].mxu1 }
 0x13a   :  { %v2652_v15 = vpop.f32.mrb[11].mxu1 }
 0x13b   :  { %v1935_v16 = vadd.f32 %v2650_v13, %v1895_v12 }
 0x155   :  { %v2670_v17 = vpop.f32.mrb[12].mxu0 }
 0x156   :  { %v2671_v18 = vpop.f32.mrb[13].mxu0 }
 0x157   :  { %v2672_v19 = vadd.f32 %v2671_v18, %v2670_v17  ;;  %v2673_v20 = vpop.f32.mrb[14].mxu0  ;;  %v2692_v21 = vpop.f32.mrb[12].mxu1 }
 0x158   :  { %v2674_v22 = vpop.f32.mrb[15].mxu0  ;;  %v2693_v23 = vpop.f32.mrb[13].mxu1 }
 0x159   :  { %v1975_v24 = vadd.f32 %v2672_v19, %v1935_v16  ;;  %v2694_v25 = vadd.f32 %v2693_v23, %v2692_v21  ;;  %v2695_v26 = vpop.f32.mrb[14].mxu1 }
 0x15a   :  { %v2696_v27 = vpop.f32.mrb[15].mxu1 }
 0x15b   :  { %v2015_v28 = vadd.f32 %v2694_v25, %v1975_v24 }
 0x175   :  { %v2714_v29 = vpop.f32.mrb[16].mxu0 }
 0x176   :  { %v2715_v30 = vpop.f32.mrb[17].mxu0 }
 0x177   :  { %v2716_v31 = vadd.f32 %v2715_v30, %v2714_v29  ;;  %v2717_v32 = vpop.f32.mrb[18].mxu0  ;;  %v2736_v33 = vpop.f32.mrb[16].mxu1 }
 0x178   :  { %v2718_v34 = vpop.f32.mrb[19].mxu0  ;;  %v2737_v36 = vpop.f32.mrb[17].mxu1 }
 0x179   :  { %v2055_v35 = vadd.f32 %v2716_v31, %v2015_v28  ;;  %v2738_v37 = vadd.f32 %v2737_v36, %v2736_v33  ;;  %v2739_v38 = vpop.f32.mrb[18].mxu1 }
 0x17a   :  { %v2740_v39 = vpop.f32.mrb[19].mxu1 }
 0x17b   :  { %v2095_v40 = vadd.f32 %v2738_v37, %v2055_v35 }
 0x195   :  { %v2758_v41 = vpop.f32.mrb[20].mxu0 }
 0x196   :  { %v2759_v42 = vpop.f32.mrb[21].mxu0 }
 0x197   :  { %v2760_v43 = vadd.f32 %v2759_v42, %v2758_v41  ;;  %v2761_v44 = vpop.f32.mrb[22].mxu0  ;;  %v2780_v45 = vpop.f32.mrb[20].mxu1 }
 0x198   :  { %v2762_v46 = vpop.f32.mrb[23].mxu0  ;;  %v2781_v47 = vpop.f32.mrb[21].mxu1 }
 0x199   :  { %v2135_v48 = vadd.f32 %v2760_v43, %v2095_v40  ;;  %v2782_v49 = vadd.f32 %v2781_v47, %v2780_v45  ;;  %v2783_v50 = vpop.f32.mrb[22].mxu1 }
 0x19a   :  { %v2784_v51 = vpop.f32.mrb[23].mxu1 }
 0x19b   :  { %v2175_v52 = vadd.f32 %v2782_v49, %v2135_v48 }
 0x1a5   :  { %v2214_v53 = vpop.f32.mrb[24].mxu0 }
 0x1a6   :  { %v2215_v54 = vadd.f32 %v2214_v53, %v2175_v52  ;;  %v2804_v55 = vpop.f32.mrb[25].mxu0 }
 0x1a7   :  { %v2217_v56 = vpop.f32.mrb[26].mxu0 }
 0x1a8   :  { %v2220_v57 = vmax.f32 %v2215_v54, 0.0  ;;  %v2805_v58 = vpop.f32.mrb[27].mxu0 }
 0x1aa   :  { %v2221_v59 = vpack.c.bf16 %v2220_v57, %v2220_v57 }
 0x1ac   :  { %2811 = vmatmul.mubr.msk.bf16.vlgmr.msra.gmra.mrb[24].mxu1 %vm2245_vm2, %v2221_v59 }
 0x27f   :  { %v2283_v61 = vpop.f32.mrb[24].mxu1 }
 0x280   :  { %v2284_v62 = vadd.f32 %v2518_v60, %v2283_v61  ;;  %v2812_v63 = vpop.f32.mrb[25].mxu1 }
 0x281   :  { %v2286_v0 = vpop.f32.mrb[26].mxu1 }
 0x282   :  { %v2289_v1 = vmax.f32 %v2284_v62, 0.0  ;;  %v2813_v2 = vpop.f32.mrb[27].mxu1 }
 0x284   :  { %2290 = vst.msk [vmem:[%s3718_s5] sm:$0xff] %vm2245_vm2, %v2289_v1 }

</bundles_post_ra>
